<compile_context>
chip_gen: v7x
topology: tpu7x:2x2x1
jax: 0.10.0
libtpu: 0.0.40
codegen_flags: <defaults>
</compile_context>

<pallas_src>
import jax
import jax.numpy as jnp
from jax.experimental import pallas as pl
from jax.experimental.pallas import tpu as pltpu

EPS = 1e-5


def _round_up(x, m):
    return ((x + m - 1) // m) * m


# ----------------------------------------------------------------------------- in-kernel helpers
def _ln(h, gamma, beta):
    # single-pass LayerNorm; variance clamped at 0 to avoid rsqrt of a tiny negative
    mu = jnp.mean(h, axis=-1, keepdims=True)
    var = jnp.maximum(jnp.mean(h * h, axis=-1, keepdims=True) - mu * mu, 0.0)
    return (h - mu) * jax.lax.rsqrt(var + EPS) * gamma + beta


def _sigmoid_eup(g):
    # exp + approximate reciprocal both land on the EUP slot (keeps the f32 VALU path free)
    return pl.reciprocal(1.0 + jnp.exp(-g), approx=True)


def _glu(pre, d):
    # F.glu: first half linear, second half gate
    return pre[:, :d] * _sigmoid_eup(pre[:, d:])


def _shift_down_mat(n):
    # (n, n) 0/1 matrix S with S[r, r-1] = 1  =>  (S @ x)[r] = x[r-1], row 0 = 0
    r = jax.lax.broadcasted_iota(jnp.int32, (n, n), 0)
    c = jax.lax.broadcasted_iota(jnp.int32, (n, n), 1)
    return jnp.where(r == c + 1, 1.0, 0.0).astype(jnp.bfloat16)


def _interleave_mats(n):
    # Pe (2n, n): row 2m selects m ; Po (2n, n): row 2m+1 selects m
    r = jax.lax.broadcasted_iota(jnp.int32, (2 * n, n), 0)
    c = jax.lax.broadcasted_iota(jnp.int32, (2 * n, n), 1)
    pe = jnp.where(r == 2 * c, 1.0, 0.0).astype(jnp.bfloat16)
    po = jnp.where(r == 2 * c + 1, 1.0, 0.0).astype(jnp.bfloat16)
    return pe, po


def _deconv_glu_ln_layer(xb, w01, w2, b_ag, gamma, beta):
    """One ConvTranspose1d(stride=2, k=3) + GLU + LayerNorm layer, fully in registers.

    xb  : (R, D) bf16 activation, rows 0..R-2 valid, row R-1 == 0 (invariant).
    w01 : (D, 4D) bf16 = [Wa0|Wg0|Wa1|Wg1]   w2: (D, 2D) bf16 = [Wa2|Wg2]
    b_ag: (1, 2D) f32  = [ba|bg]             gamma/beta: (1, D) f32
    Returns (2R, D) bf16, rows 0..2R-2 valid, row 2R-1 == 0 (invariant preserved).
    """
    R = xb.shape[0]
    d = gamma.shape[-1]
    # tap-2 operand x[m-1] via an exact 0/1 shift matmul (no sublane shift-slice relayout)
    xs = jnp.dot(_shift_down_mat(R), xb,
                 preferred_element_type=jnp.float32).astype(jnp.bfloat16)
    r01 = jnp.dot(xb, w01, preferred_element_type=jnp.float32)    # (R, 4D) [ae0|ge0|ao|go]
    r2 = jnp.dot(xs, w2, preferred_element_type=jnp.float32)      # (R, 2D) [ae2|ge2]
    even_pre = r01[:, :2 * d] + r2 + b_ag      # output positions 2m   : tap0(x[m]) + tap2(x[m-1])
    odd_pre = r01[:, 2 * d:] + b_ag            # output positions 2m+1 : tap1(x[m])
    y_e = _ln(_glu(even_pre, d), gamma, beta)  # (R, D)
    y_o = _ln(_glu(odd_pre, d), gamma, beta)   # (R, D); row R-1 (pos 2R-1) is past valid length
    rows = jax.lax.broadcasted_iota(jnp.int32, y_o.shape, 0)
    y_o = jnp.where(rows == R - 1, 0.0, y_o)
    # even/odd interleave as two 0/1 permutation matmuls (exact copies; avoids reshape/strided
    # stores and keeps the result ready for the next layer's matmul as bf16)
    pe, po = _interleave_mats(R)
    x_next = (jnp.dot(pe, y_e.astype(jnp.bfloat16), preferred_element_type=jnp.float32)
              + jnp.dot(po, y_o.astype(jnp.bfloat16), preferred_element_type=jnp.float32))
    return x_next.astype(jnp.bfloat16)


# ----------------------------------------------------------------------------- fused kernel
def _decoder_kernel(latent_ref, emb_w_ref, emb_b_ref, pre_g_ref, pre_b_ref,
                    w01_ref, w2_ref, bag_ref, lng_ref, lnb_ref,
                    og_ref, ob_ref, pw_ref, pb_ref,
                    logits_ref, act_ref):
    vt = pl.program_id(1)
    num_layers = w01_ref.shape[0]
    s_valid = latent_ref.shape[1] - 1          # latent is padded with one zero row

    @pl.when(vt == 0)
    def _build_activation():
        # latent Linear -> (Dropout=identity) -> LayerNorm
        lat = latent_ref[0].astype(jnp.bfloat16)                        # (S+1, Vl)
        h = jnp.dot(lat, emb_w_ref[...],
                    preferred_element_type=jnp.float32) + emb_b_ref[...]
        x = _ln(h, pre_g_ref[...], pre_b_ref[...])                       # (S+1, D) f32
        rows = jax.lax.broadcasted_iota(jnp.int32, x.shape, 0)
        x = jnp.where(rows == s_valid, 0.0, x)   # enforce trailing zero row (conv boundary)
        x = x.astype(jnp.bfloat16)
        for i in range(num_layers):              # static loop; shapes grow (S+1) -> 2(S+1) -> ...
            x = _deconv_glu_ln_layer(x, w01_ref[i], w2_ref[i],
                                     bag_ref[i], lng_ref[i], lnb_ref[i])
        # output_proj LayerNorm; post-LN activation persists in VMEM across vocab tiles
        act_ref[...] = _ln(x.astype(jnp.float32), og_ref[...], ob_ref[...])

    # projection for this vocab tile (only HBM store; 128-lane multiple => unmasked stores)
    logits_ref[0] = (jnp.dot(act_ref[...].astype(jnp.bfloat16), pw_ref[...],
                             preferred_element_type=jnp.float32) + pb_ref[...])


# ----------------------------------------------------------------------------- packing
def pack_params(p, layers):
    """Pre-stack per-tap / GLU-half weights into MXU-friendly bf16 operands (no zero blocks)."""
    D = p["emb_w"].shape[1]
    vout = p["out_w"].shape[1]
    vpad = _round_up(vout, 128)
    w01, w2, bag, lng, lnb = [], [], [], [], []
    for i in range(layers):
        wa, wg = p["wa"][i], p["wg"][i]                               # (3, D, D) each
        assert wa.shape[0] == 3, "kernel assumes window == 3"
        w01.append(jnp.concatenate([wa[0], wg[0], wa[1], wg[1]], axis=1))   # (D, 4D)
        w2.append(jnp.concatenate([wa[2], wg[2]], axis=1))                  # (D, 2D)
        bag.append(jnp.concatenate([p["ba"][i], p["bg"][i]]).reshape(1, 2 * D))
        lng.append(p["ln_g"][i].reshape(1, D))
        lnb.append(p["ln_b"][i].reshape(1, D))
    return {
        "emb_w": p["emb_w"].astype(jnp.bfloat16),
        "emb_b": p["emb_b"].reshape(1, D),
        "pre_g": p["pre_g"].reshape(1, D),
        "pre_b": p["pre_b"].reshape(1, D),
        "w01": jnp.stack(w01).astype(jnp.bfloat16),      # (layers, D, 4D)
        "w2": jnp.stack(w2).astype(jnp.bfloat16),        # (layers, D, 2D)
        "bag": jnp.stack(bag),                           # (layers, 1, 2D)
        "lng": jnp.stack(lng),                           # (layers, 1, D)
        "lnb": jnp.stack(lnb),                           # (layers, 1, D)
        "out_ln_g": p["out_ln_g"].reshape(1, D),
        "out_ln_b": p["out_ln_b"].reshape(1, D),
        "proj_w": jnp.pad(p["out_w"], ((0, 0), (0, vpad - vout))).astype(jnp.bfloat16),
        "proj_b": jnp.pad(p["out_b"], (0, vpad - vout)).reshape(1, vpad),
    }


def _vocab_tile(vpad):
    for t in (512, 256):
        if vpad % t == 0:
            return t
    return 128


# ----------------------------------------------------------------------------- model
def deconv_decoder_forward(latent_words, mask, params, *, layers=3, stride=2):
    """Pallas version of DeconvDecoder.forward (inference: dropout = identity)."""
    assert stride == 2, "even/odd decomposition assumes stride == 2"
    B, S, Vl = latent_words.shape
    D = params["emb_w"].shape[1]
    pk = pack_params(params, layers)

    rows = (S + 1) * (stride ** layers)        # valid output length is rows - 1
    vpad = pk["proj_w"].shape[1]
    tv = _vocab_tile(vpad)

    # one zero row appended to the latent: gives the deconv its trailing zero boundary in-kernel
    latent_pad = jnp.pad(latent_words, ((0, 0), (0, 1), (0, 0)))
    sp = S + 1

    const2 = lambda b, j: (0, 0)
    const3 = lambda b, j: (0, 0, 0)
    logits_full = pl.pallas_call(
        _decoder_kernel,
        out_shape=jax.ShapeDtypeStruct((B, rows, vpad), jnp.float32),
        grid=(B, vpad // tv),
        in_specs=[
            pl.BlockSpec((1, sp, Vl), lambda b, j: (b, 0, 0)),
            pl.BlockSpec((Vl, D), const2),
            pl.BlockSpec((1, D), const2),
            pl.BlockSpec((1, D), const2),
            pl.BlockSpec((1, D), const2),
            pl.BlockSpec((layers, D, 4 * D), const3),
            pl.BlockSpec((layers, D, 2 * D), const3),
            pl.BlockSpec((layers, 1, 2 * D), const3),
            pl.BlockSpec((layers, 1, D), const3),
            pl.BlockSpec((layers, 1, D), const3),
            pl.BlockSpec((1, D), const2),
            pl.BlockSpec((1, D), const2),
            pl.BlockSpec((D, tv), lambda b, j: (0, j)),
            pl.BlockSpec((1, tv), lambda b, j: (0, j)),
        ],
        out_specs=pl.BlockSpec((1, rows, tv), lambda b, j: (b, 0, j)),
        scratch_shapes=[pltpu.VMEM((rows, D), jnp.float32)],
        compiler_params=pltpu.CompilerParams(
            dimension_semantics=("parallel", "arbitrary")),
    )(latent_pad, pk["emb_w"], pk["emb_b"], pk["pre_g"], pk["pre_b"],
      pk["w01"], pk["w2"], pk["bag"], pk["lng"], pk["lnb"],
      pk["out_ln_g"], pk["out_ln_b"], pk["proj_w"], pk["proj_b"])

    l_out = rows - 1
    vout = params["out_w"].shape[1]
    logits = logits_full[:, :l_out, :vout]

    # torch: mask.unsqueeze(1).repeat(1, stride, 1).reshape(B, -1) per layer (tiles whole seq)
    out_mask = mask
    for _ in range(layers):
        out_mask = jnp.broadcast_to(out_mask[:, None, :],
                                    (B, stride, out_mask.shape[1])).reshape(B, -1)
    return logits, out_mask


# ----------------------------------------------------------------------------- reference (pure JAX, f32)
def _layernorm_ref(x, g, b):
    mu = jnp.mean(x, axis=-1, keepdims=True)
    var = jnp.mean((x - mu) ** 2, axis=-1, keepdims=True)
    return (x - mu) * jax.lax.rsqrt(var + EPS) * g + b


def ref_forward(latent_words, mask, p, *, layers=3, window=3, stride=2):
    B = latent_words.shape[0]
    x = latent_words @ p["emb_w"] + p["emb_b"]
    x = _layernorm_ref(x, p["pre_g"], p["pre_b"])
    out_mask = mask
    for i in range(layers):
        _, L, D = x.shape
        Lout = (L - 1) * stride + window
        ya = jnp.zeros((B, Lout, D), jnp.float32)
        yg = jnp.zeros((B, Lout, D), jnp.float32)
        for k in range(window):
            idx = jnp.arange(L) * stride + k
            ya = ya.at[:, idx, :].add(x @ p["wa"][i][k])
            yg = yg.at[:, idx, :].add(x @ p["wg"][i][k])
        h = (ya + p["ba"][i]) * jax.nn.sigmoid(yg + p["bg"][i])   # F.glu
        x = _layernorm_ref(h, p["ln_g"][i], p["ln_b"][i])
        out_mask = jnp.broadcast_to(out_mask[:, None, :],
                                    (B, stride, out_mask.shape[1])).reshape(B, -1)
    xn = _layernorm_ref(x, p["out_ln_g"], p["out_ln_b"])
    return xn @ p["out_w"] + p["out_b"], out_mask


# ----------------------------------------------------------------------------- params
def init_params(key, D, Vl, V, layers=3, window=3):
    ks = jax.random.split(key, 3 + layers)
    p = {
        "emb_w": jax.random.normal(ks[0], (Vl, D), jnp.float32) * 0.1,
        "emb_b": jax.random.normal(ks[1], (D,), jnp.float32) * 0.01,
        "pre_g": jnp.ones((D,), jnp.float32),
        "pre_b": jnp.zeros((D,), jnp.float32),
        "wa": [], "wg": [], "ba": [], "bg": [], "ln_g": [], "ln_b": [],
    }
    for i in range(layers):
        k1, k2, k3, k4 = jax.random.split(ks[2 + i], 4)
        # ConvTranspose1d weight (D, 2D, K) split into linear-half / gate-half per tap.
        p["wa"].append(jax.random.normal(k1, (window, D, D), jnp.float32) * 0.1)
        p["wg"].append(jax.random.normal(k2, (window, D, D), jnp.float32) * 0.1)
        p["ba"].append(jax.random.normal(k3, (D,), jnp.float32) * 0.01)
        p["bg"].append(jax.random.normal(k4, (D,), jnp.float32) * 0.01)
        p["ln_g"].append(jnp.ones((D,), jnp.float32))
        p["ln_b"].append(jnp.zeros((D,), jnp.float32))
    ko1, ko2 = jax.random.split(ks[2 + layers], 2)
    p["out_ln_g"] = jnp.ones((D,), jnp.float32)
    p["out_ln_b"] = jnp.zeros((D,), jnp.float32)
    p["out_w"] = jax.random.normal(ko1, (D, V + 1), jnp.float32) * 0.1
    p["out_b"] = jax.random.normal(ko2, (V + 1,), jnp.float32) * 0.01
    return p


# ----------------------------------------------------------------------------- main
if __name__ == "__main__":
    B, S = 2, 8                 # batch, latent sequence length
    D = 32                      # embedding_dim
    VL = 16                     # latent_vocab_size
    V = 11                      # vocab_size  -> output dim V + 1 = 12
    LAYERS, WINDOW, STRIDE = 3, 3, 2

    key = jax.random.PRNGKey(0)
    kx, km, kp = jax.random.split(key, 3)
    latent_words = jax.random.normal(kx, (B, S, VL), jnp.float32)
    mask = (jax.random.uniform(km, (B, S)) > 0.2).astype(jnp.float32)
    params = init_params(kp, D, VL, V, LAYERS, WINDOW)

    fwd = jax.jit(lambda lw, m: deconv_decoder_forward(lw, m, params,
                                                       layers=LAYERS, stride=STRIDE))
    logits, out_mask = fwd(latent_words, mask)
    jax.block_until_ready((logits, out_mask))

    # Self-check against a pure-JAX f32 reference (tolerance covers bf16 MXU matmuls / EUP sigmoid).
    ref_logits, ref_mask = ref_forward(latent_words, mask, params,
                                       layers=LAYERS, window=WINDOW, stride=STRIDE)
    assert logits.shape == (B, ((S * 2 + 1) * 2 + 1) * 2 + 1, V + 1), logits.shape
    assert out_mask.shape == (B, S * STRIDE ** LAYERS), out_mask.shape
    assert jnp.allclose(out_mask, ref_mask)
    assert jnp.allclose(logits, ref_logits, atol=5e-2, rtol=5e-2), \
        float(jnp.max(jnp.abs(logits - ref_logits)))

    print("KERNEL_OK")
</pallas_src>

<mosaic_0001>
module attributes {stable_mosaic.version = 11 : i64} {
  func.func @_decoder_kernel(%arg0: i32, %arg1: i32, %arg2: memref<1x9x16xf32, #tpu.memory_space<vmem>>, %arg3: memref<16x32xbf16, #tpu.memory_space<vmem>>, %arg4: memref<1x32xf32, #tpu.memory_space<vmem>>, %arg5: memref<1x32xf32, #tpu.memory_space<vmem>>, %arg6: memref<1x32xf32, #tpu.memory_space<vmem>>, %arg7: memref<3x32x128xbf16, #tpu.memory_space<vmem>>, %arg8: memref<3x32x64xbf16, #tpu.memory_space<vmem>>, %arg9: memref<3x1x64xf32, #tpu.memory_space<vmem>>, %arg10: memref<3x1x32xf32, #tpu.memory_space<vmem>>, %arg11: memref<3x1x32xf32, #tpu.memory_space<vmem>>, %arg12: memref<1x32xf32, #tpu.memory_space<vmem>>, %arg13: memref<1x32xf32, #tpu.memory_space<vmem>>, %arg14: memref<32x128xbf16, #tpu.memory_space<vmem>>, %arg15: memref<1x128xf32, #tpu.memory_space<vmem>>, %arg16: memref<1x72x128xf32, #tpu.memory_space<vmem>>, %arg17: memref<72x32xf32, #tpu.memory_space<vmem>>) attributes {dimension_semantics = [#tpu.dimension_semantics<parallel>, #tpu.dimension_semantics<arbitrary>], iteration_bounds = array<i64: 2, 1>, scalar_prefetch = 0 : i64, scratch_operands = 1 : i64, tpu.core_type = #tpu.core_type<tc>, window_params = [{transform_indices = @transform_0, window_bounds = array<i64: 1, 9, 16>}, {pipeline_mode = #tpu.pipeline_mode<synchronous>, transform_indices = @transform_1, window_bounds = array<i64: 16, 32>}, {pipeline_mode = #tpu.pipeline_mode<synchronous>, transform_indices = @transform_2, window_bounds = array<i64: 1, 32>}, {pipeline_mode = #tpu.pipeline_mode<synchronous>, transform_indices = @transform_3, window_bounds = array<i64: 1, 32>}, {pipeline_mode = #tpu.pipeline_mode<synchronous>, transform_indices = @transform_4, window_bounds = array<i64: 1, 32>}, {pipeline_mode = #tpu.pipeline_mode<synchronous>, transform_indices = @transform_5, window_bounds = array<i64: 3, 32, 128>}, {pipeline_mode = #tpu.pipeline_mode<synchronous>, transform_indices = @transform_6, window_bounds = array<i64: 3, 32, 64>}, {pipeline_mode = #tpu.pipeline_mode<synchronous>, transform_indices = @transform_7, window_bounds = array<i64: 3, 1, 64>}, {pipeline_mode = #tpu.pipeline_mode<synchronous>, transform_indices = @transform_8, window_bounds = array<i64: 3, 1, 32>}, {pipeline_mode = #tpu.pipeline_mode<synchronous>, transform_indices = @transform_9, window_bounds = array<i64: 3, 1, 32>}, {pipeline_mode = #tpu.pipeline_mode<synchronous>, transform_indices = @transform_10, window_bounds = array<i64: 1, 32>}, {pipeline_mode = #tpu.pipeline_mode<synchronous>, transform_indices = @transform_11, window_bounds = array<i64: 1, 32>}, {transform_indices = @transform_12, window_bounds = array<i64: 32, 128>}, {transform_indices = @transform_13, window_bounds = array<i64: 1, 128>}, {transform_indices = @transform_14, window_bounds = array<i64: 1, 72, 128>}]} {
    %c0_i32 = arith.constant 0 : i32
    %0 = arith.cmpi eq, %arg1, %c0_i32 : i32
    %1 = arith.extui %0 : i1 to i32
    %c0_i32_0 = arith.constant 0 : i32
    %2 = arith.cmpi ne, %1, %c0_i32_0 : i32
    scf.if %2 {
      %c0_9 = arith.constant 0 : index
      %c0_10 = arith.constant 0 : index
      %c0_11 = arith.constant 0 : index
      %13 = vector.load %arg2[%c0_9, %c0_10, %c0_11] : memref<1x9x16xf32, #tpu.memory_space<vmem>>, vector<1x9x16xf32>
      %14 = vector.shape_cast %13 : vector<1x9x16xf32> to vector<9x16xf32>
      %15 = arith.truncf %14 : vector<9x16xf32> to vector<9x16xbf16>
      %c0_12 = arith.constant 0 : index
      %c0_13 = arith.constant 0 : index
      %16 = vector.load %arg3[%c0_12, %c0_13] : memref<16x32xbf16, #tpu.memory_space<vmem>>, vector<16x32xbf16>
      %cst_14 = arith.constant dense<0.000000e+00> : vector<9x32xf32>
      %17 = tpu.matmul %15, %16, %cst_14 {dimension_numbers = #tpu.dot_dimension_numbers<[1], [0], [0], [1], [0, 0, 1, 1], [], []>} : vector<9x16xbf16>, vector<16x32xbf16>, vector<9x32xf32> -> vector<9x32xf32>
      %c0_15 = arith.constant 0 : index
      %c0_16 = arith.constant 0 : index
      %18 = vector.load %arg4[%c0_15, %c0_16] : memref<1x32xf32, #tpu.memory_space<vmem>>, vector<1x32xf32>
      %19 = vector.broadcast %18 : vector<1x32xf32> to vector<9x32xf32>
      %20 = arith.addf %17, %19 : vector<9x32xf32>
      %c0_17 = arith.constant 0 : index
      %c0_18 = arith.constant 0 : index
      %21 = vector.load %arg5[%c0_17, %c0_18] : memref<1x32xf32, #tpu.memory_space<vmem>>, vector<1x32xf32>
      %c0_19 = arith.constant 0 : index
      %c0_20 = arith.constant 0 : index
      %22 = vector.load %arg6[%c0_19, %c0_20] : memref<1x32xf32, #tpu.memory_space<vmem>>, vector<1x32xf32>
      %cst_21 = arith.constant dense<0.000000e+00> : vector<9xf32>
      %23 = vector.multi_reduction <add>, %20, %cst_21 [1] : vector<9x32xf32> to vector<9xf32>
      %24 = vector.shape_cast %23 : vector<9xf32> to vector<9x1xf32>
      %cst_22 = arith.constant 3.200000e+01 : f32
      %25 = vector.broadcast %cst_22 : f32 to vector<9x1xf32>
      %26 = arith.divf %24, %25 : vector<9x1xf32>
      %27 = arith.mulf %20, %20 : vector<9x32xf32>
      %cst_23 = arith.constant dense<0.000000e+00> : vector<9xf32>
      %28 = vector.multi_reduction <add>, %27, %cst_23 [1] : vector<9x32xf32> to vector<9xf32>
      %29 = vector.shape_cast %28 : vector<9xf32> to vector<9x1xf32>
      %cst_24 = arith.constant 3.200000e+01 : f32
      %30 = vector.broadcast %cst_24 : f32 to vector<9x1xf32>
      %31 = arith.divf %29, %30 : vector<9x1xf32>
      %32 = arith.mulf %26, %26 : vector<9x1xf32>
      %33 = arith.subf %31, %32 : vector<9x1xf32>
      %cst_25 = arith.constant 0.000000e+00 : f32
      %34 = vector.broadcast %cst_25 : f32 to vector<9x1xf32>
      %35 = arith.maximumf %33, %34 : vector<9x1xf32>
      %36 = vector.broadcast %26 : vector<9x1xf32> to vector<9x32xf32>
      %37 = arith.subf %20, %36 : vector<9x32xf32>
      %cst_26 = arith.constant 9.99999974E-6 : f32
      %38 = vector.broadcast %cst_26 : f32 to vector<9x1xf32>
      %39 = arith.addf %35, %38 : vector<9x1xf32>
      %40 = math.rsqrt %39 : vector<9x1xf32>
      %41 = vector.broadcast %40 : vector<9x1xf32> to vector<9x32xf32>
      %42 = arith.mulf %37, %41 : vector<9x32xf32>
      %43 = vector.broadcast %21 : vector<1x32xf32> to vector<9x32xf32>
      %44 = arith.mulf %42, %43 : vector<9x32xf32>
      %45 = vector.broadcast %22 : vector<1x32xf32> to vector<9x32xf32>
      %46 = arith.addf %44, %45 : vector<9x32xf32>
      %47 = tpu.iota {dimensions = array<i32: 0>} : vector<9x32xi32>
      %c8_i32 = arith.constant 8 : i32
      %48 = vector.broadcast %c8_i32 : i32 to vector<9x32xi32>
      %49 = arith.cmpi eq, %47, %48 : vector<9x32xi32>
      %cst_27 = arith.constant 0.000000e+00 : f32
      %50 = vector.broadcast %cst_27 : f32 to vector<9x32xf32>
      %51 = arith.select %49, %50, %46 : vector<9x32xi1>, vector<9x32xf32>
      %52 = arith.truncf %51 : vector<9x32xf32> to vector<9x32xbf16>
      %c0_28 = arith.constant 0 : index
      %c0_29 = arith.constant 0 : index
      %c0_30 = arith.constant 0 : index
      %53 = vector.load %arg7[%c0_28, %c0_29, %c0_30] : memref<3x32x128xbf16, #tpu.memory_space<vmem>>, vector<1x32x128xbf16>
      %54 = vector.shape_cast %53 : vector<1x32x128xbf16> to vector<32x128xbf16>
      %c0_31 = arith.constant 0 : index
      %c0_32 = arith.constant 0 : index
      %c0_33 = arith.constant 0 : index
      %55 = vector.load %arg8[%c0_31, %c0_32, %c0_33] : memref<3x32x64xbf16, #tpu.memory_space<vmem>>, vector<1x32x64xbf16>
      %56 = vector.shape_cast %55 : vector<1x32x64xbf16> to vector<32x64xbf16>
      %c0_34 = arith.constant 0 : index
      %c0_35 = arith.constant 0 : index
      %c0_36 = arith.constant 0 : index
      %57 = vector.load %arg9[%c0_34, %c0_35, %c0_36] : memref<3x1x64xf32, #tpu.memory_space<vmem>>, vector<1x1x64xf32>
      %58 = vector.shape_cast %57 : vector<1x1x64xf32> to vector<1x64xf32>
      %c0_37 = arith.constant 0 : index
      %c0_38 = arith.constant 0 : index
      %c0_39 = arith.constant 0 : index
      %59 = vector.load %arg10[%c0_37, %c0_38, %c0_39] : memref<3x1x32xf32, #tpu.memory_space<vmem>>, vector<1x1x32xf32>
      %60 = vector.shape_cast %59 : vector<1x1x32xf32> to vector<1x32xf32>
      %c0_40 = arith.constant 0 : index
      %c0_41 = arith.constant 0 : index
      %c0_42 = arith.constant 0 : index
      %61 = vector.load %arg11[%c0_40, %c0_41, %c0_42] : memref<3x1x32xf32, #tpu.memory_space<vmem>>, vector<1x1x32xf32>
      %62 = vector.shape_cast %61 : vector<1x1x32xf32> to vector<1x32xf32>
      %63 = tpu.iota {dimensions = array<i32: 0>} : vector<9x9xi32>
      %64 = tpu.iota {dimensions = array<i32: 1>} : vector<9x9xi32>
      %c1_i32 = arith.constant 1 : i32
      %65 = vector.broadcast %c1_i32 : i32 to vector<9x9xi32>
      %66 = arith.addi %64, %65 : vector<9x9xi32>
      %67 = arith.cmpi eq, %63, %66 : vector<9x9xi32>
      %cst_43 = arith.constant 1.000000e+00 : f32
      %cst_44 = arith.constant 0.000000e+00 : f32
      %68 = vector.broadcast %cst_43 : f32 to vector<9x9xf32>
      %69 = vector.broadcast %cst_44 : f32 to vector<9x9xf32>
      %70 = arith.select %67, %68, %69 : vector<9x9xi1>, vector<9x9xf32>
      %71 = arith.truncf %70 : vector<9x9xf32> to vector<9x9xbf16>
      %cst_45 = arith.constant dense<0.000000e+00> : vector<9x32xf32>
      %72 = tpu.matmul %71, %52, %cst_45 {dimension_numbers = #tpu.dot_dimension_numbers<[1], [0], [0], [1], [0, 0, 1, 1], [], []>} : vector<9x9xbf16>, vector<9x32xbf16>, vector<9x32xf32> -> vector<9x32xf32>
      %73 = arith.truncf %72 : vector<9x32xf32> to vector<9x32xbf16>
      %cst_46 = arith.constant dense<0.000000e+00> : vector<9x128xf32>
      %74 = tpu.matmul %52, %54, %cst_46 {dimension_numbers = #tpu.dot_dimension_numbers<[1], [0], [0], [1], [0, 0, 1, 1], [], []>} : vector<9x32xbf16>, vector<32x128xbf16>, vector<9x128xf32> -> vector<9x128xf32>
      %cst_47 = arith.constant dense<0.000000e+00> : vector<9x64xf32>
      %75 = tpu.matmul %73, %56, %cst_47 {dimension_numbers = #tpu.dot_dimension_numbers<[1], [0], [0], [1], [0, 0, 1, 1], [], []>} : vector<9x32xbf16>, vector<32x64xbf16>, vector<9x64xf32> -> vector<9x64xf32>
      %76 = vector.extract_strided_slice %74 {offsets = [0, 0], sizes = [9, 64], strides = [1, 1]} : vector<9x128xf32> to vector<9x64xf32>
      %77 = arith.addf %76, %75 : vector<9x64xf32>
      %78 = vector.broadcast %58 : vector<1x64xf32> to vector<9x64xf32>
      %79 = arith.addf %77, %78 : vector<9x64xf32>
      %80 = vector.extract_strided_slice %74 {offsets = [0, 64], sizes = [9, 64], strides = [1, 1]} : vector<9x128xf32> to vector<9x64xf32>
      %81 = vector.broadcast %58 : vector<1x64xf32> to vector<9x64xf32>
      %82 = arith.addf %80, %81 : vector<9x64xf32>
      %83 = vector.extract_strided_slice %79 {offsets = [0, 0], sizes = [9, 32], strides = [1, 1]} : vector<9x64xf32> to vector<9x32xf32>
      %84 = vector.extract_strided_slice %79 {offsets = [0, 32], sizes = [9, 32], strides = [1, 1]} : vector<9x64xf32> to vector<9x32xf32>
      %cst_48 = arith.constant 0.000000e+00 : f32
      %85 = vector.broadcast %cst_48 : f32 to vector<9x32xf32>
      %86 = arith.subf %85, %84 : vector<9x32xf32>
      %87 = math.exp %86 : vector<9x32xf32>
      %cst_49 = arith.constant 1.000000e+00 : f32
      %88 = vector.broadcast %cst_49 : f32 to vector<9x32xf32>
      %89 = arith.addf %88, %87 : vector<9x32xf32>
      %90 = tpu.reciprocal %89 {approx = true} : vector<9x32xf32> -> vector<9x32xf32>
      %91 = arith.mulf %83, %90 : vector<9x32xf32>
      %cst_50 = arith.constant dense<0.000000e+00> : vector<9xf32>
      %92 = vector.multi_reduction <add>, %91, %cst_50 [1] : vector<9x32xf32> to vector<9xf32>
      %93 = vector.shape_cast %92 : vector<9xf32> to vector<9x1xf32>
      %cst_51 = arith.constant 3.200000e+01 : f32
      %94 = vector.broadcast %cst_51 : f32 to vector<9x1xf32>
      %95 = arith.divf %93, %94 : vector<9x1xf32>
      %96 = arith.mulf %91, %91 : vector<9x32xf32>
      %cst_52 = arith.constant dense<0.000000e+00> : vector<9xf32>
      %97 = vector.multi_reduction <add>, %96, %cst_52 [1] : vector<9x32xf32> to vector<9xf32>
      %98 = vector.shape_cast %97 : vector<9xf32> to vector<9x1xf32>
      %cst_53 = arith.constant 3.200000e+01 : f32
      %99 = vector.broadcast %cst_53 : f32 to vector<9x1xf32>
      %100 = arith.divf %98, %99 : vector<9x1xf32>
      %101 = arith.mulf %95, %95 : vector<9x1xf32>
      %102 = arith.subf %100, %101 : vector<9x1xf32>
      %cst_54 = arith.constant 0.000000e+00 : f32
      %103 = vector.broadcast %cst_54 : f32 to vector<9x1xf32>
      %104 = arith.maximumf %102, %103 : vector<9x1xf32>
      %105 = vector.broadcast %95 : vector<9x1xf32> to vector<9x32xf32>
      %106 = arith.subf %91, %105 : vector<9x32xf32>
      %cst_55 = arith.constant 9.99999974E-6 : f32
      %107 = vector.broadcast %cst_55 : f32 to vector<9x1xf32>
      %108 = arith.addf %104, %107 : vector<9x1xf32>
      %109 = math.rsqrt %108 : vector<9x1xf32>
      %110 = vector.broadcast %109 : vector<9x1xf32> to vector<9x32xf32>
      %111 = arith.mulf %106, %110 : vector<9x32xf32>
      %112 = vector.broadcast %60 : vector<1x32xf32> to vector<9x32xf32>
      %113 = arith.mulf %111, %112 : vector<9x32xf32>
      %114 = vector.broadcast %62 : vector<1x32xf32> to vector<9x32xf32>
      %115 = arith.addf %113, %114 : vector<9x32xf32>
      %116 = vector.extract_strided_slice %82 {offsets = [0, 0], sizes = [9, 32], strides = [1, 1]} : vector<9x64xf32> to vector<9x32xf32>
      %117 = vector.extract_strided_slice %82 {offsets = [0, 32], sizes = [9, 32], strides = [1, 1]} : vector<9x64xf32> to vector<9x32xf32>
      %cst_56 = arith.constant 0.000000e+00 : f32
      %118 = vector.broadcast %cst_56 : f32 to vector<9x32xf32>
      %119 = arith.subf %118, %117 : vector<9x32xf32>
      %120 = math.exp %119 : vector<9x32xf32>
      %cst_57 = arith.constant 1.000000e+00 : f32
      %121 = vector.broadcast %cst_57 : f32 to vector<9x32xf32>
      %122 = arith.addf %121, %120 : vector<9x32xf32>
      %123 = tpu.reciprocal %122 {approx = true} : vector<9x32xf32> -> vector<9x32xf32>
      %124 = arith.mulf %116, %123 : vector<9x32xf32>
      %cst_58 = arith.constant dense<0.000000e+00> : vector<9xf32>
      %125 = vector.multi_reduction <add>, %124, %cst_58 [1] : vector<9x32xf32> to vector<9xf32>
      %126 = vector.shape_cast %125 : vector<9xf32> to vector<9x1xf32>
      %cst_59 = arith.constant 3.200000e+01 : f32
      %127 = vector.broadcast %cst_59 : f32 to vector<9x1xf32>
      %128 = arith.divf %126, %127 : vector<9x1xf32>
      %129 = arith.mulf %124, %124 : vector<9x32xf32>
      %cst_60 = arith.constant dense<0.000000e+00> : vector<9xf32>
      %130 = vector.multi_reduction <add>, %129, %cst_60 [1] : vector<9x32xf32> to vector<9xf32>
      %131 = vector.shape_cast %130 : vector<9xf32> to vector<9x1xf32>
      %cst_61 = arith.constant 3.200000e+01 : f32
      %132 = vector.broadcast %cst_61 : f32 to vector<9x1xf32>
      %133 = arith.divf %131, %132 : vector<9x1xf32>
      %134 = arith.mulf %128, %128 : vector<9x1xf32>
      %135 = arith.subf %133, %134 : vector<9x1xf32>
      %cst_62 = arith.constant 0.000000e+00 : f32
      %136 = vector.broadcast %cst_62 : f32 to vector<9x1xf32>
      %137 = arith.maximumf %135, %136 : vector<9x1xf32>
      %138 = vector.broadcast %128 : vector<9x1xf32> to vector<9x32xf32>
      %139 = arith.subf %124, %138 : vector<9x32xf32>
      %cst_63 = arith.constant 9.99999974E-6 : f32
      %140 = vector.broadcast %cst_63 : f32 to vector<9x1xf32>
      %141 = arith.addf %137, %140 : vector<9x1xf32>
      %142 = math.rsqrt %141 : vector<9x1xf32>
      %143 = vector.broadcast %142 : vector<9x1xf32> to vector<9x32xf32>
      %144 = arith.mulf %139, %143 : vector<9x32xf32>
      %145 = vector.broadcast %60 : vector<1x32xf32> to vector<9x32xf32>
      %146 = arith.mulf %144, %145 : vector<9x32xf32>
      %147 = vector.broadcast %62 : vector<1x32xf32> to vector<9x32xf32>
      %148 = arith.addf %146, %147 : vector<9x32xf32>
      %149 = tpu.iota {dimensions = array<i32: 0>} : vector<9x32xi32>
      %c8_i32_64 = arith.constant 8 : i32
      %150 = vector.broadcast %c8_i32_64 : i32 to vector<9x32xi32>
      %151 = arith.cmpi eq, %149, %150 : vector<9x32xi32>
      %cst_65 = arith.constant 0.000000e+00 : f32
      %152 = vector.broadcast %cst_65 : f32 to vector<9x32xf32>
      %153 = arith.select %151, %152, %148 : vector<9x32xi1>, vector<9x32xf32>
      %154 = tpu.iota {dimensions = array<i32: 0>} : vector<18x9xi32>
      %155 = tpu.iota {dimensions = array<i32: 1>} : vector<18x9xi32>
      %c2_i32 = arith.constant 2 : i32
      %156 = vector.broadcast %c2_i32 : i32 to vector<18x9xi32>
      %157 = arith.muli %156, %155 : vector<18x9xi32>
      %158 = arith.cmpi eq, %154, %157 : vector<18x9xi32>
      %cst_66 = arith.constant 1.000000e+00 : f32
      %cst_67 = arith.constant 0.000000e+00 : f32
      %159 = vector.broadcast %cst_66 : f32 to vector<18x9xf32>
      %160 = vector.broadcast %cst_67 : f32 to vector<18x9xf32>
      %161 = arith.select %158, %159, %160 : vector<18x9xi1>, vector<18x9xf32>
      %162 = arith.truncf %161 : vector<18x9xf32> to vector<18x9xbf16>
      %c2_i32_68 = arith.constant 2 : i32
      %163 = vector.broadcast %c2_i32_68 : i32 to vector<18x9xi32>
      %164 = arith.muli %163, %155 : vector<18x9xi32>
      %c1_i32_69 = arith.constant 1 : i32
      %165 = vector.broadcast %c1_i32_69 : i32 to vector<18x9xi32>
      %166 = arith.addi %164, %165 : vector<18x9xi32>
      %167 = arith.cmpi eq, %154, %166 : vector<18x9xi32>
      %cst_70 = arith.constant 1.000000e+00 : f32
      %cst_71 = arith.constant 0.000000e+00 : f32
      %168 = vector.broadcast %cst_70 : f32 to vector<18x9xf32>
      %169 = vector.broadcast %cst_71 : f32 to vector<18x9xf32>
      %170 = arith.select %167, %168, %169 : vector<18x9xi1>, vector<18x9xf32>
      %171 = arith.truncf %170 : vector<18x9xf32> to vector<18x9xbf16>
      %172 = arith.truncf %115 : vector<9x32xf32> to vector<9x32xbf16>
      %cst_72 = arith.constant dense<0.000000e+00> : vector<18x32xf32>
      %173 = tpu.matmul %162, %172, %cst_72 {dimension_numbers = #tpu.dot_dimension_numbers<[1], [0], [0], [1], [0, 0, 1, 1], [], []>} : vector<18x9xbf16>, vector<9x32xbf16>, vector<18x32xf32> -> vector<18x32xf32>
      %174 = arith.truncf %153 : vector<9x32xf32> to vector<9x32xbf16>
      %cst_73 = arith.constant dense<0.000000e+00> : vector<18x32xf32>
      %175 = tpu.matmul %171, %174, %cst_73 {dimension_numbers = #tpu.dot_dimension_numbers<[1], [0], [0], [1], [0, 0, 1, 1], [], []>} : vector<18x9xbf16>, vector<9x32xbf16>, vector<18x32xf32> -> vector<18x32xf32>
      %176 = arith.addf %173, %175 : vector<18x32xf32>
      %177 = arith.truncf %176 : vector<18x32xf32> to vector<18x32xbf16>
      %c1 = arith.constant 1 : index
      %c0_74 = arith.constant 0 : index
      %c0_75 = arith.constant 0 : index
      %178 = vector.load %arg7[%c1, %c0_74, %c0_75] : memref<3x32x128xbf16, #tpu.memory_space<vmem>>, vector<1x32x128xbf16>
      %179 = vector.shape_cast %178 : vector<1x32x128xbf16> to vector<32x128xbf16>
      %c1_76 = arith.constant 1 : index
      %c0_77 = arith.constant 0 : index
      %c0_78 = arith.constant 0 : index
      %180 = vector.load %arg8[%c1_76, %c0_77, %c0_78] : memref<3x32x64xbf16, #tpu.memory_space<vmem>>, vector<1x32x64xbf16>
      %181 = vector.shape_cast %180 : vector<1x32x64xbf16> to vector<32x64xbf16>
      %c1_79 = arith.constant 1 : index
      %c0_80 = arith.constant 0 : index
      %c0_81 = arith.constant 0 : index
      %182 = vector.load %arg9[%c1_79, %c0_80, %c0_81] : memref<3x1x64xf32, #tpu.memory_space<vmem>>, vector<1x1x64xf32>
      %183 = vector.shape_cast %182 : vector<1x1x64xf32> to vector<1x64xf32>
      %c1_82 = arith.constant 1 : index
      %c0_83 = arith.constant 0 : index
      %c0_84 = arith.constant 0 : index
      %184 = vector.load %arg10[%c1_82, %c0_83, %c0_84] : memref<3x1x32xf32, #tpu.memory_space<vmem>>, vector<1x1x32xf32>
      %185 = vector.shape_cast %184 : vector<1x1x32xf32> to vector<1x32xf32>
      %c1_85 = arith.constant 1 : index
      %c0_86 = arith.constant 0 : index
      %c0_87 = arith.constant 0 : index
      %186 = vector.load %arg11[%c1_85, %c0_86, %c0_87] : memref<3x1x32xf32, #tpu.memory_space<vmem>>, vector<1x1x32xf32>
      %187 = vector.shape_cast %186 : vector<1x1x32xf32> to vector<1x32xf32>
      %188 = tpu.iota {dimensions = array<i32: 0>} : vector<18x18xi32>
      %189 = tpu.iota {dimensions = array<i32: 1>} : vector<18x18xi32>
      %c1_i32_88 = arith.constant 1 : i32
      %190 = vector.broadcast %c1_i32_88 : i32 to vector<18x18xi32>
      %191 = arith.addi %189, %190 : vector<18x18xi32>
      %192 = arith.cmpi eq, %188, %191 : vector<18x18xi32>
      %cst_89 = arith.constant 1.000000e+00 : f32
      %cst_90 = arith.constant 0.000000e+00 : f32
      %193 = vector.broadcast %cst_89 : f32 to vector<18x18xf32>
      %194 = vector.broadcast %cst_90 : f32 to vector<18x18xf32>
      %195 = arith.select %192, %193, %194 : vector<18x18xi1>, vector<18x18xf32>
      %196 = arith.truncf %195 : vector<18x18xf32> to vector<18x18xbf16>
      %cst_91 = arith.constant dense<0.000000e+00> : vector<18x32xf32>
      %197 = tpu.matmul %196, %177, %cst_91 {dimension_numbers = #tpu.dot_dimension_numbers<[1], [0], [0], [1], [0, 0, 1, 1], [], []>} : vector<18x18xbf16>, vector<18x32xbf16>, vector<18x32xf32> -> vector<18x32xf32>
      %198 = arith.truncf %197 : vector<18x32xf32> to vector<18x32xbf16>
      %cst_92 = arith.constant dense<0.000000e+00> : vector<18x128xf32>
      %199 = tpu.matmul %177, %179, %cst_92 {dimension_numbers = #tpu.dot_dimension_numbers<[1], [0], [0], [1], [0, 0, 1, 1], [], []>} : vector<18x32xbf16>, vector<32x128xbf16>, vector<18x128xf32> -> vector<18x128xf32>
      %cst_93 = arith.constant dense<0.000000e+00> : vector<18x64xf32>
      %200 = tpu.matmul %198, %181, %cst_93 {dimension_numbers = #tpu.dot_dimension_numbers<[1], [0], [0], [1], [0, 0, 1, 1], [], []>} : vector<18x32xbf16>, vector<32x64xbf16>, vector<18x64xf32> -> vector<18x64xf32>
      %201 = vector.extract_strided_slice %199 {offsets = [0, 0], sizes = [18, 64], strides = [1, 1]} : vector<18x128xf32> to vector<18x64xf32>
      %202 = arith.addf %201, %200 : vector<18x64xf32>
      %203 = vector.broadcast %183 : vector<1x64xf32> to vector<18x64xf32>
      %204 = arith.addf %202, %203 : vector<18x64xf32>
      %205 = vector.extract_strided_slice %199 {offsets = [0, 64], sizes = [18, 64], strides = [1, 1]} : vector<18x128xf32> to vector<18x64xf32>
      %206 = vector.broadcast %183 : vector<1x64xf32> to vector<18x64xf32>
      %207 = arith.addf %205, %206 : vector<18x64xf32>
      %208 = vector.extract_strided_slice %204 {offsets = [0, 0], sizes = [18, 32], strides = [1, 1]} : vector<18x64xf32> to vector<18x32xf32>
      %209 = vector.extract_strided_slice %204 {offsets = [0, 32], sizes = [18, 32], strides = [1, 1]} : vector<18x64xf32> to vector<18x32xf32>
      %cst_94 = arith.constant 0.000000e+00 : f32
      %210 = vector.broadcast %cst_94 : f32 to vector<18x32xf32>
      %211 = arith.subf %210, %209 : vector<18x32xf32>
      %212 = math.exp %211 : vector<18x32xf32>
      %cst_95 = arith.constant 1.000000e+00 : f32
      %213 = vector.broadcast %cst_95 : f32 to vector<18x32xf32>
      %214 = arith.addf %213, %212 : vector<18x32xf32>
      %215 = tpu.reciprocal %214 {approx = true} : vector<18x32xf32> -> vector<18x32xf32>
      %216 = arith.mulf %208, %215 : vector<18x32xf32>
      %cst_96 = arith.constant dense<0.000000e+00> : vector<18xf32>
      %217 = vector.multi_reduction <add>, %216, %cst_96 [1] : vector<18x32xf32> to vector<18xf32>
      %218 = vector.shape_cast %217 : vector<18xf32> to vector<18x1xf32>
      %cst_97 = arith.constant 3.200000e+01 : f32
      %219 = vector.broadcast %cst_97 : f32 to vector<18x1xf32>
      %220 = arith.divf %218, %219 : vector<18x1xf32>
      %221 = arith.mulf %216, %216 : vector<18x32xf32>
      %cst_98 = arith.constant dense<0.000000e+00> : vector<18xf32>
      %222 = vector.multi_reduction <add>, %221, %cst_98 [1] : vector<18x32xf32> to vector<18xf32>
      %223 = vector.shape_cast %222 : vector<18xf32> to vector<18x1xf32>
      %cst_99 = arith.constant 3.200000e+01 : f32
      %224 = vector.broadcast %cst_99 : f32 to vector<18x1xf32>
      %225 = arith.divf %223, %224 : vector<18x1xf32>
      %226 = arith.mulf %220, %220 : vector<18x1xf32>
      %227 = arith.subf %225, %226 : vector<18x1xf32>
      %cst_100 = arith.constant 0.000000e+00 : f32
      %228 = vector.broadcast %cst_100 : f32 to vector<18x1xf32>
      %229 = arith.maximumf %227, %228 : vector<18x1xf32>
      %230 = vector.broadcast %220 : vector<18x1xf32> to vector<18x32xf32>
      %231 = arith.subf %216, %230 : vector<18x32xf32>
      %cst_101 = arith.constant 9.99999974E-6 : f32
      %232 = vector.broadcast %cst_101 : f32 to vector<18x1xf32>
      %233 = arith.addf %229, %232 : vector<18x1xf32>
      %234 = math.rsqrt %233 : vector<18x1xf32>
      %235 = vector.broadcast %234 : vector<18x1xf32> to vector<18x32xf32>
      %236 = arith.mulf %231, %235 : vector<18x32xf32>
      %237 = vector.broadcast %185 : vector<1x32xf32> to vector<18x32xf32>
      %238 = arith.mulf %236, %237 : vector<18x32xf32>
      %239 = vector.broadcast %187 : vector<1x32xf32> to vector<18x32xf32>
      %240 = arith.addf %238, %239 : vector<18x32xf32>
      %241 = vector.extract_strided_slice %207 {offsets = [0, 0], sizes = [18, 32], strides = [1, 1]} : vector<18x64xf32> to vector<18x32xf32>
      %242 = vector.extract_strided_slice %207 {offsets = [0, 32], sizes = [18, 32], strides = [1, 1]} : vector<18x64xf32> to vector<18x32xf32>
      %cst_102 = arith.constant 0.000000e+00 : f32
      %243 = vector.broadcast %cst_102 : f32 to vector<18x32xf32>
      %244 = arith.subf %243, %242 : vector<18x32xf32>
      %245 = math.exp %244 : vector<18x32xf32>
      %cst_103 = arith.constant 1.000000e+00 : f32
      %246 = vector.broadcast %cst_103 : f32 to vector<18x32xf32>
      %247 = arith.addf %246, %245 : vector<18x32xf32>
      %248 = tpu.reciprocal %247 {approx = true} : vector<18x32xf32> -> vector<18x32xf32>
      %249 = arith.mulf %241, %248 : vector<18x32xf32>
      %cst_104 = arith.constant dense<0.000000e+00> : vector<18xf32>
      %250 = vector.multi_reduction <add>, %249, %cst_104 [1] : vector<18x32xf32> to vector<18xf32>
      %251 = vector.shape_cast %250 : vector<18xf32> to vector<18x1xf32>
      %cst_105 = arith.constant 3.200000e+01 : f32
      %252 = vector.broadcast %cst_105 : f32 to vector<18x1xf32>
      %253 = arith.divf %251, %252 : vector<18x1xf32>
      %254 = arith.mulf %249, %249 : vector<18x32xf32>
      %cst_106 = arith.constant dense<0.000000e+00> : vector<18xf32>
      %255 = vector.multi_reduction <add>, %254, %cst_106 [1] : vector<18x32xf32> to vector<18xf32>
      %256 = vector.shape_cast %255 : vector<18xf32> to vector<18x1xf32>
      %cst_107 = arith.constant 3.200000e+01 : f32
      %257 = vector.broadcast %cst_107 : f32 to vector<18x1xf32>
      %258 = arith.divf %256, %257 : vector<18x1xf32>
      %259 = arith.mulf %253, %253 : vector<18x1xf32>
      %260 = arith.subf %258, %259 : vector<18x1xf32>
      %cst_108 = arith.constant 0.000000e+00 : f32
      %261 = vector.broadcast %cst_108 : f32 to vector<18x1xf32>
      %262 = arith.maximumf %260, %261 : vector<18x1xf32>
      %263 = vector.broadcast %253 : vector<18x1xf32> to vector<18x32xf32>
      %264 = arith.subf %249, %263 : vector<18x32xf32>
      %cst_109 = arith.constant 9.99999974E-6 : f32
      %265 = vector.broadcast %cst_109 : f32 to vector<18x1xf32>
      %266 = arith.addf %262, %265 : vector<18x1xf32>
      %267 = math.rsqrt %266 : vector<18x1xf32>
      %268 = vector.broadcast %267 : vector<18x1xf32> to vector<18x32xf32>
      %269 = arith.mulf %264, %268 : vector<18x32xf32>
      %270 = vector.broadcast %185 : vector<1x32xf32> to vector<18x32xf32>
      %271 = arith.mulf %269, %270 : vector<18x32xf32>
      %272 = vector.broadcast %187 : vector<1x32xf32> to vector<18x32xf32>
      %273 = arith.addf %271, %272 : vector<18x32xf32>
      %274 = tpu.iota {dimensions = array<i32: 0>} : vector<18x32xi32>
      %c17_i32 = arith.constant 17 : i32
      %275 = vector.broadcast %c17_i32 : i32 to vector<18x32xi32>
      %276 = arith.cmpi eq, %274, %275 : vector<18x32xi32>
      %cst_110 = arith.constant 0.000000e+00 : f32
      %277 = vector.broadcast %cst_110 : f32 to vector<18x32xf32>
      %278 = arith.select %276, %277, %273 : vector<18x32xi1>, vector<18x32xf32>
      %279 = tpu.iota {dimensions = array<i32: 0>} : vector<36x18xi32>
      %280 = tpu.iota {dimensions = array<i32: 1>} : vector<36x18xi32>
      %c2_i32_111 = arith.constant 2 : i32
      %281 = vector.broadcast %c2_i32_111 : i32 to vector<36x18xi32>
      %282 = arith.muli %281, %280 : vector<36x18xi32>
      %283 = arith.cmpi eq, %279, %282 : vector<36x18xi32>
      %cst_112 = arith.constant 1.000000e+00 : f32
      %cst_113 = arith.constant 0.000000e+00 : f32
      %284 = vector.broadcast %cst_112 : f32 to vector<36x18xf32>
      %285 = vector.broadcast %cst_113 : f32 to vector<36x18xf32>
      %286 = arith.select %283, %284, %285 : vector<36x18xi1>, vector<36x18xf32>
      %287 = arith.truncf %286 : vector<36x18xf32> to vector<36x18xbf16>
      %c2_i32_114 = arith.constant 2 : i32
      %288 = vector.broadcast %c2_i32_114 : i32 to vector<36x18xi32>
      %289 = arith.muli %288, %280 : vector<36x18xi32>
      %c1_i32_115 = arith.constant 1 : i32
      %290 = vector.broadcast %c1_i32_115 : i32 to vector<36x18xi32>
      %291 = arith.addi %289, %290 : vector<36x18xi32>
      %292 = arith.cmpi eq, %279, %291 : vector<36x18xi32>
      %cst_116 = arith.constant 1.000000e+00 : f32
      %cst_117 = arith.constant 0.000000e+00 : f32
      %293 = vector.broadcast %cst_116 : f32 to vector<36x18xf32>
      %294 = vector.broadcast %cst_117 : f32 to vector<36x18xf32>
      %295 = arith.select %292, %293, %294 : vector<36x18xi1>, vector<36x18xf32>
      %296 = arith.truncf %295 : vector<36x18xf32> to vector<36x18xbf16>
      %297 = arith.truncf %240 : vector<18x32xf32> to vector<18x32xbf16>
      %cst_118 = arith.constant dense<0.000000e+00> : vector<36x32xf32>
      %298 = tpu.matmul %287, %297, %cst_118 {dimension_numbers = #tpu.dot_dimension_numbers<[1], [0], [0], [1], [0, 0, 1, 1], [], []>} : vector<36x18xbf16>, vector<18x32xbf16>, vector<36x32xf32> -> vector<36x32xf32>
      %299 = arith.truncf %278 : vector<18x32xf32> to vector<18x32xbf16>
      %cst_119 = arith.constant dense<0.000000e+00> : vector<36x32xf32>
      %300 = tpu.matmul %296, %299, %cst_119 {dimension_numbers = #tpu.dot_dimension_numbers<[1], [0], [0], [1], [0, 0, 1, 1], [], []>} : vector<36x18xbf16>, vector<18x32xbf16>, vector<36x32xf32> -> vector<36x32xf32>
      %301 = arith.addf %298, %300 : vector<36x32xf32>
      %302 = arith.truncf %301 : vector<36x32xf32> to vector<36x32xbf16>
      %c2 = arith.constant 2 : index
      %c0_120 = arith.constant 0 : index
      %c0_121 = arith.constant 0 : index
      %303 = vector.load %arg7[%c2, %c0_120, %c0_121] : memref<3x32x128xbf16, #tpu.memory_space<vmem>>, vector<1x32x128xbf16>
      %304 = vector.shape_cast %303 : vector<1x32x128xbf16> to vector<32x128xbf16>
      %c2_122 = arith.constant 2 : index
      %c0_123 = arith.constant 0 : index
      %c0_124 = arith.constant 0 : index
      %305 = vector.load %arg8[%c2_122, %c0_123, %c0_124] : memref<3x32x64xbf16, #tpu.memory_space<vmem>>, vector<1x32x64xbf16>
      %306 = vector.shape_cast %305 : vector<1x32x64xbf16> to vector<32x64xbf16>
      %c2_125 = arith.constant 2 : index
      %c0_126 = arith.constant 0 : index
      %c0_127 = arith.constant 0 : index
      %307 = vector.load %arg9[%c2_125, %c0_126, %c0_127] : memref<3x1x64xf32, #tpu.memory_space<vmem>>, vector<1x1x64xf32>
      %308 = vector.shape_cast %307 : vector<1x1x64xf32> to vector<1x64xf32>
      %c2_128 = arith.constant 2 : index
      %c0_129 = arith.constant 0 : index
      %c0_130 = arith.constant 0 : index
      %309 = vector.load %arg10[%c2_128, %c0_129, %c0_130] : memref<3x1x32xf32, #tpu.memory_space<vmem>>, vector<1x1x32xf32>
      %310 = vector.shape_cast %309 : vector<1x1x32xf32> to vector<1x32xf32>
      %c2_131 = arith.constant 2 : index
      %c0_132 = arith.constant 0 : index
      %c0_133 = arith.constant 0 : index
      %311 = vector.load %arg11[%c2_131, %c0_132, %c0_133] : memref<3x1x32xf32, #tpu.memory_space<vmem>>, vector<1x1x32xf32>
      %312 = vector.shape_cast %311 : vector<1x1x32xf32> to vector<1x32xf32>
      %313 = tpu.iota {dimensions = array<i32: 0>} : vector<36x36xi32>
      %314 = tpu.iota {dimensions = array<i32: 1>} : vector<36x36xi32>
      %c1_i32_134 = arith.constant 1 : i32
      %315 = vector.broadcast %c1_i32_134 : i32 to vector<36x36xi32>
      %316 = arith.addi %314, %315 : vector<36x36xi32>
      %317 = arith.cmpi eq, %313, %316 : vector<36x36xi32>
      %cst_135 = arith.constant 1.000000e+00 : f32
      %cst_136 = arith.constant 0.000000e+00 : f32
      %318 = vector.broadcast %cst_135 : f32 to vector<36x36xf32>
      %319 = vector.broadcast %cst_136 : f32 to vector<36x36xf32>
      %320 = arith.select %317, %318, %319 : vector<36x36xi1>, vector<36x36xf32>
      %321 = arith.truncf %320 : vector<36x36xf32> to vector<36x36xbf16>
      %cst_137 = arith.constant dense<0.000000e+00> : vector<36x32xf32>
      %322 = tpu.matmul %321, %302, %cst_137 {dimension_numbers = #tpu.dot_dimension_numbers<[1], [0], [0], [1], [0, 0, 1, 1], [], []>} : vector<36x36xbf16>, vector<36x32xbf16>, vector<36x32xf32> -> vector<36x32xf32>
      %323 = arith.truncf %322 : vector<36x32xf32> to vector<36x32xbf16>
      %cst_138 = arith.constant dense<0.000000e+00> : vector<36x128xf32>
      %324 = tpu.matmul %302, %304, %cst_138 {dimension_numbers = #tpu.dot_dimension_numbers<[1], [0], [0], [1], [0, 0, 1, 1], [], []>} : vector<36x32xbf16>, vector<32x128xbf16>, vector<36x128xf32> -> vector<36x128xf32>
      %cst_139 = arith.constant dense<0.000000e+00> : vector<36x64xf32>
      %325 = tpu.matmul %323, %306, %cst_139 {dimension_numbers = #tpu.dot_dimension_numbers<[1], [0], [0], [1], [0, 0, 1, 1], [], []>} : vector<36x32xbf16>, vector<32x64xbf16>, vector<36x64xf32> -> vector<36x64xf32>
      %326 = vector.extract_strided_slice %324 {offsets = [0, 0], sizes = [36, 64], strides = [1, 1]} : vector<36x128xf32> to vector<36x64xf32>
      %327 = arith.addf %326, %325 : vector<36x64xf32>
      %328 = vector.broadcast %308 : vector<1x64xf32> to vector<36x64xf32>
      %329 = arith.addf %327, %328 : vector<36x64xf32>
      %330 = vector.extract_strided_slice %324 {offsets = [0, 64], sizes = [36, 64], strides = [1, 1]} : vector<36x128xf32> to vector<36x64xf32>
      %331 = vector.broadcast %308 : vector<1x64xf32> to vector<36x64xf32>
      %332 = arith.addf %330, %331 : vector<36x64xf32>
      %333 = vector.extract_strided_slice %329 {offsets = [0, 0], sizes = [36, 32], strides = [1, 1]} : vector<36x64xf32> to vector<36x32xf32>
      %334 = vector.extract_strided_slice %329 {offsets = [0, 32], sizes = [36, 32], strides = [1, 1]} : vector<36x64xf32> to vector<36x32xf32>
      %cst_140 = arith.constant 0.000000e+00 : f32
      %335 = vector.broadcast %cst_140 : f32 to vector<36x32xf32>
      %336 = arith.subf %335, %334 : vector<36x32xf32>
      %337 = math.exp %336 : vector<36x32xf32>
      %cst_141 = arith.constant 1.000000e+00 : f32
      %338 = vector.broadcast %cst_141 : f32 to vector<36x32xf32>
      %339 = arith.addf %338, %337 : vector<36x32xf32>
      %340 = tpu.reciprocal %339 {approx = true} : vector<36x32xf32> -> vector<36x32xf32>
      %341 = arith.mulf %333, %340 : vector<36x32xf32>
      %cst_142 = arith.constant dense<0.000000e+00> : vector<36xf32>
      %342 = vector.multi_reduction <add>, %341, %cst_142 [1] : vector<36x32xf32> to vector<36xf32>
      %343 = vector.shape_cast %342 : vector<36xf32> to vector<36x1xf32>
      %cst_143 = arith.constant 3.200000e+01 : f32
      %344 = vector.broadcast %cst_143 : f32 to vector<36x1xf32>
      %345 = arith.divf %343, %344 : vector<36x1xf32>
      %346 = arith.mulf %341, %341 : vector<36x32xf32>
      %cst_144 = arith.constant dense<0.000000e+00> : vector<36xf32>
      %347 = vector.multi_reduction <add>, %346, %cst_144 [1] : vector<36x32xf32> to vector<36xf32>
      %348 = vector.shape_cast %347 : vector<36xf32> to vector<36x1xf32>
      %cst_145 = arith.constant 3.200000e+01 : f32
      %349 = vector.broadcast %cst_145 : f32 to vector<36x1xf32>
      %350 = arith.divf %348, %349 : vector<36x1xf32>
      %351 = arith.mulf %345, %345 : vector<36x1xf32>
      %352 = arith.subf %350, %351 : vector<36x1xf32>
      %cst_146 = arith.constant 0.000000e+00 : f32
      %353 = vector.broadcast %cst_146 : f32 to vector<36x1xf32>
      %354 = arith.maximumf %352, %353 : vector<36x1xf32>
      %355 = vector.broadcast %345 : vector<36x1xf32> to vector<36x32xf32>
      %356 = arith.subf %341, %355 : vector<36x32xf32>
      %cst_147 = arith.constant 9.99999974E-6 : f32
      %357 = vector.broadcast %cst_147 : f32 to vector<36x1xf32>
      %358 = arith.addf %354, %357 : vector<36x1xf32>
      %359 = math.rsqrt %358 : vector<36x1xf32>
      %360 = vector.broadcast %359 : vector<36x1xf32> to vector<36x32xf32>
      %361 = arith.mulf %356, %360 : vector<36x32xf32>
      %362 = vector.broadcast %310 : vector<1x32xf32> to vector<36x32xf32>
      %363 = arith.mulf %361, %362 : vector<36x32xf32>
      %364 = vector.broadcast %312 : vector<1x32xf32> to vector<36x32xf32>
      %365 = arith.addf %363, %364 : vector<36x32xf32>
      %366 = vector.extract_strided_slice %332 {offsets = [0, 0], sizes = [36, 32], strides = [1, 1]} : vector<36x64xf32> to vector<36x32xf32>
      %367 = vector.extract_strided_slice %332 {offsets = [0, 32], sizes = [36, 32], strides = [1, 1]} : vector<36x64xf32> to vector<36x32xf32>
      %cst_148 = arith.constant 0.000000e+00 : f32
      %368 = vector.broadcast %cst_148 : f32 to vector<36x32xf32>
      %369 = arith.subf %368, %367 : vector<36x32xf32>
      %370 = math.exp %369 : vector<36x32xf32>
      %cst_149 = arith.constant 1.000000e+00 : f32
      %371 = vector.broadcast %cst_149 : f32 to vector<36x32xf32>
      %372 = arith.addf %371, %370 : vector<36x32xf32>
      %373 = tpu.reciprocal %372 {approx = true} : vector<36x32xf32> -> vector<36x32xf32>
      %374 = arith.mulf %366, %373 : vector<36x32xf32>
      %cst_150 = arith.constant dense<0.000000e+00> : vector<36xf32>
      %375 = vector.multi_reduction <add>, %374, %cst_150 [1] : vector<36x32xf32> to vector<36xf32>
      %376 = vector.shape_cast %375 : vector<36xf32> to vector<36x1xf32>
      %cst_151 = arith.constant 3.200000e+01 : f32
      %377 = vector.broadcast %cst_151 : f32 to vector<36x1xf32>
      %378 = arith.divf %376, %377 : vector<36x1xf32>
      %379 = arith.mulf %374, %374 : vector<36x32xf32>
      %cst_152 = arith.constant dense<0.000000e+00> : vector<36xf32>
      %380 = vector.multi_reduction <add>, %379, %cst_152 [1] : vector<36x32xf32> to vector<36xf32>
      %381 = vector.shape_cast %380 : vector<36xf32> to vector<36x1xf32>
      %cst_153 = arith.constant 3.200000e+01 : f32
      %382 = vector.broadcast %cst_153 : f32 to vector<36x1xf32>
      %383 = arith.divf %381, %382 : vector<36x1xf32>
      %384 = arith.mulf %378, %378 : vector<36x1xf32>
      %385 = arith.subf %383, %384 : vector<36x1xf32>
      %cst_154 = arith.constant 0.000000e+00 : f32
      %386 = vector.broadcast %cst_154 : f32 to vector<36x1xf32>
      %387 = arith.maximumf %385, %386 : vector<36x1xf32>
      %388 = vector.broadcast %378 : vector<36x1xf32> to vector<36x32xf32>
      %389 = arith.subf %374, %388 : vector<36x32xf32>
      %cst_155 = arith.constant 9.99999974E-6 : f32
      %390 = vector.broadcast %cst_155 : f32 to vector<36x1xf32>
      %391 = arith.addf %387, %390 : vector<36x1xf32>
      %392 = math.rsqrt %391 : vector<36x1xf32>
      %393 = vector.broadcast %392 : vector<36x1xf32> to vector<36x32xf32>
      %394 = arith.mulf %389, %393 : vector<36x32xf32>
      %395 = vector.broadcast %310 : vector<1x32xf32> to vector<36x32xf32>
      %396 = arith.mulf %394, %395 : vector<36x32xf32>
      %397 = vector.broadcast %312 : vector<1x32xf32> to vector<36x32xf32>
      %398 = arith.addf %396, %397 : vector<36x32xf32>
      %399 = tpu.iota {dimensions = array<i32: 0>} : vector<36x32xi32>
      %c35_i32 = arith.constant 35 : i32
      %400 = vector.broadcast %c35_i32 : i32 to vector<36x32xi32>
      %401 = arith.cmpi eq, %399, %400 : vector<36x32xi32>
      %cst_156 = arith.constant 0.000000e+00 : f32
      %402 = vector.broadcast %cst_156 : f32 to vector<36x32xf32>
      %403 = arith.select %401, %402, %398 : vector<36x32xi1>, vector<36x32xf32>
      %404 = tpu.iota {dimensions = array<i32: 0>} : vector<72x36xi32>
      %405 = tpu.iota {dimensions = array<i32: 1>} : vector<72x36xi32>
      %c2_i32_157 = arith.constant 2 : i32
      %406 = vector.broadcast %c2_i32_157 : i32 to vector<72x36xi32>
      %407 = arith.muli %406, %405 : vector<72x36xi32>
      %408 = arith.cmpi eq, %404, %407 : vector<72x36xi32>
      %cst_158 = arith.constant 1.000000e+00 : f32
      %cst_159 = arith.constant 0.000000e+00 : f32
      %409 = vector.broadcast %cst_158 : f32 to vector<72x36xf32>
      %410 = vector.broadcast %cst_159 : f32 to vector<72x36xf32>
      %411 = arith.select %408, %409, %410 : vector<72x36xi1>, vector<72x36xf32>
      %412 = arith.truncf %411 : vector<72x36xf32> to vector<72x36xbf16>
      %c2_i32_160 = arith.constant 2 : i32
      %413 = vector.broadcast %c2_i32_160 : i32 to vector<72x36xi32>
      %414 = arith.muli %413, %405 : vector<72x36xi32>
      %c1_i32_161 = arith.constant 1 : i32
      %415 = vector.broadcast %c1_i32_161 : i32 to vector<72x36xi32>
      %416 = arith.addi %414, %415 : vector<72x36xi32>
      %417 = arith.cmpi eq, %404, %416 : vector<72x36xi32>
      %cst_162 = arith.constant 1.000000e+00 : f32
      %cst_163 = arith.constant 0.000000e+00 : f32
      %418 = vector.broadcast %cst_162 : f32 to vector<72x36xf32>
      %419 = vector.broadcast %cst_163 : f32 to vector<72x36xf32>
      %420 = arith.select %417, %418, %419 : vector<72x36xi1>, vector<72x36xf32>
      %421 = arith.truncf %420 : vector<72x36xf32> to vector<72x36xbf16>
      %422 = arith.truncf %365 : vector<36x32xf32> to vector<36x32xbf16>
      %cst_164 = arith.constant dense<0.000000e+00> : vector<72x32xf32>
      %423 = tpu.matmul %412, %422, %cst_164 {dimension_numbers = #tpu.dot_dimension_numbers<[1], [0], [0], [1], [0, 0, 1, 1], [], []>} : vector<72x36xbf16>, vector<36x32xbf16>, vector<72x32xf32> -> vector<72x32xf32>
      %424 = arith.truncf %403 : vector<36x32xf32> to vector<36x32xbf16>
      %cst_165 = arith.constant dense<0.000000e+00> : vector<72x32xf32>
      %425 = tpu.matmul %421, %424, %cst_165 {dimension_numbers = #tpu.dot_dimension_numbers<[1], [0], [0], [1], [0, 0, 1, 1], [], []>} : vector<72x36xbf16>, vector<36x32xbf16>, vector<72x32xf32> -> vector<72x32xf32>
      %426 = arith.addf %423, %425 : vector<72x32xf32>
      %427 = arith.truncf %426 : vector<72x32xf32> to vector<72x32xbf16>
      %428 = arith.extf %427 : vector<72x32xbf16> to vector<72x32xf32>
      %c0_166 = arith.constant 0 : index
      %c0_167 = arith.constant 0 : index
      %429 = vector.load %arg12[%c0_166, %c0_167] : memref<1x32xf32, #tpu.memory_space<vmem>>, vector<1x32xf32>
      %c0_168 = arith.constant 0 : index
      %c0_169 = arith.constant 0 : index
      %430 = vector.load %arg13[%c0_168, %c0_169] : memref<1x32xf32, #tpu.memory_space<vmem>>, vector<1x32xf32>
      %cst_170 = arith.constant dense<0.000000e+00> : vector<72xf32>
      %431 = vector.multi_reduction <add>, %428, %cst_170 [1] : vector<72x32xf32> to vector<72xf32>
      %432 = vector.shape_cast %431 : vector<72xf32> to vector<72x1xf32>
      %cst_171 = arith.constant 3.200000e+01 : f32
      %433 = vector.broadcast %cst_171 : f32 to vector<72x1xf32>
      %434 = arith.divf %432, %433 : vector<72x1xf32>
      %435 = arith.mulf %428, %428 : vector<72x32xf32>
      %cst_172 = arith.constant dense<0.000000e+00> : vector<72xf32>
      %436 = vector.multi_reduction <add>, %435, %cst_172 [1] : vector<72x32xf32> to vector<72xf32>
      %437 = vector.shape_cast %436 : vector<72xf32> to vector<72x1xf32>
      %cst_173 = arith.constant 3.200000e+01 : f32
      %438 = vector.broadcast %cst_173 : f32 to vector<72x1xf32>
      %439 = arith.divf %437, %438 : vector<72x1xf32>
      %440 = arith.mulf %434, %434 : vector<72x1xf32>
      %441 = arith.subf %439, %440 : vector<72x1xf32>
      %cst_174 = arith.constant 0.000000e+00 : f32
      %442 = vector.broadcast %cst_174 : f32 to vector<72x1xf32>
      %443 = arith.maximumf %441, %442 : vector<72x1xf32>
      %444 = vector.broadcast %434 : vector<72x1xf32> to vector<72x32xf32>
      %445 = arith.subf %428, %444 : vector<72x32xf32>
      %cst_175 = arith.constant 9.99999974E-6 : f32
      %446 = vector.broadcast %cst_175 : f32 to vector<72x1xf32>
      %447 = arith.addf %443, %446 : vector<72x1xf32>
      %448 = math.rsqrt %447 : vector<72x1xf32>
      %449 = vector.broadcast %448 : vector<72x1xf32> to vector<72x32xf32>
      %450 = arith.mulf %445, %449 : vector<72x32xf32>
      %451 = vector.broadcast %429 : vector<1x32xf32> to vector<72x32xf32>
      %452 = arith.mulf %450, %451 : vector<72x32xf32>
      %453 = vector.broadcast %430 : vector<1x32xf32> to vector<72x32xf32>
      %454 = arith.addf %452, %453 : vector<72x32xf32>
      %c0_176 = arith.constant 0 : index
      %c0_177 = arith.constant 0 : index
      %455 = vector.load %arg17[%c0_176, %c0_177] : memref<72x32xf32, #tpu.memory_space<vmem>>, vector<72x32xf32>
      tpu.vector_store %arg17[%c0_176, %c0_177], %454 {strides = array<i32>} : memref<72x32xf32, #tpu.memory_space<vmem>>, vector<72x32xf32>,
    } else {
    }
    %c0 = arith.constant 0 : index
    %c0_1 = arith.constant 0 : index
    %3 = vector.load %arg17[%c0, %c0_1] : memref<72x32xf32, #tpu.memory_space<vmem>>, vector<72x32xf32>
    %4 = arith.truncf %3 : vector<72x32xf32> to vector<72x32xbf16>
    %c0_2 = arith.constant 0 : index
    %c0_3 = arith.constant 0 : index
    %5 = vector.load %arg14[%c0_2, %c0_3] : memref<32x128xbf16, #tpu.memory_space<vmem>>, vector<32x128xbf16>
    %cst = arith.constant dense<0.000000e+00> : vector<72x128xf32>
    %6 = tpu.matmul %4, %5, %cst {dimension_numbers = #tpu.dot_dimension_numbers<[1], [0], [0], [1], [0, 0, 1, 1], [], []>} : vector<72x32xbf16>, vector<32x128xbf16>, vector<72x128xf32> -> vector<72x128xf32>
    %c0_4 = arith.constant 0 : index
    %c0_5 = arith.constant 0 : index
    %7 = vector.load %arg15[%c0_4, %c0_5] : memref<1x128xf32, #tpu.memory_space<vmem>>, vector<1x128xf32>
    %8 = vector.broadcast %7 : vector<1x128xf32> to vector<72x128xf32>
    %9 = arith.addf %6, %8 : vector<72x128xf32>
    %c0_6 = arith.constant 0 : index
    %c0_7 = arith.constant 0 : index
    %c0_8 = arith.constant 0 : index
    %10 = vector.load %arg16[%c0_6, %c0_7, %c0_8] : memref<1x72x128xf32, #tpu.memory_space<vmem>>, vector<1x72x128xf32>
    %11 = vector.shape_cast %10 : vector<1x72x128xf32> to vector<72x128xf32>
    %12 = vector.shape_cast %9 : vector<72x128xf32> to vector<1x72x128xf32>
    tpu.vector_store %arg16[%c0_6, %c0_7, %c0_8], %12 {strides = array<i32>} : memref<1x72x128xf32, #tpu.memory_space<vmem>>, vector<1x72x128xf32>,
    return
  }
  func.func @transform_0(%arg0: i32, %arg1: i32) -> (i32, i32, i32) {
    %c0_i32 = arith.constant 0 : i32
    %c0_i32_0 = arith.constant 0 : i32
    %c0_i32_1 = arith.constant 0 : i32
    return %arg0, %c0_i32, %c0_i32_0 : i32, i32, i32
  }
  func.func @transform_1(%arg0: i32, %arg1: i32) -> (i32, i32) {
    %c0_i32 = arith.constant 0 : i32
    %c0_i32_0 = arith.constant 0 : i32
    %c0_i32_1 = arith.constant 0 : i32
    return %c0_i32, %c0_i32_0 : i32, i32
  }
  func.func @transform_2(%arg0: i32, %arg1: i32) -> (i32, i32) {
    %c0_i32 = arith.constant 0 : i32
    %c0_i32_0 = arith.constant 0 : i32
    %c0_i32_1 = arith.constant 0 : i32
    return %c0_i32, %c0_i32_0 : i32, i32
  }
  func.func @transform_3(%arg0: i32, %arg1: i32) -> (i32, i32) {
    %c0_i32 = arith.constant 0 : i32
    %c0_i32_0 = arith.constant 0 : i32
    %c0_i32_1 = arith.constant 0 : i32
    return %c0_i32, %c0_i32_0 : i32, i32
  }
  func.func @transform_4(%arg0: i32, %arg1: i32) -> (i32, i32) {
    %c0_i32 = arith.constant 0 : i32
    %c0_i32_0 = arith.constant 0 : i32
    %c0_i32_1 = arith.constant 0 : i32
    return %c0_i32, %c0_i32_0 : i32, i32
  }
  func.func @transform_5(%arg0: i32, %arg1: i32) -> (i32, i32, i32) {
    %c0_i32 = arith.constant 0 : i32
    %c0_i32_0 = arith.constant 0 : i32
    %c0_i32_1 = arith.constant 0 : i32
    %c0_i32_2 = arith.constant 0 : i32
    return %c0_i32, %c0_i32_0, %c0_i32_1 : i32, i32, i32
  }
  func.func @transform_6(%arg0: i32, %arg1: i32) -> (i32, i32, i32) {
    %c0_i32 = arith.constant 0 : i32
    %c0_i32_0 = arith.constant 0 : i32
    %c0_i32_1 = arith.constant 0 : i32
    %c0_i32_2 = arith.constant 0 : i32
    return %c0_i32, %c0_i32_0, %c0_i32_1 : i32, i32, i32
  }
  func.func @transform_7(%arg0: i32, %arg1: i32) -> (i32, i32, i32) {
    %c0_i32 = arith.constant 0 : i32
    %c0_i32_0 = arith.constant 0 : i32
    %c0_i32_1 = arith.constant 0 : i32
    %c0_i32_2 = arith.constant 0 : i32
    return %c0_i32, %c0_i32_0, %c0_i32_1 : i32, i32, i32
  }
  func.func @transform_8(%arg0: i32, %arg1: i32) -> (i32, i32, i32) {
    %c0_i32 = arith.constant 0 : i32
    %c0_i32_0 = arith.constant 0 : i32
    %c0_i32_1 = arith.constant 0 : i32
    %c0_i32_2 = arith.constant 0 : i32
    return %c0_i32, %c0_i32_0, %c0_i32_1 : i32, i32, i32
  }
  func.func @transform_9(%arg0: i32, %arg1: i32) -> (i32, i32, i32) {
    %c0_i32 = arith.constant 0 : i32
    %c0_i32_0 = arith.constant 0 : i32
    %c0_i32_1 = arith.constant 0 : i32
    %c0_i32_2 = arith.constant 0 : i32
    return %c0_i32, %c0_i32_0, %c0_i32_1 : i32, i32, i32
  }
  func.func @transform_10(%arg0: i32, %arg1: i32) -> (i32, i32) {
    %c0_i32 = arith.constant 0 : i32
    %c0_i32_0 = arith.constant 0 : i32
    %c0_i32_1 = arith.constant 0 : i32
    return %c0_i32, %c0_i32_0 : i32, i32
  }
  func.func @transform_11(%arg0: i32, %arg1: i32) -> (i32, i32) {
    %c0_i32 = arith.constant 0 : i32
    %c0_i32_0 = arith.constant 0 : i32
    %c0_i32_1 = arith.constant 0 : i32
    return %c0_i32, %c0_i32_0 : i32, i32
  }
  func.func @transform_12(%arg0: i32, %arg1: i32) -> (i32, i32) {
    %c0_i32 = arith.constant 0 : i32
    %c0_i32_0 = arith.constant 0 : i32
    return %c0_i32, %arg1 : i32, i32
  }
  func.func @transform_13(%arg0: i32, %arg1: i32) -> (i32, i32) {
    %c0_i32 = arith.constant 0 : i32
    %c0_i32_0 = arith.constant 0 : i32
    return %c0_i32, %arg1 : i32, i32
  }
  func.func @transform_14(%arg0: i32, %arg1: i32) -> (i32, i32, i32) {
    %c0_i32 = arith.constant 0 : i32
    %c0_i32_0 = arith.constant 0 : i32
    return %arg0, %c0_i32, %arg1 : i32, i32, i32
  }
}

</mosaic_0001>

<bundles_post_ra>
// kernel: _lambda_.1
= control target key start
LH: loop header
LB: loop body
LE: loop exit
PB: predicated region body
PF: predicated region fallthrough
CT: control target
= control target key end

     0   :  { %s4863_s0 = inlined_call_operand.vmem [shape: f32[2,9,16], index: 0, kind: input, shape index: {}]   ;;  %s4864_s1 = inlined_call_operand.vmem [shape: bf16[16,32], index: 1, kind: input, shape index: {}]   ;;  %s4865_s2 = inlined_call_operand.vmem [shape: f32[1,32], index: 2, kind: input, shape index: {}]   ;;  %s4866_s3 = inlined_call_operand.vmem [shape: f32[1,32], index: 3, kind: input, shape index: {}, may-alias: {3,10}]   ;;  %s4867_s4 = inlined_call_operand.vmem [shape: f32[1,32], index: 4, kind: input, shape index: {}, may-alias: {4,11}]   ;;  %s4868_s5 = inlined_call_operand.vmem [shape: bf16[3,32,128], index: 5, kind: input, shape index: {}]   ;;  %s4869_s6 = inlined_call_operand.vmem [shape: bf16[3,32,64], index: 6, kind: input, shape index: {}]   ;;  %s4870_s7 = inlined_call_operand.hbm [shape: f32[3,1,64], index: 7, kind: input, shape index: {}]   ;;  %s4871_s8 = inlined_call_operand.vmem [shape: f32[3,1,32], index: 8, kind: input, shape index: {}]   ;;  %s4872_s9 = inlined_call_operand.vmem [shape: f32[3,1,32], index: 9, kind: input, shape index: {}]   ;;  %s4873_s10 = inlined_call_operand.vmem [shape: f32[1,32], index: 10, kind: input, shape index: {}, may-alias: {3,10}]   ;;  %s4874_s11 = inlined_call_operand.vmem [shape: f32[1,32], index: 11, kind: input, shape index: {}, may-alias: {4,11}]   ;;  %s4875_s12 = inlined_call_operand.hbm [shape: bf16[32,128], index: 12, kind: input, shape index: {}]   ;;  %s4876_s13 = inlined_call_operand.vmem [shape: f32[1,128], index: 13, kind: input, shape index: {}]   ;;  %s4877_s14 = inlined_call_operand.vmem [shape: f32[2,72,128], index: 14, kind: output, shape index: {}]  }
   0x1   :  { %4883 = sst [smem:[#allocation12_spill]] %s4877_s14 }
   0x2   :  { %19 = vsyncpa [#allocation4], 0 }
   0x3   :  { %20 = vsyncpa [#allocation6], 0  ;;  %s3885_s29 = smov 0   ;;  %s3887_s30 = smov 0  }
   0x4   :  { %s3889_s15 = smov 0  }
   0x5 LB: > { %4884 = sst [smem:[#allocation9_spill]] %s3793_s30  ;;  %s3047_s16 = sadd.s32 4294967295, %s3797_s15   ;;  %s3797_s15 = sphi %s3889_s15, %s26_s15   ;;  %s3793_s30 = sphi %s3887_s30, %s4895_s30   ;;  %s3789_s29 = sphi %s3885_s29, %s4894_s29  }
   0x6   : > { %4885 = sst [smem:[#allocation10_spill]] %s3797_s15  ;;  %s38_s17 = sadd.s32 1, %s3793_s30 }
   0x7   : > { %p40_p0 = scmp.ge.s32.totalorder %s38_s17, 2  ;;  %p3049_p1 = scmp.ge.s32.totalorder %s3797_s15, 1 }
   0x8   : > { %p380_p2 = scmp.lt.s32.totalorder %s3797_s15, 3  ;;  %p3910_p4 = scmp.eq.s32.totalorder %s3047_s16, 0 }
   0x9   : > { %s4897_s17 = smov (%p40_p0, %s38_s17), 0  ;;  %s3799_s20 = smov [#allocation3]  }
   0xa   : > { %4886 = sst [smem:[#allocation11_spill]] %s4897_s17  ;;  %p3906_p3 = pnand %p3049_p1, %p380_p2 }
   0xb   : > { %s4888_s19 = scalar_select %p3910_p4, 1, 0 }
   0xc   : > { %s4887_s18 = scalar_select %p3906_p3, 1, 0 }
   0xd   : > { %p3508_p5 = pneg %p3906_p3  ;;  %s410_s21 = sshll.u32 %s3799_s20, 4  ;;  %s411_s21 = int_to_ptr.vmem [resolvable:$true] %s410_s21 }
   0xe   : > { %s3800_s23 = smov [#allocation5]   ;;  %s3711_s27 = scalar_lea.hbm %s4870_s7, 48 }
   0xf   : > { %p3918_p6 = pnand %p3910_p4, %p3508_p5  ;;  %s437_s24 = sshll.u32 %s3800_s23, 4  ;;  %s3922_s24 = int_to_ptr.vmem [resolvable:$true] %s437_s24 }
  0x10   : > { %p3712_p7 = scmp.ne.s32.totalorder %s4870_s7, %s3711_s27  ;;  %p3718_p11 = scmp.lt.u32.totalorder %s3711_s27, %s4870_s7 }
  0x11   : > { %p3713_p8 = pneg %p3918_p6 }
  0x13   : > { %p3714_p9 = pnand %p3713_p8, %p3712_p7 }
  0x15   : > { %p3715_p10 = pneg %p3714_p9 }
  0x17   : > { %p3720_p12 = pnand %p3718_p11, %p3715_p10 }
  0x19   : > { %3723 = shalt.err (!%p3720_p12)
}
  0x1a   : > { %s3724_s23 = scalar_lea.vmem %s411_s21, 48  ;;  %s3731_s25 = scalar_lea.vmem %s411_s21, 64 }
  0x1b   : > { %p3725_p13 = scmp.ne.s32.totalorder %s411_s21, %s3724_s23  ;;  %p3732_p2 = scmp.lt.s32.totalorder %s411_s21, %s411_s21 }
  0x1c   : > { %p3733_p5 = scmp.lt.s32.totalorder %s3731_s25, %s3724_s23 }
  0x1d   : > { %p3727_p0 = pnand %p3725_p13, %p3713_p8 }
  0x1e   : > { %p3734_p4 = por %p3733_p5, %p3732_p2 }
  0x1f   : > { %p3728_p1 = pneg %p3727_p0 }
  0x21   : > { %p3735_p3 = pnand %p3734_p4, %p3728_p1 }
  0x23   : > { %3738 = shalt.err (!%p3735_p3)
}
  0x24   : > { %s3801_s26 = smov 16   ;;  %s3802_s17 = smov 1  }
  0x25   : > { %3511 = dma.hbm_to_vmem [thread:$0]  (!%p3918_p6), %s4870_s7, 48, %s411_s21, [#allocation4], %s3801_s26, %s3801_s26, %s3802_s17  }
  0x26   : > { %s3739_s30 = scalar_lea.hbm %s4875_s12, 256 }
  0x27   : > { %p3740_p7 = scmp.ne.s32.totalorder %s4875_s12, %s3739_s30  ;;  %p3746_p9 = scmp.lt.u32.totalorder %s3739_s30, %s4875_s12 }
  0x29   : > { %p3742_p3 = pnand %p3740_p7, %p3713_p8 }
  0x2b   : > { %p3743_p4 = pneg %p3742_p3 }
  0x2d   : > { %p3748_p10 = pnand %p3746_p9, %p3743_p4 }
  0x2f   : > { %3751 = shalt.err (!%p3748_p10)
}
  0x30   : > { %s3752_s21 = scalar_lea.vmem %s3922_s24, 256  ;;  %p3760_p0 = scmp.lt.s32.totalorder %s3922_s24, %s3922_s24 }
  0x31   : > { %p3753_p11 = scmp.ne.s32.totalorder %s3922_s24, %s3752_s21  ;;  %p3761_p1 = scmp.lt.s32.totalorder %s3752_s21, %s3752_s21 }
  0x33   : > { %p3755_p12 = pnand %p3753_p11, %p3713_p8  ;;  %p3762_p2 = por %p3761_p1, %p3760_p0 }
  0x35   : > { %p3756_p13 = pneg %p3755_p12 }
  0x37   : > { %p3763_p5 = pnand %p3762_p2, %p3756_p13 }
  0x39   : > { %3766 = shalt.err (!%p3763_p5)
}
  0x3a   : > { %s3803_s14 = smov 64   ;;  %s3804_s30 = smov 4  }
  0x3b   : > { %3514 = dma.hbm_to_vmem [thread:$0]  (!%p3918_p6), %s4875_s12, 256, %s3922_s24, [#allocation6], %s3803_s14, %s3803_s14, %s3804_s30  }
  0x3c   : > { %p4890_p7 = scmp.ne.s32.totalorder %s4887_s18, 0 }
  0x3d   : > { %p4891_p8 = scmp.ne.s32.totalorder (!%p4890_p7), %s4888_s19, 0 }
  0x3e   : > { %467 = sbr.rel (%p4890_p7) target bundleno = 4133 (0x1025), region = 76 }
  0x45   : > { %3780 = dma.done.wait (%p4891_p8), [#allocation4], 48  }
  0x46   : > { %3782 = vsyncadd (%p4891_p8), [#allocation4], 4294967248 }
  0x47   : > { %3784 = dma.done.wait (%p4891_p8), [#allocation6], 256  }
  0x48   : > { %3786 = vsyncadd (%p4891_p8), [#allocation6], 4294967040  ;;  %p523_p3 = scmp.lt.s32.totalorder %s3789_s29, 1  ;;  %v3805_v0 = vmov 0.0   ;;  %vm3806_vm0 = vmmov 0   ;;  %v3554_v1 = vld [vmem:[%s4864_s1] sm:$0xff]   ;;  %v660_v37 = vlaneseq }
  0x49   : > { %3234 = vmatprep.subr.bf16.mxu0 %v3805_v0  ;;  %3236 = vmatprep.mubr.msk.bf16.mxu0 %vm3806_vm0, %v3805_v0  ;;  %vm562_vm1 = vcmask 130048   ;;  %v3060_v5 = vld [vmem:[%s4865_s2] ss:$0 sm:$0xff]  ;;  %vm613_vm2 = vcmask 253952   ;;  %vm609_vm3 = vcmask 261120   ;;  %v3556_v19 = vld [vmem:[%s4868_s5 + $0x8] sm:$0xff]  }
  0x4a   : > { %s4899_s29 = smov (!%p523_p3, %s3789_s29), 1  ;;  %3240 = vmatprep.subr.bf16.mxu1 %v3805_v0  ;;  %3242 = vmatprep.mubr.msk.bf16.mxu1 %vm3806_vm0, %v3805_v0  ;;  %v3555_v18 = vld [vmem:[%s4868_s5] sm:$0xff]   ;;  %v4015_v20 = vld [vmem:[#allocation3] ss:$0 sm:$0xff]  ;;  %s3807_s14 = smov 64   ;;  %v4019_v39 = vshrl.u32 %v660_v37, 7 }
  0x4b   : > { %s3156_s18 = sshll.u32 %s4899_s29, 4  ;;  %3235 = vmatpush3.bf16.msra.mxu0 %v3554_v1  ;;  %v3063_v41 = vld [vmem:[%s4866_s3] ss:$0 sm:$0xff]  ;;  %v4024_v42 = vand.u32 127, %v660_v37  ;;  %vm691_vm4 = vcmask 1043456   ;;  %vm692_vm6 = vcmask 1044480  }
  0x4c   : > { %s527_s24 = scalar_lea.vmem %s4863_s0, %s3156_s18  ;;  %3246 = vmatprep.subr.bf16.mxu0 %v3805_v0  ;;  %v3064_v45 = vld [vmem:[%s4867_s4] ss:$0 sm:$0xff]  ;;  %v4030_v47 = vadd.s32 8, %v4019_v39  ;;  %v3808_v53 = vmov 65535   ;;  %vm687_vm9 = vcmask 72704   ;;  %v3558_v1 = vld [vmem:[%s4869_s6 + $0x8] sm:$0xff]  }
  0x4d   : > { %v544_v2 = vld [vmem:[%s527_s24] sm:$0xff]  ;;  %v545_v3 = vld [vmem:[%s527_s24 + $0x8] sm:$0x1]  ;;  %v4033_v49 = vadd.s32 1, %v4024_v42  ;;  %v693_v54 = vsel %vm691_vm4, 4294967295, %v3808_v53  ;;  %s3809_s27 = smov 96  }
  0x4e   : > { %v546_v4 = vpack.c.bf16 %v545_v3, %v544_v2  ;;  %vm664_vm5 = vcmp.eq.s32.totalorder %v4030_v47, 8  ;;  %v4042_v57 = vsel %vm692_vm6, %v693_v54, 0  ;;  %v3557_v63 = vld [vmem:[%s4869_s6] sm:$0xff]   ;;  %vm1179_vm4 = vcmask 1040384   ;;  %s3499_s20 = smul.u32 72, %s4899_s29  ;;  %s4892_s15 = sld [smem:[#allocation12_spill]] }
  0x4f   : > { %vm682_vm7 = vcmp.eq.s32.totalorder %v4019_v39, %v4033_v49  ;;  %vm683_vm8 = vcmp.eq.s32.totalorder %v4030_v47, %v4033_v49 }
  0x50   : > { %3237 = vmatmul.mubr.msk.bf16.vlgmr.msra.gmra.mrb[0].mxu0 %vm562_vm1, %v546_v4  ;;  %v684_v59 = vsel %vm682_vm7, 1.0, %v3805_v0  ;;  %v685_v60 = vsel %vm683_vm8, 1.0, %v3805_v0  ;;  %vm1173_vm1 = vcmask 146432  }
  0x51   : > { %3250 = vmatprep.mubr.msk.bf16.mxu0 %vm3806_vm0, %v3805_v0  ;;  %3247 = vmatpush3.bf16.msra.mxu0 %v3555_v18  ;;  %v4048_v62 = vpack.c.bf16 %v685_v60, %v684_v59 }
  0x52   : > { %3248 = vmatprep.subr.bf16.mxu0 %v3805_v0 }
  0x54   : > { %s4843_s26 = scalar_lea.vmem %s4892_s15, %s3499_s20 }
  0x55   : > { %3249 = vmatpush3.bf16.msra.mxu0 %v3556_v19 }
 0x123   : > { %v600_v6 = vpop.f32.mrb[0].mxu0 }
 0x124   : > { %v3238_v7 = vpop.f32.mrb[1].mxu0  ;;  %v601_v9 = vadd.f32 %v3060_v5, %v600_v6 }
 0x125   : > { %v603_v8 = vpop.f32.mrb[2].mxu0 }
 0x126   : > { %v604_v10 = vadd.f32 %v3060_v5, %v603_v8  ;;  %v3239_v11 = vpop.f32.mrb[3].mxu0  ;;  %v620_v15 = vmul.f32 %v601_v9, %v601_v9  ;;  %v610_v16 = vsel %vm609_vm3, %v601_v9, 0.0 }
 0x128   : > { %v614_v12 = vsel %vm613_vm2, %v604_v10, 0.0  ;;  %v621_v13 = vmul.f32 %v604_v10, %v604_v10  ;;  %v622_v17 = vsel %vm609_vm3, %v620_v15, 0.0 }
 0x129   : > { %615 = vadd.xlane.f32.xlu0 %v614_v12 }
 0x12a   : > { %v625_v14 = vsel %vm613_vm2, %v621_v13, 0.0 }
 0x12b   : > { %626 = vadd.xlane.f32.xlu1 %v625_v14 }
 0x12d   : > { %611 = vadd.xlane.f32.xlu0 %v610_v16 }
 0x12f   : > { %623 = vadd.xlane.f32.xlu1 %v622_v17 }
 0x143   : > { %861 = vrot.lane.b32.xlu0 %v4015_v20, %s3807_s14 }
 0x1b6   : > { %v616_v21 = vpop.xlane.xlu0 %615 }
 0x1b7   : > { %v619_v22 = vmul.f32 0.03125, %v616_v21 }
 0x1b8   : > { %v627_v23 = vpop.xlane.xlu1 %626 }
 0x1b9   : > { %v631_v24 = vmul.f32 %v619_v22, %v619_v22  ;;  %v629_v25 = vmul.f32 0.03125, %v627_v23  ;;  %v637_v38 = vsub.f32 %v604_v10, %v619_v22 }
 0x1ba   : > { %v612_v26 = vpop.xlane.xlu0 %611 }
 0x1bb   : > { %v633_v27 = vsub.f32 %v629_v25, %v631_v24  ;;  %v618_v28 = vmul.f32 0.03125, %v612_v26 }
 0x1bc   : > { %v624_v29 = vpop.xlane.xlu1 %623 }
 0x1bd   : > { %v635_v30 = vmax.f32 %v633_v27, 0.0  ;;  %v630_v31 = vmul.f32 %v618_v28, %v618_v28  ;;  %v628_v32 = vmul.f32 0.03125, %v624_v29  ;;  %v636_v44 = vsub.f32 %v601_v9, %v618_v28 }
 0x1be   : > { %v862_v2 = vpop.permute.xlu0 %861 }
 0x1bf   : > { %v639_v33 = vadd.f32 1e-05, %v635_v30  ;;  %v632_v34 = vsub.f32 %v628_v32, %v630_v31 }
 0x1c1   : > { %3569 = vrsqrt.f32 %v639_v33  ;;  %v634_v35 = vmax.f32 %v632_v34, 0.0 }
 0x1c3   : > { %v638_v36 = vadd.f32 1e-05, %v634_v35 }
 0x1c5   : > { %3571 = vrsqrt.f32 %v638_v36 }
 0x1cb   : > { %v3570_v40 = vpop.eup %3569 }
 0x1cc   : > { %v643_v43 = vmul.f32 %v3570_v40, %v637_v38 }
 0x1ce   : > { %v651_v46 = vmul.f32 %v3063_v41, %v643_v43 }
 0x1cf   : > { %v3572_v48 = vpop.eup %3571 }
 0x1d0   : > { %v642_v50 = vmul.f32 %v3572_v48, %v636_v44  ;;  %v659_v51 = vadd.f32 %v3064_v45, %v651_v46 }
 0x1d2   : > { %v650_v52 = vmul.f32 %v3063_v41, %v642_v50  ;;  %v666_v56 = vsel %vm664_vm5, 0.0, %v659_v51 }
 0x1d4   : > { %v658_v55 = vadd.f32 %v3064_v45, %v650_v52 }
 0x1d6   : > { %v667_v58 = vpack.c.bf16 %v666_v56, %v658_v55 }
 0x1d8   : > { %3251 = vmatmul.mubr.msk.bf16.vlgmr.msra.gmra.mrb[4].mxu0 %vm609_vm3, %v667_v58  ;;  %v696_v61 = vand.u32 %v4042_v57, %v667_v58 }
 0x1da   : > { %3241 = vmatpush3.bf16.msra.mxu1 %v696_v61  ;;  %v4090_v61 = vld [vmem:[%s4871_s8] ss:$0 sm:$0xff] }
 0x1db   : > { %3254 = vmatprep.subr.bf16.mxu1 %v3805_v0 }
 0x1dd   : > { %3243 = vmatmul.mubr.msk.bf16.vlgmr.msra.gmra.mrb[0].mxu1 %vm687_vm9, %v4048_v62 }
 0x1de   : > { %3258 = vmatprep.mubr.msk.bf16.mxu1 %vm3806_vm0, %v3805_v0  ;;  %3255 = vmatpush3.bf16.msra.mxu1 %v3557_v63  ;;  %v4097_v63 = vld [vmem:[%s4872_s9] ss:$0 sm:$0xff] }
 0x1df   : > { %3256 = vmatprep.subr.bf16.mxu1 %v3805_v0 }
 0x1e2   : > { %3257 = vmatpush3.bf16.msra.mxu1 %v3558_v1 }
 0x2ab   : > { %v788_v3 = vpop.f32.mrb[4].mxu0 }
 0x2ac   : > { %v864_v4 = vadd.f32 %v862_v2, %v788_v3  ;;  %v3252_v5 = vpop.f32.mrb[5].mxu0 }
 0x2ad   : > { %v791_v6 = vpop.f32.mrb[6].mxu0 }
 0x2ae   : > { %v934_v7 = vsub.f32 0.0, %v864_v4  ;;  %v865_v8 = vadd.f32 %v862_v2, %v791_v6  ;;  %v3253_v9 = vpop.f32.mrb[7].mxu0 }
 0x2b0   : > { %v936_v10 = vmul.f32 1.442695, %v934_v7  ;;  %v935_v11 = vsub.f32 0.0, %v865_v8  ;;  %v732_v12 = vpop.f32.mrb[0].mxu1 }
 0x2b1   : > { %v3244_v13 = vpop.f32.mrb[1].mxu1 }
 0x2b2   : > { %v938_v14 = vmul.f32 1.442695, %v935_v11  ;;  %v735_v15 = vpop.f32.mrb[2].mxu1  ;;  %3573 = vpow2.f32 %v936_v10 }
 0x2b3   : > { %v739_v16 = vpack.c.bf16 %v735_v15, %v732_v12  ;;  %v3245_v17 = vpop.f32.mrb[3].mxu1 }
 0x2b4   : > { %3575 = vpow2.f32 %v938_v14 }
 0x2b5   : > { %3259 = vmatmul.mubr.msk.bf16.vlgmr.msra.gmra.mrb[4].mxu1 %vm609_vm3, %v739_v16 }
 0x2b6   : > { %3278 = vmatprep.mubr.msk.bf16.mxu1 %vm1173_vm1, %v4048_v62 }
 0x2bc   : > { %v3574_v18 = vpop.eup %3573 }
 0x2bd   : > { %v940_v22 = vadd.f32 1.0, %v3574_v18 }
 0x2be   : > { %v3576_v19 = vpop.eup %3575 }
 0x2bf   : > { %v941_v21 = vadd.f32 1.0, %v3576_v19 }
 0x2c1   : > { %3577 = vrcp.f32 %v941_v21 }
 0x2c2   : > { %3579 = vrcp.f32 %v940_v22 }
 0x2cb   : > { %v3578_v23 = vpop.eup %3577 }
 0x2cc   : > { %948 = vrot.lane.b32.xlu1 %v3578_v23, %s3809_s27  ;;  %v3580_v24 = vpop.eup %3579 }
 0x2d0   : > { %946 = vrot.lane.b32.xlu1 %v3580_v24, %s3809_s27 }
 0x33e   : > { %v949_v25 = vpop.permute.xlu1 %948 }
 0x33f   : > { %v4065_v26 = vmul.f32 %v949_v25, %v865_v8 }
 0x341   : > { %958 = vrot.lane.b32.xlu1 %v4065_v26, %s3807_s14  ;;  %v971_v29 = vmul.f32 %v4065_v26, %v4065_v26 }
 0x342   : > { %v947_v27 = vpop.permute.xlu1 %946 }
 0x343   : > { %v4069_v28 = vmul.f32 %v947_v27, %v864_v4 }
 0x345   : > { %976 = vrot.lane.b32.xlu1 %v971_v29, %s3807_s14  ;;  %956 = vrot.lane.b32.xlu0 %v4069_v28, %s3807_s14  ;;  %v970_v30 = vmul.f32 %v4069_v28, %v4069_v28 }
 0x349   : > { %974 = vrot.lane.b32.xlu0 %v970_v30, %s3807_s14 }
 0x388   : > { %v844_v31 = vpop.f32.mrb[4].mxu1 }
 0x389   : > { %v851_v32 = vadd.f32 %v844_v31, %v788_v3  ;;  %v3260_v33 = vpop.f32.mrb[5].mxu1 }
 0x38a   : > { %v847_v34 = vpop.f32.mrb[6].mxu1 }
 0x38b   : > { %v859_v35 = vadd.f32 %v4015_v20, %v851_v32  ;;  %v852_v36 = vadd.f32 %v847_v34, %v791_v6  ;;  %v3261_v37 = vpop.f32.mrb[7].mxu1 }
 0x38d   : > { %v866_v38 = vsub.f32 0.0, %v859_v35  ;;  %v860_v45 = vadd.f32 %v4015_v20, %v852_v36  ;;  %v4118_v36 = vmul.u32 2, %v4024_v42 }
 0x38f   : > { %v868_v40 = vmul.f32 1.442695, %v866_v38  ;;  %v867_v46 = vsub.f32 0.0, %v860_v45  ;;  %vm1016_vm13 = vcmp.eq.s32.totalorder %v4019_v39, %v4118_v36  ;;  %vm1017_vm14 = vcmp.eq.s32.totalorder %v4030_v47, %v4118_v36 }
 0x391   : > { %3581 = vpow2.f32 %v868_v40  ;;  %v870_v48 = vmul.f32 1.442695, %v867_v46 }
 0x39b   : > { %v3582_v41 = vpop.eup %3581 }
 0x39c   : > { %v872_v43 = vadd.f32 1.0, %v3582_v41 }
 0x39e   : > { %3583 = vrcp.f32 %v872_v43 }
 0x39f   : > { %3585 = vpow2.f32 %v870_v48 }
 0x3a8   : > { %v3584_v44 = vpop.eup %3583 }
 0x3a9   : > { %878 = vrot.lane.b32.xlu1 %v3584_v44, %s3809_s27  ;;  %v3586_v58 = vpop.eup %3585  ;;  %v4121_v44 = vadd.s32 1, %v4118_v36 }
 0x3aa   : > { %v873_v59 = vadd.f32 1.0, %v3586_v58 }
 0x3ab   : > { %vm1025_vm10 = vcmp.eq.s32.totalorder %v4019_v39, %v4121_v44  ;;  %vm1026_vm11 = vcmp.eq.s32.totalorder %v4030_v47, %v4121_v44 }
 0x3ac   : > { %3587 = vrcp.f32 %v873_v59  ;;  %v1029_v46 = vsel %vm1026_vm11, 1.0, %v3805_v0 }
 0x3b3   : > { %v959_v50 = vpop.permute.xlu1 %958 }
 0x3b4   : > { %v965_v20 = vsel %vm613_vm2, %v959_v50, 0.0 }
 0x3b6   : > { %v3588_v60 = vpop.eup %3587 }
 0x3b7   : > { %v957_v51 = vpop.permute.xlu0 %956  ;;  %v977_v55 = vpop.permute.xlu1 %976 }
 0x3b8   : > { %v962_v52 = vsel %vm609_vm3, %v957_v51, 0.0  ;;  %v983_v56 = vsel %vm613_vm2, %v977_v55, 0.0 }
 0x3b9   : > { %963 = vadd.xlane.f32.xlu0 %v962_v52  ;;  %v4137_v52 = vadd.s32 16, %v4019_v39 }
 0x3bb   : > { %v975_v53 = vpop.permute.xlu0 %974  ;;  %vm1027_vm12 = vcmp.eq.s32.totalorder %v4137_v52, %v4121_v44  ;;  %vm1018_vm15 = vcmp.eq.s32.totalorder %v4137_v52, %v4118_v36  ;;  %vm1595_vm6 = vcmp.eq.s32.totalorder %v4137_v52, 17 }
 0x3bc   : > { %v980_v54 = vsel %vm609_vm3, %v975_v53, 0.0 }
 0x3bd   : > { %981 = vadd.xlane.f32.xlu0 %v980_v54 }
 0x3c1   : > { %984 = vadd.xlane.f32.xlu0 %v983_v56 }
 0x3cd   : > { %966 = vadd.xlane.f32.xlu1 %v965_v20 }
 0x3d7   : > { %880 = vrot.lane.b32.xlu0 %v3588_v60, %s3809_s27 }
 0x3de   : > { %1002 = vrot.lane.b32.xlu1 %v4090_v61, %s3807_s14 }
 0x3e2   : > { %1007 = vrot.lane.b32.xlu1 %v4097_v63, %s3807_s14 }
 0x41b   : > { %v879_v1 = vpop.permute.xlu1 %878 }
 0x41c   : > { %v4101_v2 = vmul.f32 %v879_v1, %v859_v35  ;;  %v4146_v1 = vsel %vm1027_vm12, 1.0, %v3805_v0  ;;  %vm1792_vm12 = vcmask 1041408  }
 0x41d   : > { %v1032_v47 = vpack.c.bf16 %v4146_v1, %v4146_v1 }
 0x41e   : > { %v886_v3 = vsel %vm609_vm3, %v4101_v2, 0.0  ;;  %v894_v14 = vmul.f32 %v4101_v2, %v4101_v2 }
 0x41f   : > { %887 = vadd.xlane.f32.xlu1 %v886_v3  ;;  %v1019_v3 = vsel %vm1016_vm13, 1.0, %v3805_v0  ;;  %vm1783_vm13 = vcmask 293888  }
 0x420   : > { %v896_v16 = vsel %vm609_vm3, %v894_v14, 0.0 }
 0x446   : > { %v964_v4 = vpop.xlane.xlu0 %963 }
 0x447   : > { %v968_v6 = vmul.f32 0.03125, %v964_v4  ;;  %v1020_v4 = vsel %vm1017_vm14, 1.0, %v3805_v0 }
 0x449   : > { %v988_v9 = vmul.f32 %v968_v6, %v968_v6  ;;  %v994_v31 = vsub.f32 %v4069_v28, %v968_v6 }
 0x44a   : > { %v982_v5 = vpop.xlane.xlu0 %981 }
 0x44b   : > { %v986_v8 = vmul.f32 0.03125, %v982_v5 }
 0x44d   : > { %v990_v12 = vsub.f32 %v986_v8, %v988_v9 }
 0x44e   : > { %v985_v7 = vpop.xlane.xlu0 %984 }
 0x44f   : > { %v992_v15 = vmax.f32 %v990_v12, 0.0  ;;  %v987_v22 = vmul.f32 0.03125, %v985_v7  ;;  %v4153_v12 = vpack.c.bf16 %v1020_v4, %v1019_v3 }
 0x451   : > { %v996_v21 = vadd.f32 1e-05, %v992_v15 }
 0x452   : > { %v881_v10 = vpop.permute.xlu0 %880 }
 0x453   : > { %v4105_v11 = vmul.f32 %v881_v10, %v860_v45  ;;  %3589 = vrsqrt.f32 %v996_v21 }
 0x455   : > { %v889_v13 = vsel %vm613_vm2, %v4105_v11, 0.0  ;;  %v895_v17 = vmul.f32 %v4105_v11, %v4105_v11 }
 0x456   : > { %890 = vadd.xlane.f32.xlu0 %v889_v13 }
 0x457   : > { %v899_v24 = vsel %vm613_vm2, %v895_v17, 0.0  ;;  %vm1170_vm2 = vcmp.eq.s32.totalorder %v4137_v52, %v4033_v49 }
 0x45a   : > { %v967_v18 = vpop.xlane.xlu1 %966  ;;  %897 = vadd.xlane.f32.xlu0 %v896_v16 }
 0x45b   : > { %v969_v19 = vmul.f32 0.03125, %v967_v18 }
 0x45d   : > { %v989_v23 = vmul.f32 %v969_v19, %v969_v19  ;;  %v3590_v30 = vpop.eup %3589  ;;  %v995_v34 = vsub.f32 %v4065_v26, %v969_v19  ;;  %v1028_v26 = vsel %vm1025_vm10, 1.0, %v3805_v0 }
 0x45e   : > { %900 = vadd.xlane.f32.xlu0 %v899_v24  ;;  %v1003_v32 = vpop.permute.xlu1 %1002  ;;  %v1000_v33 = vmul.f32 %v3590_v30, %v994_v31  ;;  %v4131_v48 = vpack.c.bf16 %v1029_v46, %v1028_v26 }
 0x45f   : > { %v991_v25 = vsub.f32 %v987_v22, %v989_v23 }
 0x460   : > { %v1005_v38 = vmul.f32 %v1003_v32, %v1000_v33  ;;  %3264 = vmatprep.mubr.msk.bf16.mxu0 %vm687_vm9, %v4131_v48 }
 0x461   : > { %v993_v27 = vmax.f32 %v991_v25, 0.0 }
 0x462   : > { %v1008_v41 = vpop.permute.xlu1 %1007 }
 0x463   : > { %v997_v29 = vadd.f32 1e-05, %v993_v27  ;;  %v1010_v45 = vadd.f32 %v1008_v41, %v1005_v38 }
 0x465   : > { %3591 = vrsqrt.f32 %v997_v29 }
 0x46f   : > { %v3592_v35 = vpop.eup %3591 }
 0x470   : > { %v1001_v37 = vmul.f32 %v3592_v35, %v995_v34  ;;  %v4185_v35 = vsel %vm1170_vm2, 1.0, %v3805_v0 }
 0x472   : > { %v1006_v40 = vmul.f32 %v1003_v32, %v1001_v37  ;;  %v3559_v37 = vld [vmem:[%s4868_s5 + $0x10] sm:$0xff]  }
 0x474   : > { %v1011_v43 = vadd.f32 %v1008_v41, %v1006_v40  ;;  %v1172_v40 = vpack.c.bf16 %v4185_v35, %v4185_v35  ;;  %v3560_v41 = vld [vmem:[%s4868_s5 + $0x18] sm:$0xff]  }
 0x476   : > { %v1013_v28 = vsel %vm664_vm5, 0.0, %v1011_v43  ;;  %v3562_v43 = vld [vmem:[%s4869_s6 + $0x18] sm:$0xff]   ;;  %vm1418_vm5 = vcmask 254976  }
 0x477   : > { %v1034_v42 = vpack.c.bf16 %v1013_v28, %v1010_v45 }
 0x479   : > { %1036 = vrot.lane.b32.xlu1 %v1034_v42, %s3807_s14 }
 0x4ac   : > { %v888_v50 = vpop.xlane.xlu1 %887 }
 0x4ad   : > { %v892_v53 = vmul.f32 0.03125, %v888_v50 }
 0x4af   : > { %v904_v55 = vmul.f32 %v892_v53, %v892_v53  ;;  %v910_v15 = vsub.f32 %v4101_v2, %v892_v53  ;;  %v4167_v2 = vsel %vm1018_vm15, 1.0, %v3805_v0  ;;  %vm2094_vm15 = vcmask 257024  }
 0x4e3   : > { %v891_v51 = vpop.xlane.xlu0 %890 }
 0x4e4   : > { %v893_v56 = vmul.f32 0.03125, %v891_v51 }
 0x4e6   : > { %v905_v5 = vmul.f32 %v893_v56, %v893_v56  ;;  %v911_v18 = vsub.f32 %v4105_v11, %v893_v56  ;;  %v1023_v11 = vpack.c.bf16 %v4167_v2, %v4167_v2 }
 0x4e7   : > { %v898_v54 = vpop.xlane.xlu0 %897 }
 0x4e8   : > { %v902_v58 = vmul.f32 0.03125, %v898_v54 }
 0x4ea   : > { %v906_v59 = vsub.f32 %v902_v58, %v904_v55 }
 0x4eb   : > { %v1037_v20 = vpop.permute.xlu1 %1036  ;;  %v901_v60 = vpop.xlane.xlu0 %900 }
 0x4ec   : > { %v908_v6 = vmax.f32 %v906_v59, 0.0  ;;  %v1045_v7 = vand.u32 %v1037_v20, %v4042_v57  ;;  %v903_v8 = vmul.f32 0.03125, %v901_v60 }
 0x4ee   : > { %v912_v9 = vadd.f32 1e-05, %v908_v6  ;;  %v907_v10 = vsub.f32 %v903_v8, %v905_v5  ;;  %3262 = vmatprep.subr.bf16.mxu0 %v1045_v7 }
 0x4ef   : > { %3263 = vmatpush3.bf16.msra.mxu0 %v1045_v7 }
 0x4f0   : > { %3593 = vrsqrt.f32 %v912_v9  ;;  %v909_v13 = vmax.f32 %v907_v10, 0.0 }
 0x4f2   : > { %v913_v14 = vadd.f32 1e-05, %v909_v13  ;;  %3265 = vmatmul.mubr.msk.bf16.vlgmr.msra.gmra.mrb[8].mxu0 %vm687_vm9, %v1032_v47 }
 0x4f3   : > { %3270 = vmatprep.mubr.msk.bf16.mxu0 %vm687_vm9, %v4153_v12 }
 0x4f4   : > { %3595 = vrsqrt.f32 %v913_v14 }
 0x4fa   : > { %v3594_v16 = vpop.eup %3593 }
 0x4fb   : > { %v916_v17 = vmul.f32 %v3594_v16, %v910_v15 }
 0x4fd   : > { %v924_v22 = vmul.f32 %v4090_v61, %v916_v17 }
 0x4fe   : > { %v3596_v19 = vpop.eup %3595 }
 0x4ff   : > { %v917_v21 = vmul.f32 %v3596_v19, %v911_v18  ;;  %v932_v24 = vadd.f32 %v4097_v63, %v924_v22 }
 0x501   : > { %v925_v23 = vmul.f32 %v4090_v61, %v917_v21  ;;  %v4175_v61 = vld [vmem:[#allocation3 + $0x1] ss:$0 sm:$0xff] }
 0x502   : > { %1376 = vrot.lane.b32.xlu0 %v4175_v61, %s3807_s14 }
 0x503   : > { %v933_v25 = vadd.f32 %v4097_v63, %v925_v23  ;;  %v3561_v63 = vld [vmem:[%s4869_s6 + $0x10] sm:$0xff]  }
 0x505   : > { %v1033_v27 = vpack.c.bf16 %v933_v25, %v932_v24 }
 0x507   : > { %v1102_v29 = vand.u32 %v1033_v27, %v4042_v57 }
 0x509   : > { %3268 = vmatprep.subr.bf16.mxu0 %v1102_v29 }
 0x50a   : > { %3269 = vmatpush3.bf16.msra.mxu0 %v1102_v29 }
 0x50b   : > { %3290 = vmatprep.subr.bf16.mxu0 %v3561_v63 }
 0x50d   : > { %3271 = vmatmul.mubr.msk.bf16.vlgmr.msra.gmra.mrb[8].mxu0 %vm687_vm9, %v1023_v11 }
 0x50e   : > { %3291 = vmatpush3.bf16.msra.mxu0 %v3561_v63 }
 0x50f   : > { %3292 = vmatprep.subr.bf16.mxu0 %v3562_v43 }
 0x512   : > { %3293 = vmatpush3.bf16.msra.mxu0 %v3562_v43 }
 0x513   : > { %3330 = vmatprep.subr.bf16.mxu0 %v3805_v0 }
 0x574   : > { %v1377_v51 = vpop.permute.xlu0 %1376 }
 0x5e0   : > { %v3272_v57 = vpop.f32.mrb[8].mxu0 }
 0x5e1   : > { %v1138_v30 = vpop.f32.mrb[9].mxu0  ;;  %v1153_v34 = vpack.c.bf16 %v3272_v57, %v3272_v57 }
 0x5e2   : > { %v3273_v31 = vpop.f32.mrb[10].mxu0 }
 0x5e3   : > { %v1141_v32 = vpop.f32.mrb[11].mxu0  ;;  %v1181_v38 = vsel %vm1179_vm4, %v1153_v34, 0 }
 0x5e4   : > { %v1152_v33 = vpack.c.bf16 %v1141_v32, %v1138_v30 }
 0x5e6   : > { %3274 = vmatprep.subr.bf16.mxu1 %v1152_v33 }
 0x5e7   : > { %3275 = vmatpush3.bf16.msra.mxu1 %v1152_v33 }
 0x5e8   : > { %3498 = vmatprep.subr.msk.bf16.mxu1 %vm1179_vm4, %v1153_v34 }
 0x5eb   : > { %3277 = vmatpush3.bf16.msra.mxu1 %v1181_v38 }
 0x5ec   : > { %3282 = vmatprep.subr.bf16.mxu1 %v3559_v37 }
 0x5ee   : > { %3279 = vmatmul.mubr.msk.bf16.vlgmr.msra.gmra.mrb[8].mxu1 %vm1173_vm1, %v1172_v40 }
 0x5ef   : > { %3283 = vmatpush3.bf16.msra.mxu1 %v3559_v37  ;;  %3286 = vmatprep.mubr.msk.bf16.mxu1 %vm609_vm3, %v1152_v33 }
 0x5f0   : > { %3284 = vmatprep.subr.bf16.mxu1 %v3560_v41 }
 0x5f3   : > { %3285 = vmatpush3.bf16.msra.mxu1 %v3560_v41 }
 0x5f4   : > { %3298 = vmatprep.subr.bf16.mxu1 %v3805_v0 }
 0x5f6   : > { %3287 = vmatmul.mubr.msk.bf16.vlgmr.msra.gmra.mrb[12].mxu1 %vm609_vm3, %v1153_v34 }
 0x5f7   : > { %3302 = vmatprep.mubr.msk.bf16.mxu1 %vm3806_vm0, %v3805_v0 }
 0x6c1   : > { %v3280_v45 = vpop.f32.mrb[8].mxu1 }
 0x6c2   : > { %v1217_v28 = vpop.f32.mrb[9].mxu1  ;;  %v1232_v50 = vpack.c.bf16 %v3280_v45, %v3280_v45 }
 0x6c3   : > { %v3281_v42 = vpop.f32.mrb[10].mxu1 }
 0x6c4   : > { %v1220_v26 = vpop.f32.mrb[11].mxu1 }
 0x6c5   : > { %v1231_v46 = vpack.c.bf16 %v1220_v26, %v1217_v28 }
 0x6c7   : > { %3294 = vmatprep.mubr.msk.bf16.mxu0 %vm609_vm3, %v1231_v46 }
 0x6c8   : > { %3295 = vmatmul.mubr.msk.bf16.vlgmr.msra.gmra.mrb[12].mxu0 %vm609_vm3, %v1232_v50 }
 0x6c9   : > { %v3288_v53 = vpop.f32.mrb[12].mxu1  ;;  %3336 = vmatprep.mubr.msk.bf16.mxu0 %vm3806_vm0, %v3805_v0 }
 0x6ca   : > { %v1381_v54 = vadd.f32 %v3288_v53, %v1377_v51  ;;  %v1284_v55 = vpop.f32.mrb[13].mxu1 }
 0x6cb   : > { %v1379_v56 = vadd.f32 %v1377_v51, %v1284_v55  ;;  %v3289_v58 = vpop.f32.mrb[14].mxu1 }
 0x6cc   : > { %v1287_v59 = vpop.f32.mrb[15].mxu1  ;;  %v1481_v20 = vsub.f32 0.0, %v1381_v54 }
 0x6cd   : > { %v1479_v60 = vsub.f32 0.0, %v1379_v56  ;;  %v1380_v3 = vadd.f32 %v1377_v51, %v1287_v59 }
 0x6ce   : > { %v1486_v6 = vmul.f32 1.442695, %v1481_v20 }
 0x6cf   : > { %v1482_v4 = vmul.f32 1.442695, %v1479_v60  ;;  %v1480_v5 = vsub.f32 0.0, %v1380_v3 }
 0x6d1   : > { %3597 = vpow2.f32 %v1482_v4  ;;  %v1484_v7 = vmul.f32 1.442695, %v1480_v5 }
 0x6d3   : > { %3599 = vpow2.f32 %v1484_v7 }
 0x6d4   : > { %3601 = vpow2.f32 %v1486_v6 }
 0x6db   : > { %v3598_v8 = vpop.eup %3597 }
 0x6dc   : > { %v1488_v9 = vadd.f32 1.0, %v3598_v8 }
 0x6dd   : > { %v3600_v10 = vpop.eup %3599 }
 0x6de   : > { %3603 = vrcp.f32 %v1488_v9  ;;  %v1489_v47 = vadd.f32 1.0, %v3600_v10  ;;  %v3602_v13 = vpop.eup %3601  ;;  %v4258_v10 = vld [vmem:[%s4871_s8 + $0x1] ss:$0 sm:$0xff] }
 0x6df   : > { %v1490_v14 = vadd.f32 1.0, %v3602_v13  ;;  %v4266_v13 = vld [vmem:[%s4872_s9 + $0x1] ss:$0 sm:$0xff] }
 0x6e0   : > { %3605 = vrcp.f32 %v1489_v47 }
 0x6e1   : > { %3607 = vrcp.f32 %v1490_v14 }
 0x6e8   : > { %v3604_v15 = vpop.eup %3603 }
 0x6e9   : > { %1497 = vrot.lane.b32.xlu1 %v3604_v15, %s3809_s27 }
 0x6ea   : > { %v3606_v16 = vpop.eup %3605 }
 0x6eb   : > { %v3608_v17 = vpop.eup %3607 }
 0x6ed   : > { %1499 = vrot.lane.b32.xlu1 %v3606_v16, %s3809_s27 }
 0x6f1   : > { %1501 = vrot.lane.b32.xlu1 %v3608_v17, %s3809_s27 }
 0x75b   : > { %v1498_v18 = vpop.permute.xlu1 %1497 }
 0x75c   : > { %v4214_v21 = vmul.f32 %v1498_v18, %v1379_v56 }
 0x75e   : > { %v1533_v25 = vmul.f32 %v4214_v21, %v4214_v21 }
 0x75f   : > { %v1500_v19 = vpop.permute.xlu1 %1499 }
 0x760   : > { %v4216_v22 = vmul.f32 %v1500_v19, %v1380_v3 }
 0x762   : > { %1514 = vrot.lane.b32.xlu1 %v4216_v22, %s3807_s14  ;;  %v1534_v29 = vmul.f32 %v4216_v22, %v4216_v22 }
 0x763   : > { %v1502_v23 = vpop.permute.xlu1 %1501 }
 0x764   : > { %v4220_v24 = vmul.f32 %v1502_v23, %v1381_v54 }
 0x766   : > { %1539 = vrot.lane.b32.xlu1 %v1533_v25, %s3807_s14  ;;  %1516 = vrot.lane.b32.xlu0 %v4220_v24, %s3807_s14  ;;  %v1535_v27 = vmul.f32 %v4220_v24, %v4220_v24 }
 0x76a   : > { %1512 = vrot.lane.b32.xlu0 %v4214_v21, %s3807_s14  ;;  %1543 = vrot.lane.b32.xlu1 %v1535_v27, %s3807_s14 }
 0x76e   : > { %1541 = vrot.lane.b32.xlu0 %v1534_v29, %s3807_s14 }
 0x79b   : > { %v3296_v11 = vpop.f32.mrb[12].mxu0 }
 0x79c   : > { %v1366_v63 = vadd.f32 %v3296_v11, %v3288_v53  ;;  %v1350_v57 = vpop.f32.mrb[13].mxu0 }
 0x79d   : > { %v1364_v30 = vadd.f32 %v1350_v57, %v1284_v55  ;;  %v3297_v31 = vpop.f32.mrb[14].mxu0 }
 0x79e   : > { %v1353_v32 = vpop.f32.mrb[15].mxu0  ;;  %v4239_v37 = vadd.f32 %v4175_v61, %v1366_v63 }
 0x79f   : > { %v1365_v33 = vadd.f32 %v1353_v32, %v1287_v59  ;;  %v4244_v43 = vadd.f32 %v4175_v61, %v1364_v30 }
 0x7a0   : > { %v1384_v40 = vsub.f32 0.0, %v4239_v37 }
 0x7a1   : > { %v4236_v34 = vadd.f32 %v4175_v61, %v1365_v33  ;;  %v1382_v42 = vsub.f32 0.0, %v4244_v43 }
 0x7a2   : > { %v1389_v28 = vmul.f32 1.442695, %v1384_v40 }
 0x7a3   : > { %v1383_v38 = vsub.f32 0.0, %v4236_v34  ;;  %v1385_v51 = vmul.f32 1.442695, %v1382_v42 }
 0x7a5   : > { %v1387_v41 = vmul.f32 1.442695, %v1383_v38 }
 0x7a7   : > { %3609 = vpow2.f32 %v1387_v41 }
 0x7a8   : > { %3611 = vpow2.f32 %v1389_v28 }
 0x7a9   : > { %3613 = vpow2.f32 %v1385_v51 }
 0x7b1   : > { %v3610_v56 = vpop.eup %3609 }
 0x7b2   : > { %v1392_v60 = vadd.f32 1.0, %v3610_v56  ;;  %v3612_v3 = vpop.eup %3611 }
 0x7b3   : > { %v1393_v5 = vadd.f32 1.0, %v3612_v3  ;;  %v3614_v6 = vpop.eup %3613 }
 0x7b4   : > { %3615 = vrcp.f32 %v1392_v60  ;;  %v1391_v7 = vadd.f32 1.0, %v3614_v6 }
 0x7b5   : > { %3617 = vrcp.f32 %v1393_v5 }
 0x7b6   : > { %3619 = vrcp.f32 %v1391_v7 }
 0x7be   : > { %v3616_v8 = vpop.eup %3615 }
 0x7bf   : > { %v3618_v9 = vpop.eup %3617 }
 0x7c0   : > { %v3620_v47 = vpop.eup %3619 }
 0x7d4   : > { %v1515_v45 = vpop.permute.xlu1 %1514 }
 0x7d5   : > { %v1524_v59 = vsel %vm609_vm3, %v1515_v45, 0.0 }
 0x7d8   : > { %v1517_v26 = vpop.permute.xlu0 %1516  ;;  %v1540_v46 = vpop.permute.xlu1 %1539 }
 0x7d9   : > { %v1527_v50 = vsel %vm1418_vm5, %v1517_v26, 0.0  ;;  %v1548_v58 = vsel %vm609_vm3, %v1540_v46, 0.0 }
 0x7da   : > { %1528 = vadd.xlane.f32.xlu0 %v1527_v50 }
 0x7dc   : > { %v1513_v53 = vpop.permute.xlu0 %1512  ;;  %v1544_v54 = vpop.permute.xlu1 %1543 }
 0x7dd   : > { %v1521_v55 = vsel %vm609_vm3, %v1513_v53, 0.0  ;;  %v1554_v61 = vsel %vm1418_vm5, %v1544_v54, 0.0 }
 0x7de   : > { %1522 = vadd.xlane.f32.xlu0 %v1521_v55  ;;  %1555 = vadd.xlane.f32.xlu1 %v1554_v61 }
 0x7e0   : > { %v1542_v20 = vpop.permute.xlu0 %1541 }
 0x7e1   : > { %v1551_v4 = vsel %vm609_vm3, %v1542_v20, 0.0 }
 0x7e2   : > { %1549 = vadd.xlane.f32.xlu0 %v1548_v58  ;;  %1525 = vadd.xlane.f32.xlu1 %v1524_v59 }
 0x7e6   : > { %1552 = vadd.xlane.f32.xlu0 %v1551_v4 }
 0x7f3   : > { %1402 = vrot.lane.b32.xlu1 %v3616_v8, %s3809_s27 }
 0x7f7   : > { %1404 = vrot.lane.b32.xlu1 %v3618_v9, %s3809_s27 }
 0x7fb   : > { %1581 = vrot.lane.b32.xlu1 %v4258_v10, %s3807_s14 }
 0x7fc   : > { %1400 = vrot.lane.b32.xlu0 %v3620_v47, %s3809_s27 }
 0x800   : > { %1587 = vrot.lane.b32.xlu0 %v4266_v13, %s3807_s14 }
 0x867   : > { %v1529_v14 = vpop.xlane.xlu0 %1528 }
 0x868   : > { %v1532_v18 = vmul.f32 0.03125, %v1529_v14 }
 0x86a   : > { %v1562_v57 = vmul.f32 %v1532_v18, %v1532_v18 }
 0x86b   : > { %v1523_v15 = vpop.xlane.xlu0 %1522  ;;  %v1556_v16 = vpop.xlane.xlu1 %1555 }
 0x86c   : > { %v1530_v17 = vmul.f32 0.03125, %v1523_v15  ;;  %v1559_v11 = vmul.f32 0.03125, %v1556_v16 }
 0x86e   : > { %v1560_v25 = vmul.f32 %v1530_v17, %v1530_v17  ;;  %v1565_v40 = vsub.f32 %v1559_v11, %v1562_v57  ;;  %v1569_v20 = vsub.f32 %v4214_v21, %v1530_v17 }
 0x86f   : > { %v1550_v19 = vpop.xlane.xlu0 %1549  ;;  %v1526_v23 = vpop.xlane.xlu1 %1525 }
 0x870   : > { %v1557_v27 = vmul.f32 0.03125, %v1550_v19  ;;  %v1531_v29 = vmul.f32 0.03125, %v1526_v23  ;;  %v1568_v50 = vmax.f32 %v1565_v40, 0.0  ;;  %v1571_v19 = vsub.f32 %v4220_v24, %v1532_v18 }
 0x872   : > { %v1563_v63 = vsub.f32 %v1557_v27, %v1560_v25  ;;  %v1561_v33 = vmul.f32 %v1531_v29, %v1531_v29  ;;  %v1570_v5 = vsub.f32 %v4216_v22, %v1531_v29 }
 0x873   : > { %v1553_v30 = vpop.xlane.xlu0 %1552  ;;  %v1403_v31 = vpop.permute.xlu1 %1402 }
 0x874   : > { %v1566_v32 = vmax.f32 %v1563_v63, 0.0  ;;  %v1558_v38 = vmul.f32 0.03125, %v1553_v30  ;;  %v4281_v61 = vmul.f32 %v1403_v31, %v4236_v34 }
 0x876   : > { %v1572_v41 = vadd.f32 1e-05, %v1566_v32  ;;  %v1564_v45 = vsub.f32 %v1558_v38, %v1561_v33  ;;  %v1426_v4 = vmul.f32 %v4281_v61, %v4281_v61 }
 0x877   : > { %v1401_v28 = vpop.permute.xlu0 %1400  ;;  %v1405_v42 = vpop.permute.xlu1 %1404 }
 0x878   : > { %3621 = vrsqrt.f32 %v1572_v41  ;;  %v1567_v26 = vmax.f32 %v1564_v45, 0.0  ;;  %v4271_v46 = vmul.f32 %v1405_v42, %v4239_v37  ;;  %v4274_v53 = vmul.f32 %v1401_v28, %v4244_v43 }
 0x879   : > { %v1574_v37 = vadd.f32 1e-05, %v1568_v50  ;;  %v1415_v43 = vsel %vm609_vm3, %v4281_v61, 0.0  ;;  %v1431_v47 = vsel %vm609_vm3, %v1426_v4, 0.0  ;;  %v4314_v4 = vadd.s32 32, %v4019_v39 }
 0x87a   : > { %v1573_v51 = vadd.f32 1e-05, %v1567_v26  ;;  %v1419_v54 = vsel %vm1418_vm5, %v4271_v46, 0.0  ;;  %v1427_v55 = vmul.f32 %v4271_v46, %v4271_v46  ;;  %v1412_v58 = vsel %vm609_vm3, %v4274_v53, 0.0 }
 0x87b   : > { %1420 = vadd.xlane.f32.xlu1 %v1419_v54  ;;  %v1425_v59 = vmul.f32 %v4274_v53, %v4274_v53  ;;  %v1582_v7 = vpop.permute.xlu1 %1581  ;;  %v1588_v21 = vpop.permute.xlu0 %1587  ;;  %vm1608_vm8 = vcmp.eq.s32.totalorder %v4314_v4, %v4121_v44  ;;  %vm1602_vm10 = vcmp.eq.s32.totalorder %v4314_v4, %v4118_v36  ;;  %vm1778_vm14 = vcmp.eq.s32.totalorder %v4314_v4, %v4033_v49 }
 0x87c   : > { %3623 = vrsqrt.f32 %v1573_v51  ;;  %v1434_v56 = vsel %vm1418_vm5, %v1427_v55, 0.0 }
 0x87d   : > { %1435 = vadd.xlane.f32.xlu0 %v1434_v56  ;;  %3625 = vrsqrt.f32 %v1574_v37  ;;  %v1428_v3 = vsel %vm609_vm3, %v1425_v59, 0.0  ;;  %v4302_v37 = vadd.s32 24, %v4019_v39 }
 0x87f   : > { %1413 = vadd.xlane.f32.xlu1 %v1412_v58  ;;  %vm1607_vm7 = vcmp.eq.s32.totalorder %v4302_v37, %v4121_v44  ;;  %vm1601_vm9 = vcmp.eq.s32.totalorder %v4302_v37, %v4118_v36  ;;  %vm1777_vm11 = vcmp.eq.s32.totalorder %v4302_v37, %v4033_v49  ;;  %v1780_v49 = vsel %vm1778_vm14, 1.0, %v3805_v0 }
 0x880   : > { %v1782_v37 = vpack.c.bf16 %v1780_v49, %v1780_v49 }
 0x881   : > { %1416 = vadd.xlane.f32.xlu0 %v1415_v43 }
 0x882   : > { %v3622_v34 = vpop.eup %3621 }
 0x883   : > { %v1578_v60 = vmul.f32 %v3622_v34, %v1569_v20 }
 0x885   : > { %1429 = vadd.xlane.f32.xlu0 %v1428_v3  ;;  %v1584_v9 = vmul.f32 %v1582_v7, %v1578_v60  ;;  %v1609_v3 = vsel %vm1607_vm7, 1.0, %v3805_v0 }
 0x886   : > { %v3624_v6 = vpop.eup %3623 }
 0x887   : > { %v1579_v8 = vmul.f32 %v3624_v6, %v1570_v5  ;;  %v3626_v15 = vpop.eup %3625  ;;  %v1590_v16 = vadd.f32 %v1588_v21, %v1584_v9 }
 0x888   : > { %v1580_v25 = vmul.f32 %v3626_v15, %v1571_v19 }
 0x889   : > { %v1585_v14 = vmul.f32 %v1582_v7, %v1579_v8  ;;  %1432 = vadd.xlane.f32.xlu0 %v1431_v47 }
 0x88a   : > { %v1586_v22 = vmul.f32 %v1582_v7, %v1580_v25  ;;  %v4318_v7 = vpack.c.bf16 %v1609_v3, %v4146_v1 }
 0x88b   : > { %v1591_v17 = vadd.f32 %v1588_v21, %v1585_v14 }
 0x88c   : > { %v1592_v27 = vadd.f32 %v1588_v21, %v1586_v22 }
 0x88d   : > { %v1615_v23 = vpack.c.bf16 %v1591_v17, %v1590_v16 }
 0x88e   : > { %v1598_v29 = vsel %vm1595_vm6, 0.0, %v1592_v27 }
 0x88f   : > { %v1616_v11 = vpack.c.bf16 %v1598_v29, %v1598_v29 }
 0x890   : > { %1619 = vrot.lane.b32.xlu1 %v1615_v23, %s3807_s14 }
 0x89f   : > { %1621 = vrot.lane.b32.xlu0 %v1616_v11, %s3807_s14  ;;  %v4362_v11 = vsel %vm1602_vm10, 1.0, %v3805_v0 }
 0x908   : > { %v1421_v63 = vpop.xlane.xlu1 %1420 }
 0x909   : > { %v1424_v57 = vmul.f32 0.03125, %v1421_v63  ;;  %v1606_v63 = vpack.c.bf16 %v4362_v11, %v4362_v11 }
 0x90a   : > { %v1436_v30 = vpop.xlane.xlu0 %1435 }
 0x90b   : > { %v1442_v31 = vmul.f32 %v1424_v57, %v1424_v57  ;;  %v1439_v32 = vmul.f32 0.03125, %v1436_v30  ;;  %v1451_v6 = vsub.f32 %v4271_v46, %v1424_v57  ;;  %v4329_v46 = vsel %vm1608_vm8, 1.0, %v3805_v0 }
 0x90c   : > { %v1414_v33 = vpop.xlane.xlu1 %1413  ;;  %v1612_v17 = vpack.c.bf16 %v4329_v46, %v4329_v46 }
 0x90d   : > { %v1445_v38 = vsub.f32 %v1439_v32, %v1442_v31  ;;  %v1422_v18 = vmul.f32 0.03125, %v1414_v33 }
 0x90e   : > { %v1417_v24 = vpop.xlane.xlu0 %1416 }
 0x90f   : > { %v1448_v40 = vmax.f32 %v1445_v38, 0.0  ;;  %v1440_v52 = vmul.f32 %v1422_v18, %v1422_v18  ;;  %v1423_v28 = vmul.f32 0.03125, %v1417_v24  ;;  %v1449_v8 = vsub.f32 %v4274_v53, %v1422_v18 }
 0x910   : > { %v1620_v41 = vpop.permute.xlu1 %1619 }
 0x911   : > { %3299 = vmatpush3.bf16.msra.mxu1 %v1620_v41  ;;  %v1454_v26 = vadd.f32 1e-05, %v1448_v40  ;;  %v1441_v54 = vmul.f32 %v1423_v28, %v1423_v28  ;;  %v1450_v21 = vsub.f32 %v4281_v61, %v1423_v28 }
 0x912   : > { %v1430_v45 = vpop.xlane.xlu0 %1429  ;;  %3300 = vmatprep.subr.bf16.mxu1 %v3805_v0 }
 0x913   : > { %v1437_v42 = vmul.f32 0.03125, %v1430_v45  ;;  %3627 = vrsqrt.f32 %v1454_v26  ;;  %v1779_v45 = vsel %vm1777_vm11, 1.0, %v3805_v0 }
 0x915   : > { %v1443_v50 = vsub.f32 %v1437_v42, %v1440_v52 }
 0x916   : > { %v1433_v51 = vpop.xlane.xlu0 %1432 }
 0x917   : > { %v1446_v55 = vmax.f32 %v1443_v50, 0.0  ;;  %v1438_v56 = vmul.f32 0.03125, %v1433_v51  ;;  %v1781_v50 = vpack.c.bf16 %v1779_v45, %v4185_v35  ;;  %v3565_v35 = vld [vmem:[%s4869_s6 + $0x20] sm:$0xff]  }
 0x919   : > { %v1452_v58 = vadd.f32 1e-05, %v1446_v55  ;;  %v1444_v43 = vsub.f32 %v1438_v56, %v1441_v54  ;;  %v3563_v55 = vld [vmem:[%s4868_s5 + $0x20] sm:$0xff]   ;;  %v3564_v56 = vld [vmem:[%s4868_s5 + $0x28] sm:$0xff]  }
 0x91a   : > { %v1622_v59 = vpop.permute.xlu0 %1621 }
 0x91b   : > { %3629 = vrsqrt.f32 %v1452_v58  ;;  %v1447_v20 = vmax.f32 %v1444_v43, 0.0  ;;  %v1633_v34 = vsel %vm1179_vm4, %v1622_v59, 0 }
 0x91c   : > { %3301 = vmatpush3.bf16.msra.mxu1 %v1633_v34 }
 0x91d   : > { %v1453_v60 = vadd.f32 1e-05, %v1447_v20  ;;  %3314 = vmatprep.subr.bf16.mxu1 %v3805_v0  ;;  %v3628_v5 = vpop.eup %3627 }
 0x91e   : > { %v1460_v47 = vmul.f32 %v3628_v5, %v1451_v6 }
 0x91f   : > { %3631 = vrsqrt.f32 %v1453_v60  ;;  %3303 = vmatmul.mubr.msk.bf16.vlgmr.msra.gmra.mrb[16].mxu1 %vm1173_vm1, %v4131_v48 }
 0x920   : > { %3306 = vmatprep.mubr.msk.bf16.mxu1 %vm3806_vm0, %v3805_v0  ;;  %v1469_v53 = vmul.f32 %v4258_v10, %v1460_v47 }
 0x922   : > { %v1478_v23 = vadd.f32 %v4266_v13, %v1469_v53 }
 0x924   : > { %v1614_v27 = vpack.c.bf16 %v1478_v23, %v1478_v23 }
 0x925   : > { %v3630_v9 = vpop.eup %3629 }
 0x926   : > { %v1458_v14 = vmul.f32 %v3630_v9, %v1449_v8  ;;  %v1700_v29 = vsel %vm1179_vm4, %v1614_v27, 0 }
 0x927   : > { %3307 = vmatmul.mubr.msk.bf16.gmra.mrb[20].mxu1 %vm1173_vm1, %v4318_v7 }
 0x928   : > { %3310 = vmatprep.mubr.msk.bf16.mxu1 %vm3806_vm0, %v3805_v0  ;;  %v1467_v16 = vmul.f32 %v4258_v10, %v1458_v14 }
 0x929   : > { %v3632_v1 = vpop.eup %3631 }
 0x92a   : > { %v1459_v15 = vmul.f32 %v3632_v1, %v1450_v21  ;;  %v1476_v61 = vadd.f32 %v4266_v13, %v1467_v16 }
 0x92c   : > { %v1468_v19 = vmul.f32 %v4258_v10, %v1459_v15  ;;  %v1603_v10 = vsel %vm1601_vm9, 1.0, %v3805_v0 }
 0x92e   : > { %v1477_v25 = vadd.f32 %v4266_v13, %v1468_v19  ;;  %v4353_v13 = vpack.c.bf16 %v1603_v10, %v4167_v2  ;;  %v4369_v2 = vld [vmem:[#allocation3 + $0x2] ss:$0 sm:$0xff] }
 0x92f   : > { %3311 = vmatmul.mubr.msk.bf16.gmra.mrb[24].mxu1 %vm1173_vm1, %v1612_v17  ;;  %2024 = vrot.lane.b32.xlu1 %v4369_v2, %s3807_s14 }
 0x930   : > { %v1613_v22 = vpack.c.bf16 %v1477_v25, %v1476_v61  ;;  %3318 = vmatprep.mubr.msk.bf16.mxu1 %vm3806_vm0, %v3805_v0 }
 0x932   : > { %3315 = vmatpush3.bf16.msra.mxu1 %v1613_v22 }
 0x933   : > { %3316 = vmatprep.subr.bf16.mxu1 %v3805_v0 }
 0x936   : > { %3317 = vmatpush3.bf16.msra.mxu1 %v1700_v29 }
 0x937   : > { %3456 = vmatprep.subr.bf16.mxu1 %v3805_v0 }
 0x939   : > { %3319 = vmatmul.mubr.msk.bf16.vlgmr.msra.gmra.mrb[16].mxu1 %vm1173_vm1, %v4153_v12 }
 0x93a   : > { %3322 = vmatprep.mubr.msk.bf16.mxu1 %vm3806_vm0, %v3805_v0 }
 0x941   : > { %3323 = vmatmul.mubr.msk.bf16.gmra.mrb[20].mxu1 %vm1173_vm1, %v4353_v13 }
 0x942   : > { %3326 = vmatprep.mubr.msk.bf16.mxu1 %vm3806_vm0, %v3805_v0 }
 0x949   : > { %3327 = vmatmul.mubr.msk.bf16.gmra.mrb[24].mxu1 %vm1173_vm1, %v1606_v63  ;;  %vm2375_vm1 = vcmp.eq.s32.totalorder %v4314_v4, 35 }
 0x94a   : > { %3340 = vmatprep.mubr.msk.bf16.mxu1 %vm3806_vm0, %v3805_v0 }
 0x9a1   : > { %v2025_v9 = vpop.permute.xlu1 %2024 }
 0xa0c   : > { %v1736_v57 = vpop.f32.mrb[16].mxu1 }
 0xa0d   : > { %v3320_v30 = vpop.f32.mrb[17].mxu1 }
 0xa0e   : > { %v1739_v31 = vpop.f32.mrb[18].mxu1 }
 0xa0f   : > { %v1758_v32 = vpack.c.bf16 %v1739_v31, %v1736_v57  ;;  %v3321_v33 = vpop.f32.mrb[19].mxu1 }
 0xa11   : > { %3331 = vmatpush3.bf16.msra.mxu0 %v1758_v32  ;;  %3459 = vmatpush3.bf16.msra.mxu1 %v1758_v32 }
 0xa12   : > { %3332 = vmatprep.subr.bf16.mxu0 %v3805_v0  ;;  %3457 = vmatprep.subr.bf16.mxu1 %v3805_v0 }
 0xa14   : > { %v1744_v38 = vpop.f32.mrb[20].mxu1 }
 0xa15   : > { %v3324_v24 = vpop.f32.mrb[21].mxu1 }
 0xa16   : > { %v1747_v18 = vpop.f32.mrb[22].mxu1 }
 0xa17   : > { %v1759_v40 = vpack.c.bf16 %v1747_v18, %v1744_v38  ;;  %v3325_v41 = vpop.f32.mrb[23].mxu1 }
 0xa19   : > { %3333 = vmatpush3.bf16.msra.mxu0 %v1759_v40  ;;  %3460 = vmatpush3.bf16.msra.mxu1 %v1759_v40 }
 0xa1a   : > { %3334 = vmatprep.subr.bf16.mxu0 %v3805_v0  ;;  %3458 = vmatprep.subr.bf16.mxu1 %v3805_v0 }
 0xa1c   : > { %v1752_v52 = vpop.f32.mrb[24].mxu1 }
 0xa1d   : > { %v1760_v28 = vpack.c.bf16 %v1752_v52, %v1752_v52  ;;  %v3328_v42 = vpop.f32.mrb[25].mxu1 }
 0xa1e   : > { %v1755_v26 = vpop.f32.mrb[26].mxu1 }
 0xa1f   : > { %v1794_v51 = vsel %vm1792_vm12, %v1760_v28, 0  ;;  %v3329_v54 = vpop.f32.mrb[27].mxu1 }
 0xa20   : > { %3335 = vmatpush3.bf16.msra.mxu0 %v1794_v51  ;;  %3461 = vmatpush3.bf16.msra.mxu1 %v1794_v51 }
 0xa21   : > { %3348 = vmatprep.subr.bf16.mxu0 %v3805_v0  ;;  %3364 = vmatprep.subr.bf16.mxu1 %v3805_v0 }
 0xa23   : > { %3337 = vmatmul.mubr.msk.bf16.vlgmr.msra.gmra.mrb[16].mxu0 %vm1783_vm13, %v4048_v62  ;;  %3341 = vmatmul.mubr.msk.bf16.vlgmr.msra.gmra.mrb[28].mxu1 %vm1783_vm13, %v1781_v50  ;;  %v3566_v62 = vld [vmem:[%s4869_s6 + $0x28] sm:$0xff]  }
 0xa24   : > { %3349 = vmatpush3.bf16.msra.mxu0 %v3563_v55  ;;  %3352 = vmatprep.mubr.msk.bf16.mxu0 %vm3806_vm0, %v3805_v0 }
 0xa25   : > { %3350 = vmatprep.subr.bf16.mxu0 %v3805_v0  ;;  %3344 = vmatprep.mubr.msk.bf16.mxu1 %vm3806_vm0, %v3805_v0 }
 0xa26   : > { %3365 = vmatpush3.bf16.msra.mxu1 %v3565_v35 }
 0xa27   : > { %3366 = vmatprep.subr.bf16.mxu1 %v3805_v0 }
 0xa28   : > { %3351 = vmatpush3.bf16.msra.mxu0 %v3564_v56 }
 0xa29   : > { %3380 = vmatprep.subr.bf16.mxu0 %v3805_v0 }
 0xa2a   : > { %3367 = vmatpush3.bf16.msra.mxu1 %v3566_v62 }
 0xa2b   : > { %3353 = vmatmul.mubr.msk.bf16.vlgmr.msra.gmra.mrb[20].mxu0 %vm609_vm3, %v1758_v32  ;;  %3345 = vmatmul.mubr.msk.bf16.gmra.mrb[32].mxu1 %vm1783_vm13, %v1782_v37 }
 0xa2c   : > { %3356 = vmatprep.mubr.msk.bf16.mxu0 %vm3806_vm0, %v3805_v0  ;;  %3368 = vmatprep.mubr.msk.bf16.mxu1 %vm3806_vm0, %v3805_v0 }
 0xa2d   : > { %3432 = vmatprep.subr.bf16.mxu1 %v3805_v0 }
 0xa33   : > { %3357 = vmatmul.mubr.msk.bf16.gmra.mrb[24].mxu0 %vm609_vm3, %v1759_v40 }
 0xa34   : > { %3360 = vmatprep.mubr.msk.bf16.mxu0 %vm3806_vm0, %v3805_v0 }
 0xa3b   : > { %3361 = vmatmul.mubr.msk.bf16.gmra.mrb[28].mxu0 %vm609_vm3, %v1760_v28 }
 0xa3c   : > { %3386 = vmatprep.mubr.msk.bf16.mxu0 %vm3806_vm0, %v3805_v0 }
 0xaf6   : > { %v1830_v58 = vpop.f32.mrb[16].mxu0  ;;  %v1838_v43 = vpop.f32.mrb[28].mxu1 }
 0xaf7   : > { %v3338_v59 = vpop.f32.mrb[17].mxu0  ;;  %v3342_v20 = vpop.f32.mrb[29].mxu1 }
 0xaf8   : > { %v1833_v34 = vpop.f32.mrb[18].mxu0  ;;  %v1841_v60 = vpop.f32.mrb[30].mxu1 }
 0xaf9   : > { %v1852_v3 = vpack.c.bf16 %v1833_v34, %v1830_v58  ;;  %v3339_v5 = vpop.f32.mrb[19].mxu0  ;;  %v1853_v6 = vpack.c.bf16 %v1841_v60, %v1838_v43  ;;  %v3343_v8 = vpop.f32.mrb[31].mxu1 }
 0xafb   : > { %3369 = vmatmul.mubr.msk.bf16.vlgmr.msra.gmra.mrb[36].mxu1 %vm609_vm3, %v1852_v3 }
 0xafc   : > { %3372 = vmatprep.mubr.msk.bf16.mxu1 %vm3806_vm0, %v3805_v0 }
 0xafe   : > { %v4425_v47 = vpop.f32.mrb[20].mxu0  ;;  %v1846_v14 = vpop.f32.mrb[32].mxu1 }
 0xaff   : > { %v4428_v21 = vadd.f32 %v2025_v9, %v4425_v47  ;;  %v3354_v1 = vpop.f32.mrb[21].mxu0  ;;  %v3346_v53 = vpop.f32.mrb[33].mxu1  ;;  %v1854_v57 = vpack.c.bf16 %v1846_v14, %v1846_v14 }
 0xb00   : > { %v4430_v15 = vpop.f32.mrb[22].mxu0  ;;  %v1849_v16 = vpop.f32.mrb[34].mxu1 }
 0xb01   : > { %v2185_v17 = vsub.f32 0.0, %v4428_v21  ;;  %v2028_v19 = vadd.f32 %v2025_v9, %v4430_v15  ;;  %v3355_v23 = vpop.f32.mrb[23].mxu0  ;;  %v3347_v61 = vpop.f32.mrb[35].mxu1 }
 0xb03   : > { %v2190_v25 = vmul.f32 1.442695, %v2185_v17  ;;  %v2186_v22 = vsub.f32 0.0, %v2028_v19  ;;  %3373 = vmatmul.mubr.msk.bf16.gmra.mrb[40].mxu1 %vm609_vm3, %v1853_v6 }
 0xb04   : > { %3376 = vmatprep.mubr.msk.bf16.mxu1 %vm3806_vm0, %v3805_v0 }
 0xb05   : > { %3633 = vpow2.f32 %v2190_v25  ;;  %v2192_v27 = vmul.f32 1.442695, %v2186_v22  ;;  %v4493_v22 = vld [vmem:[%s4871_s8 + $0x2] ss:$0 sm:$0xff] }
 0xb06   : > { %v4437_v29 = vpop.f32.mrb[24].mxu0 }
 0xb07   : > { %3635 = vpow2.f32 %v2192_v27  ;;  %v2029_v10 = vadd.f32 %v2025_v9, %v4437_v29  ;;  %v3358_v63 = vpop.f32.mrb[25].mxu0  ;;  %v4500_v27 = vld [vmem:[%s4872_s9 + $0x2] ss:$0 sm:$0xff] }
 0xb08   : > { %v4440_v30 = vpop.f32.mrb[26].mxu0 }
 0xb09   : > { %v2187_v31 = vsub.f32 0.0, %v2029_v10  ;;  %v2030_v32 = vadd.f32 %v2025_v9, %v4440_v30  ;;  %v3359_v33 = vpop.f32.mrb[27].mxu0 }
 0xb0b   : > { %v2194_v38 = vmul.f32 1.442695, %v2187_v31  ;;  %v2188_v24 = vsub.f32 0.0, %v2030_v32  ;;  %3377 = vmatmul.mubr.msk.bf16.gmra.mrb[44].mxu1 %vm609_vm3, %v1854_v57 }
 0xb0c   : > { %3436 = vmatprep.mubr.msk.bf16.mxu1 %vm3806_vm0, %v3805_v0 }
 0xb0d   : > { %3637 = vpow2.f32 %v2194_v38  ;;  %v2196_v18 = vmul.f32 1.442695, %v2188_v24 }
 0xb0e   : > { %v4446_v40 = vpop.f32.mrb[28].mxu0 }
 0xb0f   : > { %v3634_v41 = vpop.eup %3633  ;;  %3639 = vpow2.f32 %v2196_v18  ;;  %v2031_v45 = vadd.f32 %v2025_v9, %v4446_v40  ;;  %v3362_v52 = vpop.f32.mrb[29].mxu0 }
 0xb10   : > { %v2200_v28 = vadd.f32 1.0, %v3634_v41  ;;  %v1928_v42 = vpop.f32.mrb[30].mxu0 }
 0xb11   : > { %v3636_v26 = vpop.eup %3635  ;;  %v2189_v50 = vsub.f32 0.0, %v2031_v45  ;;  %v3363_v51 = vpop.f32.mrb[31].mxu0 }
 0xb12   : > { %3641 = vrcp.f32 %v2200_v28  ;;  %v2201_v54 = vadd.f32 1.0, %v3636_v26 }
 0xb13   : > { %v2198_v55 = vmul.f32 1.442695, %v2189_v50 }
 0xb15   : > { %3643 = vpow2.f32 %v2198_v55 }
 0xb16   : > { %3645 = vrcp.f32 %v2201_v54 }
 0xb17   : > { %v3638_v35 = vpop.eup %3637 }
 0xb18   : > { %v2202_v56 = vadd.f32 1.0, %v3638_v35 }
 0xb19   : > { %v3640_v49 = vpop.eup %3639 }
 0xb1a   : > { %3647 = vrcp.f32 %v2202_v56  ;;  %v2203_v37 = vadd.f32 1.0, %v3640_v49 }
 0xb1c   : > { %v3642_v62 = vpop.eup %3641  ;;  %3649 = vrcp.f32 %v2203_v37 }
 0xb1d   : > { %2215 = vrot.lane.b32.xlu1 %v3642_v62, %s3809_s27 }
 0xb1f   : > { %v3644_v58 = vpop.eup %3643 }
 0xb20   : > { %v3646_v43 = vpop.eup %3645  ;;  %v2204_v59 = vadd.f32 1.0, %v3644_v58 }
 0xb21   : > { %2217 = vrot.lane.b32.xlu1 %v3646_v43, %s3809_s27 }
 0xb22   : > { %3651 = vrcp.f32 %v2204_v59 }
 0xb24   : > { %v3648_v20 = vpop.eup %3647 }
 0xb25   : > { %2219 = vrot.lane.b32.xlu0 %v3648_v20, %s3809_s27 }
 0xb26   : > { %v3650_v34 = vpop.eup %3649 }
 0xb27   : > { %2221 = vrot.lane.b32.xlu1 %v3650_v34, %s3809_s27 }
 0xb2c   : > { %v3652_v60 = vpop.eup %3651 }
 0xb2d   : > { %2223 = vrot.lane.b32.xlu0 %v3652_v60, %s3809_s27 }
 0xb8f   : > { %v2216_v3 = vpop.permute.xlu1 %2215 }
 0xb90   : > { %v4455_v5 = vmul.f32 %v2216_v3, %v4428_v21 }
 0xb92   : > { %2240 = vrot.lane.b32.xlu1 %v4455_v5, %s3807_s14  ;;  %v2275_v9 = vmul.f32 %v4455_v5, %v4455_v5 }
 0xb93   : > { %v2218_v6 = vpop.permute.xlu1 %2217 }
 0xb94   : > { %v4459_v8 = vmul.f32 %v2218_v6, %v2028_v19 }
 0xb96   : > { %2285 = vrot.lane.b32.xlu1 %v2275_v9, %s3807_s14  ;;  %2242 = vrot.lane.b32.xlu0 %v4459_v8, %s3807_s14  ;;  %v2276_v21 = vmul.f32 %v4459_v8, %v4459_v8 }
 0xb97   : > { %v2220_v14 = vpop.permute.xlu0 %2219 }
 0xb98   : > { %v4466_v1 = vmul.f32 %v2220_v14, %v2029_v10 }
 0xb99   : > { %v2222_v53 = vpop.permute.xlu1 %2221 }
 0xb9a   : > { %2244 = vrot.lane.b32.xlu1 %v4466_v1, %s3807_s14  ;;  %2287 = vrot.lane.b32.xlu0 %v2276_v21, %s3807_s14  ;;  %v4473_v16 = vmul.f32 %v2222_v53, %v2030_v32  ;;  %v2277_v23 = vmul.f32 %v4466_v1, %v4466_v1 }
 0xb9c   : > { %v2278_v25 = vmul.f32 %v4473_v16, %v4473_v16 }
 0xb9e   : > { %2246 = vrot.lane.b32.xlu0 %v4473_v16, %s3807_s14 }
 0xb9f   : > { %v2224_v17 = vpop.permute.xlu0 %2223 }
 0xba0   : > { %v4477_v19 = vmul.f32 %v2224_v17, %v2031_v45 }
 0xba2   : > { %2248 = vrot.lane.b32.xlu1 %v4477_v19, %s3807_s14  ;;  %2289 = vrot.lane.b32.xlu0 %v2277_v23, %s3807_s14  ;;  %v2279_v61 = vmul.f32 %v4477_v19, %v4477_v19 }
 0xba6   : > { %2293 = vrot.lane.b32.xlu0 %v2279_v61, %s3807_s14  ;;  %2291 = vrot.lane.b32.xlu1 %v2278_v25, %s3807_s14 }
 0xbaa   : > { %2355 = vrot.lane.b32.xlu1 %v4493_v22, %s3807_s14 }
 0xbae   : > { %2363 = vrot.lane.b32.xlu1 %v4500_v27, %s3807_s14 }
 0xbce   : > { %v1986_v10 = vpop.f32.mrb[36].mxu1 }
 0xbcf   : > { %v2008_v63 = vadd.f32 %v1986_v10, %v4425_v47  ;;  %v3370_v57 = vpop.f32.mrb[37].mxu1 }
 0xbd0   : > { %v1989_v31 = vpop.f32.mrb[38].mxu1 }
 0xbd1   : > { %v4506_v32 = vadd.f32 %v4369_v2, %v2008_v63  ;;  %v2009_v33 = vadd.f32 %v1989_v31, %v4430_v15  ;;  %v3371_v38 = vpop.f32.mrb[39].mxu1 }
 0xbd3   : > { %v2032_v24 = vsub.f32 0.0, %v4506_v32  ;;  %v4511_v18 = vadd.f32 %v4369_v2, %v2009_v33 }
 0xbd5   : > { %v2037_v41 = vmul.f32 1.442695, %v2032_v24  ;;  %v2033_v45 = vsub.f32 0.0, %v4511_v18 }
 0xbd6   : > { %v1994_v52 = vpop.f32.mrb[40].mxu1 }
 0xbd7   : > { %3653 = vpow2.f32 %v2037_v41  ;;  %v2039_v28 = vmul.f32 1.442695, %v2033_v45  ;;  %v2010_v47 = vadd.f32 %v1994_v52, %v4437_v29  ;;  %v3374_v42 = vpop.f32.mrb[41].mxu1 }
 0xbd8   : > { %v1997_v26 = vpop.f32.mrb[42].mxu1 }
 0xbd9   : > { %3655 = vpow2.f32 %v2039_v28  ;;  %v4516_v50 = vadd.f32 %v4369_v2, %v2010_v47  ;;  %v2011_v15 = vadd.f32 %v1997_v26, %v4440_v30  ;;  %v3375_v51 = vpop.f32.mrb[43].mxu1 }
 0xbdb   : > { %v2034_v54 = vsub.f32 0.0, %v4516_v50  ;;  %v4529_v17 = vadd.f32 %v4369_v2, %v2011_v15 }
 0xbdd   : > { %v2041_v55 = vmul.f32 1.442695, %v2034_v54  ;;  %v2035_v63 = vsub.f32 0.0, %v4529_v17 }
 0xbde   : > { %v2002_v35 = vpop.f32.mrb[44].mxu1 }
 0xbdf   : > { %3657 = vpow2.f32 %v2041_v55  ;;  %v2012_v56 = vadd.f32 %v2002_v35, %v4446_v40  ;;  %v3378_v49 = vpop.f32.mrb[45].mxu1  ;;  %v2043_v38 = vmul.f32 1.442695, %v2035_v63 }
 0xbe0   : > { %v2005_v37 = vpop.f32.mrb[46].mxu1 }
 0xbe1   : > { %v3654_v62 = vpop.eup %3653  ;;  %v3379_v29 = vpop.f32.mrb[47].mxu1  ;;  %v4526_v53 = vadd.f32 %v4369_v2, %v2012_v56 }
 0xbe2   : > { %v2047_v58 = vadd.f32 1.0, %v3654_v62 }
 0xbe3   : > { %v3656_v43 = vpop.eup %3655  ;;  %v2036_v61 = vsub.f32 0.0, %v4526_v53 }
 0xbe4   : > { %3659 = vrcp.f32 %v2047_v58  ;;  %v2048_v59 = vadd.f32 1.0, %v3656_v43 }
 0xbe5   : > { %v2045_v31 = vmul.f32 1.442695, %v2036_v61 }
 0xbe6   : > { %3661 = vrcp.f32 %v2048_v59 }
 0xbe9   : > { %v3658_v20 = vpop.eup %3657 }
 0xbea   : > { %v2049_v34 = vadd.f32 1.0, %v3658_v20 }
 0xbec   : > { %3663 = vrcp.f32 %v2049_v34 }
 0xbed   : > { %3665 = vpow2.f32 %v2045_v31 }
 0xbee   : > { %v3660_v30 = vpop.eup %3659  ;;  %3667 = vpow2.f32 %v2043_v38 }
 0xbef   : > { %2062 = vrot.lane.b32.xlu1 %v3660_v30, %s3809_s27 }
 0xbf0   : > { %v3662_v60 = vpop.eup %3661 }
 0xbf1   : > { %2064 = vrot.lane.b32.xlu0 %v3662_v60, %s3809_s27 }
 0xbf6   : > { %v3664_v3 = vpop.eup %3663 }
 0xbf7   : > { %2066 = vrot.lane.b32.xlu1 %v3664_v3, %s3809_s27  ;;  %v3666_v15 = vpop.eup %3665 }
 0xbf8   : > { %v3668_v54 = vpop.eup %3667  ;;  %v2051_v55 = vadd.f32 1.0, %v3666_v15 }
 0xbf9   : > { %v2050_v35 = vadd.f32 1.0, %v3668_v54 }
 0xbfa   : > { %3669 = vrcp.f32 %v2051_v55 }
 0xbfb   : > { %3671 = vrcp.f32 %v2050_v35 }
 0xc04   : > { %v2241_v6 = vpop.permute.xlu1 %2240  ;;  %v3670_v56 = vpop.eup %3669 }
 0xc05   : > { %v2255_v41 = vsel %vm609_vm3, %v2241_v6, 0.0  ;;  %v3672_v49 = vpop.eup %3671 }
 0xc08   : > { %v2243_v40 = vpop.permute.xlu0 %2242  ;;  %v2286_v14 = vpop.permute.xlu1 %2285 }
 0xc09   : > { %v2258_v21 = vsel %vm609_vm3, %v2243_v40, 0.0  ;;  %v2300_v23 = vsel %vm609_vm3, %v2286_v14, 0.0 }
 0xc0c   : > { %v2288_v9 = vpop.permute.xlu0 %2287  ;;  %v2245_v10 = vpop.permute.xlu1 %2244 }
 0xc0d   : > { %v2303_v57 = vsel %vm609_vm3, %v2288_v9, 0.0  ;;  %v2261_v45 = vsel %vm609_vm3, %v2245_v10, 0.0 }
 0xc10   : > { %2259 = vadd.xlane.f32.xlu0 %v2258_v21  ;;  %v2247_v25 = vpop.permute.xlu0 %2246 }
 0xc11   : > { %v2264_v2 = vsel %vm609_vm3, %v2247_v25, 0.0 }
 0xc14   : > { %2301 = vadd.xlane.f32.xlu0 %v2300_v23  ;;  %v2249_v33 = vpop.permute.xlu1 %2248  ;;  %v2290_v24 = vpop.permute.xlu0 %2289 }
 0xc15   : > { %v2306_v28 = vsel %vm609_vm3, %v2290_v24, 0.0  ;;  %v2267_v51 = vsel %vm2094_vm15, %v2249_v33, 0.0 }
 0xc18   : > { %2304 = vadd.xlane.f32.xlu0 %v2303_v57  ;;  %v2292_v52 = vpop.permute.xlu1 %2291  ;;  %v2294_v47 = vpop.permute.xlu0 %2293 }
 0xc19   : > { %v2309_v42 = vsel %vm609_vm3, %v2292_v52, 0.0  ;;  %v2312_v26 = vsel %vm2094_vm15, %v2294_v47, 0.0 }
 0xc1b   : > { %2256 = vadd.xlane.f32.xlu1 %v2255_v41 }
 0xc1c   : > { %2265 = vadd.xlane.f32.xlu0 %v2264_v2  ;;  %v4544_v37 = vpop.permute.xlu1 %2355 }
 0xc1f   : > { %2262 = vadd.xlane.f32.xlu1 %v2261_v45 }
 0xc20   : > { %2307 = vadd.xlane.f32.xlu0 %v2306_v28  ;;  %v4546_v62 = vpop.permute.xlu1 %2363 }
 0xc23   : > { %2310 = vadd.xlane.f32.xlu1 %v2309_v42 }
 0xc24   : > { %2313 = vadd.xlane.f32.xlu0 %v2312_v26 }
 0xc27   : > { %2268 = vadd.xlane.f32.xlu1 %v2267_v51 }
 0xc38   : > { %2070 = vrot.lane.b32.xlu1 %v3670_v56, %s3809_s27 }
 0xc3a   : > { %2068 = vrot.lane.b32.xlu0 %v3672_v49, %s3809_s27 }
 0xc61   : > { %v2063_v29 = vpop.permute.xlu1 %2062 }
 0xc62   : > { %v4549_v58 = vmul.f32 %v2063_v29, %v4506_v32 }
 0xc63   : > { %v2065_v43 = vpop.permute.xlu0 %2064 }
 0xc64   : > { %v4552_v59 = vmul.f32 %v2065_v43, %v4511_v18  ;;  %v2082_v20 = vsel %vm609_vm3, %v4549_v58, 0.0  ;;  %v2103_v34 = vmul.f32 %v4549_v58, %v4549_v58 }
 0xc65   : > { %2083 = vadd.xlane.f32.xlu0 %v2082_v20 }
 0xc66   : > { %v2085_v30 = vsel %vm609_vm3, %v4552_v59, 0.0  ;;  %v2108_v60 = vsel %vm609_vm3, %v2103_v34, 0.0  ;;  %v2104_v32 = vmul.f32 %v4552_v59, %v4552_v59 }
 0xc67   : > { %2086 = vadd.xlane.f32.xlu1 %v2085_v30 }
 0xc68   : > { %v2111_v40 = vsel %vm609_vm3, %v2104_v32, 0.0 }
 0xc69   : > { %2109 = vadd.xlane.f32.xlu0 %v2108_v60  ;;  %v2067_v3 = vpop.permute.xlu1 %2066 }
 0xc6a   : > { %v4564_v18 = vmul.f32 %v2067_v3, %v4516_v50 }
 0xc6c   : > { %v2088_v6 = vsel %vm609_vm3, %v4564_v18, 0.0 }
 0xc6d   : > { %2112 = vadd.xlane.f32.xlu0 %v2111_v40  ;;  %2089 = vadd.xlane.f32.xlu1 %v2088_v6 }
 0xc9d   : > { %v2260_v9 = vpop.xlane.xlu0 %2259 }
 0xc9e   : > { %v2271_v21 = vmul.f32 0.03125, %v2260_v9 }
 0xca0   : > { %v2321_v61 = vmul.f32 %v2271_v21, %v2271_v21  ;;  %v2336_v9 = vsub.f32 %v4459_v8, %v2271_v21 }
 0xca1   : > { %v2302_v14 = vpop.xlane.xlu0 %2301 }
 0xca2   : > { %v2315_v50 = vmul.f32 0.03125, %v2302_v14 }
 0xca5   : > { %v2305_v23 = vpop.xlane.xlu0 %2304 }
 0xca6   : > { %v2316_v25 = vmul.f32 0.03125, %v2305_v23  ;;  %v2105_v23 = vmul.f32 %v4564_v18, %v4564_v18 }
 0xca8   : > { %v2326_v10 = vsub.f32 %v2316_v25, %v2321_v61  ;;  %v2257_v63 = vpop.xlane.xlu1 %2256 }
 0xca9   : > { %v2270_v57 = vmul.f32 0.03125, %v2257_v63  ;;  %v2266_v31 = vpop.xlane.xlu0 %2265 }
 0xcaa   : > { %v2331_v33 = vmax.f32 %v2326_v10, 0.0  ;;  %v2273_v45 = vmul.f32 0.03125, %v2266_v31  ;;  %v2114_v31 = vsel %vm609_vm3, %v2105_v23, 0.0 }
 0xcab   : > { %v2320_v38 = vmul.f32 %v2270_v57, %v2270_v57 }
 0xcac   : > { %v2341_v24 = vadd.f32 1e-05, %v2331_v33  ;;  %v2263_v41 = vpop.xlane.xlu1 %2262  ;;  %v2323_v54 = vmul.f32 %v2273_v45, %v2273_v45 }
 0xcad   : > { %v2325_v2 = vsub.f32 %v2315_v50, %v2320_v38  ;;  %v4569_v52 = vmul.f32 0.03125, %v2263_v41  ;;  %v2308_v28 = vpop.xlane.xlu0 %2307 }
 0xcae   : > { %3673 = vrsqrt.f32 %v2341_v24  ;;  %v2317_v47 = vmul.f32 0.03125, %v2308_v28 }
 0xcaf   : > { %v2330_v42 = vmax.f32 %v2325_v2, 0.0  ;;  %v2322_v26 = vmul.f32 %v4569_v52, %v4569_v52 }
 0xcb0   : > { %v2311_v15 = vpop.xlane.xlu1 %2310 }
 0xcb1   : > { %v2340_v51 = vadd.f32 1e-05, %v2330_v42  ;;  %v2327_v55 = vsub.f32 %v2317_v47, %v2322_v26  ;;  %v2318_v35 = vmul.f32 0.03125, %v2311_v15  ;;  %v2314_v56 = vpop.xlane.xlu0 %2313  ;;  %v2338_v15 = vsub.f32 %v4473_v16, %v2273_v45 }
 0xcb2   : > { %v2319_v3 = vmul.f32 0.03125, %v2314_v56 }
 0xcb3   : > { %3675 = vrsqrt.f32 %v2340_v51  ;;  %v2328_v49 = vsub.f32 %v2318_v35, %v2323_v54  ;;  %v2332_v43 = vmax.f32 %v2327_v55, 0.0 }
 0xcb4   : > { %v2269_v29 = vpop.xlane.xlu1 %2268 }
 0xcb5   : > { %v2333_v20 = vmax.f32 %v2328_v49, 0.0  ;;  %v2274_v34 = vmul.f32 0.03125, %v2269_v29  ;;  %v2069_v30 = vpop.permute.xlu0 %2068  ;;  %v2342_v61 = vadd.f32 1e-05, %v2332_v43 }
 0xcb6   : > { %v4574_v60 = vmul.f32 %v2069_v30, %v4529_v17  ;;  %v2335_v17 = vsub.f32 %v4455_v5, %v2270_v57 }
 0xcb7   : > { %v2343_v32 = vadd.f32 1e-05, %v2333_v20  ;;  %v2324_v40 = vmul.f32 %v2274_v34, %v2274_v34  ;;  %v2339_v54 = vsub.f32 %v4477_v19, %v2274_v34 }
 0xcb8   : > { %v3674_v6 = vpop.eup %3673  ;;  %v2091_v14 = vsel %vm609_vm3, %v4574_v60, 0.0  ;;  %v2106_v33 = vmul.f32 %v4574_v60, %v4574_v60  ;;  %v2071_v50 = vpop.permute.xlu1 %2070 }
 0xcb9   : > { %v2329_v25 = vsub.f32 %v2319_v3, %v2324_v40  ;;  %2092 = vadd.xlane.f32.xlu1 %v2091_v14  ;;  %v2351_v10 = vmul.f32 %v3674_v6, %v2336_v9  ;;  %3677 = vrsqrt.f32 %v2343_v32  ;;  %v4588_v2 = vmul.f32 %v2071_v50, %v4526_v53 }
 0xcba   : > { %3679 = vrsqrt.f32 %v2342_v61  ;;  %v2117_v5 = vsel %vm609_vm3, %v2106_v33, 0.0  ;;  %v2337_v53 = vsub.f32 %v4466_v1, %v4569_v52 }
 0xcbb   : > { %v2334_v63 = vmax.f32 %v2329_v25, 0.0  ;;  %v2359_v24 = vmul.f32 %v4544_v37, %v2351_v10  ;;  %v2095_v47 = vsel %vm2094_vm15, %v4588_v2, 0.0  ;;  %v2107_v34 = vmul.f32 %v4588_v2, %v4588_v2 }
 0xcbd   : > { %v3676_v8 = vpop.eup %3675  ;;  %v2344_v21 = vadd.f32 1e-05, %v2334_v63  ;;  %2115 = vadd.xlane.f32.xlu1 %v2114_v31  ;;  %v2367_v28 = vadd.f32 %v4546_v62, %v2359_v24 }
 0xcbe   : > { %v2350_v38 = vmul.f32 %v3676_v8, %v2335_v17 }
 0xcbf   : > { %3681 = vrsqrt.f32 %v2344_v21 }
 0xcc0   : > { %v2358_v41 = vmul.f32 %v4544_v37, %v2350_v38 }
 0xcc1   : > { %2118 = vadd.xlane.f32.xlu1 %v2117_v5 }
 0xcc2   : > { %v2366_v57 = vadd.f32 %v4546_v62, %v2358_v41 }
 0xcc3   : > { %v3678_v26 = vpop.eup %3677 }
 0xcc4   : > { %v2410_v42 = vpack.c.bf16 %v2367_v28, %v2366_v57  ;;  %v3680_v51 = vpop.eup %3679  ;;  %v2353_v55 = vmul.f32 %v3678_v26, %v2338_v15 }
 0xcc5   : > { %2096 = vadd.xlane.f32.xlu1 %v2095_v47  ;;  %v2352_v49 = vmul.f32 %v3680_v51, %v2337_v53 }
 0xcc6   : > { %2416 = vrot.lane.b32.xlu0 %v2410_v42, %s3807_s14  ;;  %v2361_v29 = vmul.f32 %v4544_v37, %v2353_v55 }
 0xcc7   : > { %v2360_v20 = vmul.f32 %v4544_v37, %v2352_v49 }
 0xcc8   : > { %v2369_v16 = vadd.f32 %v4546_v62, %v2361_v29 }
 0xcc9   : > { %v3682_v35 = vpop.eup %3681  ;;  %v2368_v30 = vadd.f32 %v4546_v62, %v2360_v20 }
 0xcca   : > { %v2354_v56 = vmul.f32 %v3682_v35, %v2339_v54 }
 0xccb   : > { %v2411_v1 = vpack.c.bf16 %v2369_v16, %v2368_v30 }
 0xccc   : > { %v2362_v43 = vmul.f32 %v4544_v37, %v2354_v56  ;;  %v2120_v37 = vsel %vm2094_vm15, %v2107_v34, 0.0 }
 0xcce   : > { %v2370_v45 = vadd.f32 %v4546_v62, %v2362_v43 }
 0xcd0   : > { %v2380_v19 = vsel %vm2375_vm1, 0.0, %v2370_v45 }
 0xcd1   : > { %v2412_v52 = vpack.c.bf16 %v2380_v19, %v2380_v19 }
 0xcd6   : > { %2418 = vrot.lane.b32.xlu1 %v2411_v1, %s3807_s14 }
 0xcda   : > { %2420 = vrot.lane.b32.xlu1 %v2412_v52, %s3807_s14 }
 0xce5   : > { %2121 = vadd.xlane.f32.xlu0 %v2120_v37 }
 0xcf2   : > { %v2084_v32 = vpop.xlane.xlu0 %2083 }
 0xcf3   : > { %v2098_v9 = vmul.f32 0.03125, %v2084_v32 }
 0xcf4   : > { %v2087_v40 = vpop.xlane.xlu1 %2086 }
 0xcf5   : > { %v2099_v62 = vmul.f32 0.03125, %v2087_v40  ;;  %v2128_v25 = vmul.f32 %v2098_v9, %v2098_v9  ;;  %v2143_v56 = vsub.f32 %v4549_v58, %v2098_v9 }
 0xcf6   : > { %v2110_v3 = vpop.xlane.xlu0 %2109 }
 0xcf7   : > { %v2129_v14 = vmul.f32 %v2099_v62, %v2099_v62  ;;  %v2123_v23 = vmul.f32 0.03125, %v2110_v3  ;;  %v2144_v53 = vsub.f32 %v4552_v59, %v2099_v62 }
 0xcf9   : > { %v2133_v63 = vsub.f32 %v2123_v23, %v2128_v25  ;;  %v2383_v25 = vadd.s32 56, %v4019_v39 }
 0xcfa   : > { %v2113_v6 = vpop.xlane.xlu0 %2112  ;;  %v2090_v8 = vpop.xlane.xlu1 %2089 }
 0xcfb   : > { %v2124_v4 = vmul.f32 0.03125, %v2113_v6  ;;  %v2138_v31 = vmax.f32 %v2133_v63, 0.0  ;;  %v2100_v38 = vmul.f32 0.03125, %v2090_v8  ;;  %vm2398_vm5 = vcmp.eq.s32.totalorder %v2383_v25, %v4121_v44 }
 0xcfc   : > { %vm2387_vm9 = vcmp.eq.s32.totalorder %v2383_v25, %v4118_v36 }
 0xcfd   : > { %v2134_v10 = vsub.f32 %v2124_v4, %v2129_v14  ;;  %v2148_v21 = vadd.f32 1e-05, %v2138_v31  ;;  %v2130_v41 = vmul.f32 %v2100_v38, %v2100_v38  ;;  %v2145_v52 = vsub.f32 %v4564_v18, %v2100_v38 }
 0xcfe   : > { %v2381_v18 = vadd.s32 40, %v4019_v39  ;;  %v2384_v31 = vadd.s32 64, %v4019_v39 }
 0xcff   : > { %v2139_v17 = vmax.f32 %v2134_v10, 0.0 }
 0xd00   : > { %vm2396_vm2 = vcmp.eq.s32.totalorder %v2381_v18, %v4121_v44  ;;  %vm2399_vm6 = vcmp.eq.s32.totalorder %v2384_v31, %v4121_v44  ;;  %vm2385_vm7 = vcmp.eq.s32.totalorder %v2381_v18, %v4118_v36  ;;  %vm2388_vm10 = vcmp.eq.s32.totalorder %v2384_v31, %v4118_v36 }
 0xd01   : > { %v2149_v33 = vadd.f32 1e-05, %v2139_v17  ;;  %v2400_v23 = vsel %vm2396_vm2, 1.0, %v3805_v0  ;;  %v2402_v17 = vsel %vm2398_vm5, 1.0, %v3805_v0 }
 0xd02   : > { %v2404_v10 = vpack.c.bf16 %v2400_v23, %v4329_v46 }
 0xd03   : > { %3683 = vrsqrt.f32 %v2149_v33 }
 0xd04   : > { %3685 = vrsqrt.f32 %v2148_v21 }
 0xd0d   : > { %v3684_v42 = vpop.eup %3683 }
 0xd0e   : > { %v3686_v54 = vpop.eup %3685  ;;  %v2159_v29 = vmul.f32 %v3684_v42, %v2144_v53 }
 0xd0f   : > { %v2158_v20 = vmul.f32 %v3686_v54, %v2143_v56 }
 0xd10   : > { %v2170_v30 = vmul.f32 %v4493_v22, %v2159_v29 }
 0xd11   : > { %v2169_v59 = vmul.f32 %v4493_v22, %v2158_v20 }
 0xd12   : > { %v2181_v19 = vadd.f32 %v4500_v27, %v2170_v30 }
 0xd13   : > { %v2180_v34 = vadd.f32 %v4500_v27, %v2169_v59 }
 0xd15   : > { %v2407_v32 = vpack.c.bf16 %v2181_v19, %v2180_v34 }
 0xd38   : > { %v2417_v61 = vpop.permute.xlu0 %2416 }
 0xd39   : > { %3381 = vmatpush3.bf16.msra.mxu0 %v2417_v61  ;;  %v2382_v61 = vadd.s32 48, %v4019_v39 }
 0xd3a   : > { %3382 = vmatprep.subr.bf16.mxu0 %v3805_v0 }
 0xd3b   : > { %vm2397_vm4 = vcmp.eq.s32.totalorder %v2382_v61, %v4121_v44  ;;  %vm2386_vm8 = vcmp.eq.s32.totalorder %v2382_v61, %v4118_v36 }
 0xd3c   : > { %v2401_v63 = vsel %vm2397_vm4, 1.0, %v3805_v0 }
 0xd3d   : > { %v2405_v21 = vpack.c.bf16 %v2402_v17, %v2401_v63 }
 0xd46   : > { %v2093_v50 = vpop.xlane.xlu1 %2092 }
 0xd47   : > { %v2101_v5 = vmul.f32 0.03125, %v2093_v50 }
 0xd49   : > { %v2131_v26 = vmul.f32 %v2101_v5, %v2101_v5  ;;  %v2146_v40 = vsub.f32 %v4574_v60, %v2101_v5 }
 0xd4a   : > { %v2116_v24 = vpop.xlane.xlu1 %2115 }
 0xd4b   : > { %v2125_v57 = vmul.f32 0.03125, %v2116_v24  ;;  %v2403_v24 = vsel %vm2399_vm6, 1.0, %v3805_v0 }
 0xd4c   : > { %v2406_v5 = vpack.c.bf16 %v2403_v24, %v2403_v24 }
 0xd4d   : > { %v2135_v28 = vsub.f32 %v2125_v57, %v2130_v41 }
 0xd4e   : > { %v2119_v47 = vpop.xlane.xlu1 %2118 }
 0xd4f   : > { %v2140_v15 = vmax.f32 %v2135_v28, 0.0  ;;  %v2126_v51 = vmul.f32 0.03125, %v2119_v47 }
 0xd51   : > { %v2150_v55 = vadd.f32 1e-05, %v2140_v15  ;;  %v2136_v35 = vsub.f32 %v2126_v51, %v2131_v26 }
 0xd52   : > { %v2097_v49 = vpop.xlane.xlu1 %2096 }
 0xd53   : > { %3687 = vrsqrt.f32 %v2150_v55  ;;  %v2141_v43 = vmax.f32 %v2136_v35, 0.0 }
 0xd55   : > { %v2151_v16 = vadd.f32 1e-05, %v2141_v43 }
 0xd56   : > { %v2419_v45 = vpop.permute.xlu1 %2418 }
 0xd57   : > { %3689 = vrsqrt.f32 %v2151_v16  ;;  %3383 = vmatpush3.bf16.msra.mxu0 %v2419_v45 }
 0xd58   : > { %3384 = vmatprep.subr.bf16.mxu0 %v3805_v0 }
 0xd5a   : > { %v2421_v1 = vpop.permute.xlu1 %2420 }
 0xd5b   : > { %v2438_v58 = vsel %vm1792_vm12, %v2421_v1, 0 }
 0xd5c   : > { %3385 = vmatpush3.bf16.msra.mxu0 %v2438_v58 }
 0xd5d   : > { %v3688_v37 = vpop.eup %3687  ;;  %3406 = vmatprep.subr.bf16.mxu0 %v3805_v0 }
 0xd5e   : > { %v2160_v3 = vmul.f32 %v3688_v37, %v2145_v52 }
 0xd5f   : > { %3387 = vmatmul.mubr.msk.bf16.vlgmr.msra.gmra.mrb[32].mxu0 %vm1783_vm13, %v4131_v48 }
 0xd60   : > { %3407 = vmatpush3.bf16.msra.mxu0 %v2407_v32  ;;  %3390 = vmatprep.mubr.msk.bf16.mxu0 %vm3806_vm0, %v3805_v0  ;;  %v2171_v9 = vmul.f32 %v4493_v22, %v2160_v3 }
 0xd61   : > { %v3690_v6 = vpop.eup %3689  ;;  %3408 = vmatprep.subr.bf16.mxu0 %v3805_v0 }
 0xd62   : > { %v2161_v62 = vmul.f32 %v3690_v6, %v2146_v40  ;;  %v2182_v48 = vadd.f32 %v4500_v27, %v2171_v9 }
 0xd64   : > { %v2172_v4 = vmul.f32 %v4493_v22, %v2161_v62 }
 0xd66   : > { %v2183_v60 = vadd.f32 %v4500_v27, %v2172_v4 }
 0xd67   : > { %3391 = vmatmul.mubr.msk.bf16.gmra.mrb[36].mxu0 %vm1783_vm13, %v4318_v7  ;;  %v2102_v7 = vmul.f32 0.03125, %v2097_v49 }
 0xd68   : > { %v2408_v14 = vpack.c.bf16 %v2183_v60, %v2182_v48  ;;  %3394 = vmatprep.mubr.msk.bf16.mxu0 %vm3806_vm0, %v3805_v0 }
 0xd69   : > { %v2132_v46 = vmul.f32 %v2102_v7, %v2102_v7  ;;  %v2147_v39 = vsub.f32 %v4588_v2, %v2102_v7 }
 0xd6a   : > { %3409 = vmatpush3.bf16.msra.mxu0 %v2408_v14 }
 0xd6b   : > { %3410 = vmatprep.subr.bf16.mxu0 %v3805_v0 }
 0xd6f   : > { %3395 = vmatmul.mubr.msk.bf16.gmra.mrb[40].mxu0 %vm1783_vm13, %v2404_v10 }
 0xd70   : > { %3398 = vmatprep.mubr.msk.bf16.mxu0 %vm3806_vm0, %v3805_v0 }
 0xd72   : > { %v2122_v33 = vpop.xlane.xlu0 %2121 }
 0xd73   : > { %v2127_v8 = vmul.f32 0.03125, %v2122_v33 }
 0xd75   : > { %v2137_v50 = vsub.f32 %v2127_v8, %v2132_v46 }
 0xd77   : > { %v2142_v38 = vmax.f32 %v2137_v50, 0.0  ;;  %3399 = vmatmul.mubr.msk.bf16.gmra.mrb[44].mxu0 %vm1783_vm13, %v2405_v21 }
 0xd78   : > { %3402 = vmatprep.mubr.msk.bf16.mxu0 %vm3806_vm0, %v3805_v0 }
 0xd79   : > { %v2152_v41 = vadd.f32 1e-05, %v2142_v38 }
 0xd7b   : > { %3691 = vrsqrt.f32 %v2152_v41 }
 0xd7f   : > { %3403 = vmatmul.mubr.msk.bf16.gmra.mrb[48].mxu0 %vm1783_vm13, %v2406_v5 }
 0xd80   : > { %3412 = vmatprep.mubr.msk.bf16.mxu0 %vm3806_vm0, %v3805_v0 }
 0xd85   : > { %v3692_v57 = vpop.eup %3691 }
 0xd86   : > { %v2162_v44 = vmul.f32 %v3692_v57, %v2147_v39 }
 0xd88   : > { %v2173_v28 = vmul.f32 %v4493_v22, %v2162_v44  ;;  %v2389_v22 = vsel %vm2385_vm7, 1.0, %v3805_v0 }
 0xd8a   : > { %v2184_v47 = vadd.f32 %v4500_v27, %v2173_v28  ;;  %v2393_v27 = vpack.c.bf16 %v2389_v22, %v4362_v11  ;;  %v2392_v11 = vsel %vm2388_vm10, 1.0, %v3805_v0 }
 0xd8b   : > { %v2395_v15 = vpack.c.bf16 %v2392_v11, %v2392_v11  ;;  %v3567_v11 = vld [vmem:[#allocation5] sm:$0xff]  }
 0xd8c   : > { %v2409_v42 = vpack.c.bf16 %v2184_v47, %v2184_v47  ;;  %3433 = vmatpush3.bf16.msra.mxu1 %v3567_v11 }
 0xd8d   : > { %3434 = vmatprep.subr.bf16.mxu1 %v3805_v0 }
 0xd8e   : > { %v2526_v26 = vsel %vm1792_vm12, %v2409_v42, 0 }
 0xd8f   : > { %3411 = vmatpush3.bf16.msra.mxu0 %v2526_v26 }
 0xd92   : > { %3413 = vmatmul.mubr.msk.bf16.vlgmr.msra.gmra.mrb[32].mxu0 %vm1783_vm13, %v4153_v12  ;;  %v2390_v12 = vsel %vm2386_vm8, 1.0, %v3805_v0 }
 0xd93   : > { %3416 = vmatprep.mubr.msk.bf16.mxu0 %vm3806_vm0, %v3805_v0 }
 0xd9a   : > { %3417 = vmatmul.mubr.msk.bf16.gmra.mrb[36].mxu0 %vm1783_vm13, %v4353_v13  ;;  %v2391_v13 = vsel %vm2387_vm9, 1.0, %v3805_v0 }
 0xd9b   : > { %3420 = vmatprep.mubr.msk.bf16.mxu0 %vm3806_vm0, %v3805_v0  ;;  %v2394_v2 = vpack.c.bf16 %v2391_v13, %v2390_v12 }
 0xda2   : > { %3421 = vmatmul.mubr.msk.bf16.gmra.mrb[40].mxu0 %vm1783_vm13, %v2393_v27 }
 0xda3   : > { %3424 = vmatprep.mubr.msk.bf16.mxu0 %vm3806_vm0, %v3805_v0 }
 0xdaa   : > { %3425 = vmatmul.mubr.msk.bf16.gmra.mrb[44].mxu0 %vm1783_vm13, %v2394_v2 }
 0xdab   : > { %3428 = vmatprep.mubr.msk.bf16.mxu0 %vm3806_vm0, %v3805_v0 }
 0xdb2   : > { %3429 = vmatmul.mubr.msk.bf16.gmra.mrb[48].mxu0 %vm1783_vm13, %v2395_v15  ;;  %v3568_v15 = vld [vmem:[#allocation5 + $0x8] sm:$0xff]  }
 0xdb3   : > { %3435 = vmatpush3.bf16.msra.mxu1 %v3568_v15 }
 0xe65   : > { %v2562_v51 = vpop.f32.mrb[32].mxu0 }
 0xe66   : > { %v3414_v53 = vpop.f32.mrb[33].mxu0 }
 0xe67   : > { %v2565_v54 = vpop.f32.mrb[34].mxu0 }
 0xe68   : > { %v2600_v55 = vpack.c.bf16 %v2565_v54, %v2562_v51  ;;  %v3415_v35 = vpop.f32.mrb[35].mxu0 }
 0xe6a   : > { %v4688_v56 = vunpack.c.l.bf16 %v2600_v55  ;;  %v4690_v49 = vunpack.c.h.bf16 %v2600_v55 }
 0xe6c   : > { %v2619_v36 = vsel %vm609_vm3, %v4690_v49, 0.0  ;;  %v2616_v29 = vsel %vm609_vm3, %v4688_v56, 0.0  ;;  %v2652_v43 = vmul.f32 %v4688_v56, %v4688_v56  ;;  %v2653_v19 = vmul.f32 %v4690_v49, %v4690_v49 }
 0xe6d   : > { %2620 = vadd.xlane.f32.xlu0 %v2619_v36  ;;  %2617 = vadd.xlane.f32.xlu1 %v2616_v29  ;;  %v2570_v20 = vpop.f32.mrb[36].mxu0 }
 0xe6e   : > { %v3418_v16 = vpop.f32.mrb[37].mxu0  ;;  %v2661_v1 = vsel %vm609_vm3, %v2652_v43, 0.0  ;;  %v2664_v52 = vsel %vm609_vm3, %v2653_v19, 0.0 }
 0xe6f   : > { %v2573_v45 = vpop.f32.mrb[38].mxu0 }
 0xe70   : > { %v2601_v30 = vpack.c.bf16 %v2573_v45, %v2570_v20  ;;  %v3419_v59 = vpop.f32.mrb[39].mxu0 }
 0xe71   : > { %2662 = vadd.xlane.f32.xlu0 %v2661_v1 }
 0xe72   : > { %v4701_v58 = vunpack.c.l.bf16 %v2601_v30  ;;  %v4704_v3 = vunpack.c.h.bf16 %v2601_v30 }
 0xe74   : > { %v2622_v18 = vsel %vm609_vm3, %v4701_v58, 0.0  ;;  %v2625_v9 = vsel %vm609_vm3, %v4704_v3, 0.0  ;;  %v2654_v48 = vmul.f32 %v4701_v58, %v4701_v58  ;;  %v2655_v17 = vmul.f32 %v4704_v3, %v4704_v3 }
 0xe75   : > { %2665 = vadd.xlane.f32.xlu0 %v2664_v52  ;;  %v2578_v34 = vpop.f32.mrb[40].mxu0 }
 0xe76   : > { %v3422_v37 = vpop.f32.mrb[41].mxu0  ;;  %v2667_v7 = vsel %vm609_vm3, %v2654_v48, 0.0  ;;  %v2670_v46 = vsel %vm609_vm3, %v2655_v17, 0.0 }
 0xe77   : > { %v2581_v32 = vpop.f32.mrb[42].mxu0 }
 0xe78   : > { %v2602_v40 = vpack.c.bf16 %v2581_v32, %v2578_v34  ;;  %v3423_v6 = vpop.f32.mrb[43].mxu0 }
 0xe79   : > { %2623 = vadd.xlane.f32.xlu0 %v2622_v18 }
 0xe7a   : > { %v4708_v62 = vunpack.c.l.bf16 %v2602_v40  ;;  %v4724_v33 = vunpack.c.h.bf16 %v2602_v40 }
 0xe7c   : > { %v2628_v4 = vsel %vm609_vm3, %v4708_v62, 0.0  ;;  %v2656_v60 = vmul.f32 %v4708_v62, %v4708_v62  ;;  %v2631_v57 = vsel %vm609_vm3, %v4724_v33, 0.0  ;;  %v2657_v28 = vmul.f32 %v4724_v33, %v4724_v33 }
 0xe7d   : > { %2626 = vadd.xlane.f32.xlu0 %v2625_v9  ;;  %2629 = vadd.xlane.f32.xlu1 %v2628_v4  ;;  %v2586_v14 = vpop.f32.mrb[44].mxu0 }
 0xe7e   : > { %v3426_v23 = vpop.f32.mrb[45].mxu0  ;;  %v2673_v63 = vsel %vm609_vm3, %v2656_v60, 0.0  ;;  %v2676_v42 = vsel %vm609_vm3, %v2657_v28, 0.0 }
 0xe7f   : > { %v2589_v61 = vpop.f32.mrb[46].mxu0 }
 0xe80   : > { %v2603_v25 = vpack.c.bf16 %v2589_v61, %v2586_v14  ;;  %v3427_v10 = vpop.f32.mrb[47].mxu0 }
 0xe81   : > { %2668 = vadd.xlane.f32.xlu0 %v2667_v7  ;;  %2674 = vadd.xlane.f32.xlu1 %v2673_v63  ;;  %v4766_v10 = vld [vmem:[%s4873_s10] ss:$0 sm:$0xff] }
 0xe82   : > { %v4722_v31 = vunpack.c.l.bf16 %v2603_v25  ;;  %v4738_v47 = vunpack.c.h.bf16 %v2603_v25 }
 0xe84   : > { %v2634_v8 = vsel %vm609_vm3, %v4722_v31, 0.0  ;;  %v2658_v21 = vmul.f32 %v4722_v31, %v4722_v31  ;;  %v2637_v22 = vsel %vm609_vm3, %v4738_v47, 0.0  ;;  %v2659_v27 = vmul.f32 %v4738_v47, %v4738_v47 }
 0xe85   : > { %2671 = vadd.xlane.f32.xlu0 %v2670_v46  ;;  %2635 = vadd.xlane.f32.xlu1 %v2634_v8  ;;  %v2594_v50 = vpop.f32.mrb[48].mxu0 }
 0xe86   : > { %v2604_v38 = vpack.c.bf16 %v2594_v50, %v2594_v50  ;;  %v3430_v24 = vpop.f32.mrb[49].mxu0  ;;  %v2679_v44 = vsel %vm609_vm3, %v2658_v21, 0.0  ;;  %v2682_v12 = vsel %vm609_vm3, %v2659_v27, 0.0  ;;  %v4773_v50 = vld [vmem:[%s4874_s11] ss:$0 sm:$0xff] }
 0xe87   : > { %v2597_v41 = vpop.f32.mrb[50].mxu0 }
 0xe88   : > { %v4731_v5 = vunpack.c.l.bf16 %v2604_v38  ;;  %v3431_v39 = vpop.f32.mrb[51].mxu0 }
 0xe89   : > { %2632 = vadd.xlane.f32.xlu0 %v2631_v57  ;;  %2680 = vadd.xlane.f32.xlu1 %v2679_v44 }
 0xe8a   : > { %v2640_v26 = vsel %vm609_vm3, %v4731_v5, 0.0  ;;  %v2660_v13 = vmul.f32 %v4731_v5, %v4731_v5 }
 0xe8c   : > { %v2685_v2 = vsel %vm609_vm3, %v2660_v13, 0.0 }
 0xe8d   : > { %2677 = vadd.xlane.f32.xlu0 %v2676_v42  ;;  %2641 = vadd.xlane.f32.xlu1 %v2640_v26 }
 0xe91   : > { %2638 = vadd.xlane.f32.xlu0 %v2637_v22 }
 0xe95   : > { %2683 = vadd.xlane.f32.xlu0 %v2682_v12 }
 0xe99   : > { %2686 = vadd.xlane.f32.xlu0 %v2685_v2 }
 0xefa   : > { %v2621_v51 = vpop.xlane.xlu0 %2620  ;;  %v2618_v53 = vpop.xlane.xlu1 %2617 }
 0xefb   : > { %v2643_v54 = vmul.f32 0.03125, %v2618_v53  ;;  %v2644_v35 = vmul.f32 0.03125, %v2621_v51 }
 0xefd   : > { %v2697_v36 = vmul.f32 %v2643_v54, %v2643_v54  ;;  %v2698_v16 = vmul.f32 %v2644_v35, %v2644_v35  ;;  %v2724_v61 = vsub.f32 %v4688_v56, %v2643_v54  ;;  %v2725_v39 = vsub.f32 %v4690_v49, %v2644_v35 }
 0xefe   : > { %v2663_v55 = vpop.xlane.xlu0 %2662 }
 0xeff   : > { %v2688_v29 = vmul.f32 0.03125, %v2663_v55 }
 0xf01   : > { %v2706_v43 = vsub.f32 %v2688_v29, %v2697_v36 }
 0xf02   : > { %v2666_v20 = vpop.xlane.xlu0 %2665 }
 0xf03   : > { %v2715_v45 = vmax.f32 %v2706_v43, 0.0  ;;  %v2689_v30 = vmul.f32 0.03125, %v2666_v20 }
 0xf05   : > { %v2733_v59 = vadd.f32 1e-05, %v2715_v45  ;;  %v2707_v1 = vsub.f32 %v2689_v30, %v2698_v16 }
 0xf06   : > { %v2624_v19 = vpop.xlane.xlu0 %2623 }
 0xf07   : > { %3693 = vrsqrt.f32 %v2733_v59  ;;  %v2716_v52 = vmax.f32 %v2707_v1, 0.0  ;;  %v4752_v40 = vmul.f32 0.03125, %v2624_v19 }
 0xf09   : > { %v2734_v34 = vadd.f32 1e-05, %v2716_v52  ;;  %v2699_v48 = vmul.f32 %v4752_v40, %v4752_v40  ;;  %v2726_v19 = vsub.f32 %v4701_v58, %v4752_v40 }
 0xf0a   : > { %v2627_v37 = vpop.xlane.xlu0 %2626  ;;  %v2630_v32 = vpop.xlane.xlu1 %2629 }
 0xf0b   : > { %3695 = vrsqrt.f32 %v2734_v34  ;;  %v4754_v6 = vmul.f32 0.03125, %v2630_v32  ;;  %v4756_v18 = vmul.f32 0.03125, %v2627_v37 }
 0xf0d   : > { %v2701_v60 = vmul.f32 %v4754_v6, %v4754_v6  ;;  %v2700_v46 = vmul.f32 %v4756_v18, %v4756_v18  ;;  %v2728_v34 = vsub.f32 %v4708_v62, %v4754_v6 }
 0xf0e   : > { %v2669_v9 = vpop.xlane.xlu0 %2668  ;;  %v2675_v4 = vpop.xlane.xlu1 %2674 }
 0xf0f   : > { %v2690_v14 = vmul.f32 0.03125, %v2669_v9  ;;  %v2692_v23 = vmul.f32 0.03125, %v2675_v4 }
 0xf11   : > { %v3694_v25 = vpop.eup %3693  ;;  %v2708_v7 = vsub.f32 %v2690_v14, %v2699_v48  ;;  %v2710_v63 = vsub.f32 %v2692_v23, %v2701_v60 }
 0xf12   : > { %v2751_v17 = vmul.f32 %v3694_v25, %v2724_v61  ;;  %v2672_v8 = vpop.xlane.xlu0 %2671  ;;  %v2636_v21 = vpop.xlane.xlu1 %2635 }
 0xf13   : > { %v2717_v56 = vmax.f32 %v2708_v7, 0.0  ;;  %v2719_v38 = vmax.f32 %v2710_v63, 0.0  ;;  %v2691_v24 = vmul.f32 0.03125, %v2672_v8  ;;  %v4775_v41 = vmul.f32 0.03125, %v2636_v21 }
 0xf14   : > { %v2766_v57 = vmul.f32 %v4766_v10, %v2751_v17  ;;  %v2727_v7 = vsub.f32 %v4704_v3, %v4756_v18 }
 0xf15   : > { %v3696_v44 = vpop.eup %3695  ;;  %v2735_v28 = vadd.f32 1e-05, %v2717_v56  ;;  %v2737_v42 = vadd.f32 1e-05, %v2719_v38  ;;  %v2709_v26 = vsub.f32 %v2691_v24, %v2700_v46  ;;  %v2703_v12 = vmul.f32 %v4775_v41, %v4775_v41 }
 0xf16   : > { %v2781_v22 = vadd.f32 %v4773_v50, %v2766_v57  ;;  %v2752_v27 = vmul.f32 %v3696_v44, %v2725_v39  ;;  %v2633_v13 = vpop.xlane.xlu0 %2632  ;;  %v2681_v2 = vpop.xlane.xlu1 %2680  ;;  %v2730_v18 = vsub.f32 %v4722_v31, %v4775_v41 }
 0xf17   : > { %3697 = vrsqrt.f32 %v2735_v28  ;;  %v2718_v11 = vmax.f32 %v2709_v26, 0.0  ;;  %v4782_v15 = vmul.f32 0.03125, %v2633_v13  ;;  %v2694_v51 = vmul.f32 0.03125, %v2681_v2 }
 0xf18   : > { %2790 = vst.msk [vmem:[#allocation2] sm:$0xff] %vm609_vm3, %v2781_v22  ;;  %v2767_v49 = vmul.f32 %v4766_v10, %v2752_v27  ;;  %3699 = vrsqrt.f32 %v2737_v42 }
 0xf19   : > { %v2736_v53 = vadd.f32 1e-05, %v2718_v11  ;;  %v2712_v54 = vsub.f32 %v2694_v51, %v2703_v12  ;;  %v2702_v36 = vmul.f32 %v4782_v15, %v4782_v15  ;;  %v2729_v22 = vsub.f32 %v4724_v33, %v4782_v15 }
 0xf1a   : > { %v2782_v55 = vadd.f32 %v4773_v50, %v2767_v49  ;;  %v2678_v35 = vpop.xlane.xlu0 %2677  ;;  %v2642_v59 = vpop.xlane.xlu1 %2641 }
 0xf1b   : > { %3701 = vrsqrt.f32 %v2736_v53  ;;  %v2721_v29 = vmax.f32 %v2712_v54, 0.0  ;;  %v2693_v43 = vmul.f32 0.03125, %v2678_v35  ;;  %v2651_v4 = vmul.f32 0.03125, %v2642_v59 }
 0xf1c   : > { %2791 = vst.msk [vmem:[#allocation2 + $0x8] sm:$0xff] %vm609_vm3, %v2782_v55 }
 0xf1d   : > { %v2739_v20 = vadd.f32 1e-05, %v2721_v29  ;;  %v2711_v16 = vsub.f32 %v2693_v43, %v2702_v36  ;;  %v2705_v56 = vmul.f32 %v2651_v4, %v2651_v4  ;;  %v2732_v55 = vsub.f32 %v4731_v5, %v2651_v4 }
 0xf1e   : > { %v2639_v45 = vpop.xlane.xlu0 %2638 }
 0xf1f   : > { %3703 = vrsqrt.f32 %v2739_v20  ;;  %v2720_v30 = vmax.f32 %v2711_v16, 0.0  ;;  %v2650_v1 = vmul.f32 0.03125, %v2639_v45  ;;  %v2799_v61 = vld [vmem:[#allocation2] sm:$0xff] }
 0xf21   : > { %v3698_v52 = vpop.eup %3697  ;;  %v2738_v37 = vadd.f32 1e-05, %v2720_v30  ;;  %v2704_v14 = vmul.f32 %v2650_v1, %v2650_v1  ;;  %v2731_v33 = vsub.f32 %v4738_v47, %v2650_v1 }
 0xf22   : > { %v3700_v32 = vpop.eup %3699  ;;  %v2753_v9 = vmul.f32 %v3698_v52, %v2726_v19  ;;  %v2684_v48 = vpop.xlane.xlu0 %2683 }
 0xf23   : > { %v2755_v60 = vmul.f32 %v3700_v32, %v2728_v34  ;;  %3705 = vrsqrt.f32 %v2738_v37  ;;  %v2695_v23 = vmul.f32 0.03125, %v2684_v48  ;;  %v2800_v25 = vld [vmem:[#allocation2 + $0x8] sm:$0xff] }
 0xf24   : > { %v2768_v58 = vmul.f32 %v4766_v10, %v2753_v9  ;;  %v2808_v40 = vpack.c.bf16 %v2800_v25, %v2799_v61 }
 0xf25   : > { %v3702_v63 = vpop.eup %3701  ;;  %v2770_v62 = vmul.f32 %v4766_v10, %v2755_v60  ;;  %v2713_v6 = vsub.f32 %v2695_v23, %v2704_v14 }
 0xf26   : > { %v2783_v17 = vadd.f32 %v4773_v50, %v2768_v58  ;;  %v2754_v46 = vmul.f32 %v3702_v63, %v2727_v7  ;;  %3437 = vmatmul.mubr.msk.bf16.vlgmr.msra.gmra.mrb[48].mxu1 %vm609_vm3, %v2808_v40  ;;  %v2687_v8 = vpop.xlane.xlu0 %2686 }
 0xf27   : > { %v2785_v21 = vadd.f32 %v4773_v50, %v2770_v62  ;;  %v2722_v38 = vmax.f32 %v2713_v6, 0.0  ;;  %v2696_v24 = vmul.f32 0.03125, %v2687_v8  ;;  %3440 = vmatprep.mubr.msk.bf16.mxu1 %vm3806_vm0, %v3805_v0 }
 0xf28   : > { %2792 = vst.msk [vmem:[#allocation2 + $0x10] sm:$0xff] %vm609_vm3, %v2783_v17  ;;  %v2769_v3 = vmul.f32 %v4766_v10, %v2754_v46 }
 0xf29   : > { %v3704_v39 = vpop.eup %3703  ;;  %2794 = vst.msk [vmem:[#allocation2 + $0x20] sm:$0xff] %vm609_vm3, %v2785_v21  ;;  %v2740_v57 = vadd.f32 1e-05, %v2722_v38  ;;  %v2714_v44 = vsub.f32 %v2696_v24, %v2705_v56 }
 0xf2a   : > { %v2784_v28 = vadd.f32 %v4773_v50, %v2769_v3  ;;  %v2757_v42 = vmul.f32 %v3704_v39, %v2730_v18 }
 0xf2b   : > { %3707 = vrsqrt.f32 %v2740_v57  ;;  %v2723_v26 = vmax.f32 %v2714_v44, 0.0 }
 0xf2c   : > { %2793 = vst.msk [vmem:[#allocation2 + $0x18] sm:$0xff] %vm609_vm3, %v2784_v28  ;;  %v2772_v27 = vmul.f32 %v4766_v10, %v2757_v42 }
 0xf2d   : > { %v3706_v12 = vpop.eup %3705  ;;  %v2741_v13 = vadd.f32 1e-05, %v2723_v26 }
 0xf2e   : > { %v2787_v31 = vadd.f32 %v4773_v50, %v2772_v27  ;;  %v2756_v41 = vmul.f32 %v3706_v12, %v2729_v22 }
 0xf2f   : > { %3709 = vrsqrt.f32 %v2741_v13  ;;  %v2801_v51 = vld [vmem:[#allocation2 + $0x10] sm:$0xff] }
 0xf30   : > { %2796 = vst.msk [vmem:[#allocation2 + $0x30] sm:$0xff] %vm609_vm3, %v2787_v31  ;;  %v2771_v2 = vmul.f32 %v4766_v10, %v2756_v41  ;;  %v2803_v20 = vld [vmem:[#allocation2 + $0x20] sm:$0xff] }
 0xf32   : > { %v2786_v11 = vadd.f32 %v4773_v50, %v2771_v2 }
 0xf33   : > { %v2802_v49 = vld [vmem:[#allocation2 + $0x18] sm:$0xff] }
 0xf34   : > { %2795 = vst.msk [vmem:[#allocation2 + $0x28] sm:$0xff] %vm609_vm3, %v2786_v11  ;;  %v2809_v15 = vpack.c.bf16 %v2802_v49, %v2801_v51 }
 0xf35   : > { %v3708_v53 = vpop.eup %3707 }
 0xf36   : > { %v2758_v54 = vmul.f32 %v3708_v53, %v2731_v33  ;;  %3441 = vmatmul.mubr.msk.bf16.gmra.mrb[52].mxu1 %vm609_vm3, %v2809_v15 }
 0xf37   : > { %3444 = vmatprep.mubr.msk.bf16.mxu1 %vm3806_vm0, %v3805_v0  ;;  %v2805_v5 = vld [vmem:[#allocation2 + $0x30] sm:$0xff] }
 0xf38   : > { %v2773_v35 = vmul.f32 %v4766_v10, %v2758_v54 }
 0xf39   : > { %v3710_v36 = vpop.eup %3709 }
 0xf3a   : > { %v2788_v29 = vadd.f32 %v4773_v50, %v2773_v35  ;;  %v2759_v43 = vmul.f32 %v3710_v36, %v2732_v55 }
 0xf3b   : > { %v2804_v16 = vld [vmem:[#allocation2 + $0x28] sm:$0xff] }
 0xf3c   : > { %2797 = vst.msk [vmem:[#allocation2 + $0x38] sm:$0xff] %vm609_vm3, %v2788_v29  ;;  %v2774_v47 = vmul.f32 %v4766_v10, %v2759_v43  ;;  %v2810_v45 = vpack.c.bf16 %v2804_v16, %v2803_v20 }
 0xf3e   : > { %v2789_v30 = vadd.f32 %v4773_v50, %v2774_v47  ;;  %3445 = vmatmul.mubr.msk.bf16.gmra.mrb[56].mxu1 %vm609_vm3, %v2810_v45  ;;  %v3146_v50 = vld [vmem:[%s4876_s13] ss:$0 sm:$0xff] }
 0xf3f   : > { %3448 = vmatprep.mubr.msk.bf16.mxu1 %vm3806_vm0, %v3805_v0 }
 0xf40   : > { %2798 = vst.msk [vmem:[#allocation2 + $0x40] sm:$0xff] %vm609_vm3, %v2789_v30 }
 0xf43   : > { %v2806_v59 = vld [vmem:[#allocation2 + $0x38] sm:$0xff] }
 0xf44   : > { %v2811_v1 = vpack.c.bf16 %v2806_v59, %v2805_v5 }
 0xf46   : > { %3449 = vmatmul.mubr.msk.bf16.gmra.mrb[60].mxu1 %vm609_vm3, %v2811_v1 }
 0xf47   : > { %3452 = vmatprep.mubr.msk.bf16.mxu1 %vm3806_vm0, %v3805_v0  ;;  %v2807_v19 = vld [vmem:[#allocation2 + $0x40] sm:$0xff] }
 0xf48   : > { %v2812_v10 = vpack.c.bf16 %v2807_v19, %v2807_v19 }
 0xf4e   : > { %3453 = vmatmul.mubr.msk.bf16.gmra.mrb[64].mxu1 %vm609_vm3, %v2812_v10 }
 0xff9   : > { %v2886_v52 = vpop.f32.mrb[48].mxu1 }
 0xffa   : > { %v2887_v0 = vadd.f32 %v3146_v50, %v2886_v52  ;;  %v3438_v34 = vpop.f32.mrb[49].mxu1 }
 0xffb   : > { %v2889_v37 = vpop.f32.mrb[50].mxu1 }
 0xffc   : > { %2924 = vst [vmem:[%s4843_s26] sm:$0xff] %v2887_v0  ;;  %v2890_v32 = vadd.f32 %v3146_v50, %v2889_v37  ;;  %v3439_v9 = vpop.f32.mrb[51].mxu1 }
 0xffe   : > { %2925 = vst [vmem:[%s4843_s26 + $0x8] sm:$0xff] %v2890_v32 }
0x1009   : > { %v2894_v4 = vpop.f32.mrb[52].mxu1 }
0x100a   : > { %v2895_v48 = vadd.f32 %v3146_v50, %v2894_v4  ;;  %v3442_v60 = vpop.f32.mrb[53].mxu1 }
0x100b   : > { %v2897_v14 = vpop.f32.mrb[54].mxu1 }
0x100c   : > { %2926 = vst [vmem:[%s4843_s26 + $0x10] sm:$0xff] %v2895_v48  ;;  %v2898_v23 = vadd.f32 %v3146_v50, %v2897_v14  ;;  %v3443_v61 = vpop.f32.mrb[55].mxu1 }
0x100e   : > { %2927 = vst [vmem:[%s4843_s26 + $0x18] sm:$0xff] %v2898_v23 }
0x1011   : > { %v2902_v25 = vpop.f32.mrb[56].mxu1 }
0x1012   : > { %v2903_v7 = vadd.f32 %v3146_v50, %v2902_v25  ;;  %v3446_v58 = vpop.f32.mrb[57].mxu1 }
0x1013   : > { %v2905_v40 = vpop.f32.mrb[58].mxu1 }
0x1014   : > { %2928 = vst [vmem:[%s4843_s26 + $0x20] sm:$0xff] %v2903_v7  ;;  %v2906_v63 = vadd.f32 %v3146_v50, %v2905_v40  ;;  %v3447_v62 = vpop.f32.mrb[59].mxu1 }
0x1016   : > { %2929 = vst [vmem:[%s4843_s26 + $0x28] sm:$0xff] %v2906_v63 }
0x1019   : > { %v2910_v6 = vpop.f32.mrb[60].mxu1 }
0x101a   : > { %v2911_v17 = vadd.f32 %v3146_v50, %v2910_v6  ;;  %v3450_v46 = vpop.f32.mrb[61].mxu1 }
0x101b   : > { %v2913_v8 = vpop.f32.mrb[62].mxu1 }
0x101c   : > { %2930 = vst [vmem:[%s4843_s26 + $0x30] sm:$0xff] %v2911_v17  ;;  %v2914_v21 = vadd.f32 %v3146_v50, %v2913_v8  ;;  %v3451_v56 = vpop.f32.mrb[63].mxu1 }
0x101e   : > { %2931 = vst [vmem:[%s4843_s26 + $0x38] sm:$0xff] %v2914_v21 }
0x1021   : > { %v2918_v38 = vpop.f32.mrb[64].mxu1 }
0x1022   : > { %v2919_v24 = vadd.f32 %v3146_v50, %v2918_v38  ;;  %v3454_v3 = vpop.f32.mrb[65].mxu1 }
0x1023   : > { %v2921_v18 = vpop.f32.mrb[66].mxu1 }
0x1024   : > { %2932 = vst [vmem:[%s4843_s26 + $0x40] sm:$0xff] %v2919_v24  ;;  %v3455_v39 = vpop.f32.mrb[67].mxu1 }
0x1025 PF: > { %s4893_s29 = sld [smem:[#allocation10_spill]]  ;;  %s4895_s30 = sld [smem:[#allocation11_spill]] }
0x102b   : > { %s26_s15 = sadd.s32 1, %s4893_s29   ;;  %s4894_s29 = sld [smem:[#allocation9_spill]] }
0x102c   : > { %p23_p6 = scmp.ge.s32.totalorder %s26_s15, 4  }
0x102e   :  { %25 = sbr.rel (!%p23_p6) target bundleno = 5 (0x5), region = 133 }
0x1035   :  { %2960 = vsyncpa [#allocation4], 1 }
0x1036   :  { %2962 = vsyncpa [#allocation4 + $0x1], 1 }
0x1037   :  { %2963 = vsyncpa [#allocation6], 1 }

</bundles_post_ra>
